<compile_context>
chip_gen: v7x
topology: tpu7x:2x2x1
jax: 0.10.0
libtpu: 0.0.40
codegen_flags: <defaults>
</compile_context>

<pallas_src>
import jax
import jax.numpy as jnp
from jax.experimental import pallas as pl
from jax.experimental.pallas import tpu as pltpu


# ---------------------------------------------------------------------------
# Fused forward kernel: one batch element per grid step, whole network in VMEM.
# ---------------------------------------------------------------------------
def _cnn1d_fused_kernel(x_ref, alphas_ref,
                        w1_ref, b1_ref, w2_ref, b2_ref, w3_ref, b3_ref,
                        wd2_ref, bd2_ref, wd3_ref, bd3_ref, wd4_ref, bd4_ref,
                        o_ref, h1_ref, h2_ref):
    highest = jax.lax.Precision.HIGHEST

    def prelu(v, a):
        return jnp.where(v > 0, v, v * a)

    a_c1 = alphas_ref[0]
    a_c2 = alphas_ref[1]
    a_c3 = alphas_ref[2]
    a_d2 = alphas_ref[3]
    a_d3 = alphas_ref[4]
    a_d4 = alphas_ref[5]
    a_out = alphas_ref[6]

    # ---- c1: Conv1d(1 -> 32, K=3, s=1).  BN1 already folded into (w1, b1).
    #      Cin=1 contraction = outer product -> VPU broadcast FMA, no MXU.
    x = x_ref[0]                                            # (128, 1)
    acc = x[0:126, :] * w1_ref[0:1, :]                      # (126,1)*(1,32) -> (126,32)
    acc = acc + x[1:127, :] * w1_ref[1:2, :]
    acc = acc + x[2:128, :] * w1_ref[2:3, :]
    h1 = prelu(acc + b1_ref[...], a_c1)                     # (126, 32)
    h1_ref[...] = h1

    # MaxPool1d(2) fused with the stride-2 phase split needed by c2:
    #   pooled[m] = max(h1[2m], h1[2m+1]);  even phase = pooled[2j], odd = pooled[2j+1]
    h1_even = jnp.maximum(h1_ref[pl.ds(0, 32, 4), :], h1_ref[pl.ds(1, 32, 4), :])  # (32, 32)
    h1_odd = jnp.maximum(h1_ref[pl.ds(2, 31, 4), :], h1_ref[pl.ds(3, 31, 4), :])   # (31, 32)

    # ---- c2: Conv1d(32 -> 64, K=5, s=2) as ONE im2col matmul (depth 5*32 = 160).
    lhs2 = jnp.concatenate(
        [h1_even[0:30, :], h1_odd[0:30, :], h1_even[1:31, :],
         h1_odd[1:31, :], h1_even[2:32, :]], axis=-1)       # (30, 160)
    h2 = jnp.dot(lhs2, w2_ref[...], precision=highest,
                 preferred_element_type=jnp.float32) + b2_ref[...]
    h2 = prelu(h2, a_c2)                                    # (30, 64)
    h2_ref[...] = h2

    h2_even = jnp.maximum(h2_ref[pl.ds(0, 8, 4), :], h2_ref[pl.ds(1, 8, 4), :])    # (8, 64)
    h2_odd = jnp.maximum(h2_ref[pl.ds(2, 7, 4), :], h2_ref[pl.ds(3, 7, 4), :])     # (7, 64)

    # ---- c3: Conv1d(64 -> 128, K=5, s=2) as ONE im2col matmul (depth 5*64 = 320).
    lhs3 = jnp.concatenate(
        [h2_even[0:6, :], h2_odd[0:6, :], h2_even[1:7, :],
         h2_odd[1:7, :], h2_even[2:8, :]], axis=-1)         # (6, 320)
    h3 = jnp.dot(lhs3, w3_ref[...], precision=highest,
                 preferred_element_type=jnp.float32) + b3_ref[...]
    h3 = prelu(h3, a_c3)                                    # (6, 128)

    # ---- MaxPool1d(2): 6 -> 3 positions, then flatten via lane-aligned concat.
    p0 = jnp.maximum(h3[0:1, :], h3[1:2, :])                # (1, 128)
    p1 = jnp.maximum(h3[2:3, :], h3[3:4, :])
    p2 = jnp.maximum(h3[4:5, :], h3[5:6, :])
    # wd2 rows were pre-permuted so this channels-last flatten (index = l*128 + c)
    # matches torch.nn.Flatten on (B, C, L) exactly.
    c_flat = jnp.concatenate([p0, p1, p2], axis=-1)         # (1, 384)

    # ---- dense head (dropouts are identity in eval mode)
    d2 = prelu(jnp.dot(c_flat, wd2_ref[...], precision=highest,
                       preferred_element_type=jnp.float32) + bd2_ref[...], a_d2)
    d3 = prelu(jnp.dot(d2, wd3_ref[...], precision=highest,
                       preferred_element_type=jnp.float32) + bd3_ref[...], a_d3)
    d4 = prelu(jnp.dot(d3, wd4_ref[...], precision=highest,
                       preferred_element_type=jnp.float32) + bd4_ref[...], a_d4)
    logits = prelu(d4, a_out)                               # self.acti

    m = jnp.max(logits, axis=-1, keepdims=True)             # Softmax(dim=1)
    e = jnp.exp(logits - m)
    o_ref[0] = (e / jnp.sum(e, axis=-1, keepdims=True)).astype(o_ref.dtype)


def cnn1d_forward(x, prepped):
    """x: (B, 128) float32.  prepped: dict from prepare_params()."""
    B, L = x.shape
    if L != 128:
        raise ValueError("CNN1D head is hard-coded for input length 128 (384 features).")
    num_classes = prepped["wd4"].shape[1]
    x3 = x.astype(jnp.float32).reshape(B, L, 1)             # channels-last (B, L, 1)

    weight_names = ["w1", "b1", "w2", "b2", "w3", "b3",
                    "wd2", "bd2", "wd3", "bd3", "wd4", "bd4"]
    weights = [prepped[n] for n in weight_names]

    def _bcast_spec(arr):
        nd = arr.ndim
        return pl.BlockSpec(arr.shape, lambda i, nd=nd: (0,) * nd)

    out = pl.pallas_call(
        _cnn1d_fused_kernel,
        out_shape=jax.ShapeDtypeStruct((B, 1, num_classes), jnp.float32),
        grid=(B,),
        in_specs=[
            pl.BlockSpec((1, L, 1), lambda i: (i, 0, 0)),                    # x (per sample)
            pl.BlockSpec(memory_space=pltpu.MemorySpace.SMEM),               # PReLU alphas
        ] + [_bcast_spec(w) for w in weights],
        out_specs=pl.BlockSpec((1, 1, num_classes), lambda i: (i, 0, 0)),
        scratch_shapes=[
            pltpu.VMEM((126, 32), jnp.float32),   # c1 pre-pool activations
            pltpu.VMEM((30, 64), jnp.float32),    # c2 pre-pool activations
        ],
        compiler_params=pltpu.CompilerParams(
            dimension_semantics=("parallel",)),
    )(x3, prepped["alphas"], *weights)
    return out[:, 0, :]


# ---------------------------------------------------------------------------
# Parameter prep: fold BN into conv weights, im2col-reshape weights, fold the
# torch Flatten ordering into the d2 weight, collect PReLU alphas for SMEM.
# ---------------------------------------------------------------------------
def prepare_params(raw_params):
    conv_layers, dense_layers, a_acti = raw_params

    folded = []
    for layer in conv_layers:
        s = layer["gamma"] / jnp.sqrt(layer["var"] + layer["eps"])   # BN eval scale
        t = layer["beta"] - layer["mean"] * s                        # BN eval shift
        w = layer["w"]                                               # (Cout, Cin, K)
        wf = w * s[None, :, None]                                    # fold scale into taps
        bf = layer["b"] + jnp.einsum("ock,c->o", w, t)               # fold shift into bias
        folded.append((wf, bf))

    def im2col_weight(wf):
        cout, cin, ksz = wf.shape
        # row index = k * Cin + c  (matches the kernel's tap-concat order)
        return jnp.transpose(wf, (2, 1, 0)).reshape(ksz * cin, cout)

    (w1f, b1f), (w2f, b2f), (w3f, b3f) = folded
    d2, d3, d4 = dense_layers

    # torch Flatten on (B, C=128, L=3) -> feature index c*3+l; the kernel flattens
    # channels-last -> index l*128+c.  Permute d2's rows once, host-side.
    wd2 = d2["w"].T                                                  # (384, 256) rows = c*3+l
    wd2 = wd2.reshape(128, 3, -1).transpose(1, 0, 2).reshape(384, -1)  # rows = l*128+c

    alphas = jnp.stack([conv_layers[0]["alpha"], conv_layers[1]["alpha"],
                        conv_layers[2]["alpha"], d2["alpha"], d3["alpha"],
                        d4["alpha"], a_acti]).astype(jnp.float32)

    return dict(
        w1=jnp.transpose(w1f, (2, 1, 0))[:, 0, :],   # (3, 32)  (Cin = 1 squeezed)
        b1=b1f.reshape(1, -1),
        w2=im2col_weight(w2f), b2=b2f.reshape(1, -1),
        w3=im2col_weight(w3f), b3=b3f.reshape(1, -1),
        wd2=wd2, bd2=d2["b"].reshape(1, -1),
        wd3=d3["w"].T, bd3=d3["b"].reshape(1, -1),
        wd4=d4["w"].T, bd4=d4["b"].reshape(1, -1),
        alphas=alphas)


# ---------------------------------------------------------------------------
# Pure-JAX reference (faithful to the PyTorch module, NCL layout, unfolded params)
# ---------------------------------------------------------------------------
def cnn1d_ref(x, raw_params):
    conv_layers, dense_layers, a_acti = raw_params
    hp = jax.lax.Precision.HIGHEST
    h = x[:, None, :].astype(jnp.float32)                    # (B, 1, L) NCL
    for layer in conv_layers:
        s = layer["gamma"] / jnp.sqrt(layer["var"] + layer["eps"])
        t = layer["beta"] - layer["mean"] * s
        hb = h * s[None, :, None] + t[None, :, None]         # BatchNorm1d (eval)
        w, b, stride = layer["w"], layer["b"], layer["stride"]
        cout, cin, ksz = w.shape
        bsz, _, lin = hb.shape
        lc = (lin - ksz) // stride + 1
        acc = jnp.zeros((bsz, cout, lc), jnp.float32)
        for k in range(ksz):                                  # Conv1d
            xs = jax.lax.slice(hb, (0, 0, k),
                               (bsz, cin, k + stride * (lc - 1) + 1),
                               (1, 1, stride))
            acc = acc + jnp.einsum("bcl,oc->bol", xs, w[:, :, k], precision=hp)
        acc = acc + b[None, :, None]
        acc = jnp.where(acc > 0, acc, layer["alpha"] * acc)   # PReLU
        lp = lc // 2
        h = acc[:, :, :2 * lp].reshape(bsz, cout, lp, 2).max(axis=-1)  # MaxPool1d(2)

    c = h.reshape(h.shape[0], -1)                             # Flatten on (B, C, L)

    def prelu(v, a):
        return jnp.where(v > 0, v, a * v)

    d = c
    for layer in dense_layers:                                # Dense: Linear + PReLU
        d = prelu(jnp.dot(d, layer["w"].T, precision=hp) + layer["b"], layer["alpha"])
    d = prelu(d, a_acti)                                      # self.acti
    return jax.nn.softmax(d, axis=1)


# ---------------------------------------------------------------------------
# Deterministic parameter init in PyTorch layout (shapes follow CNN1D.__init__)
# ---------------------------------------------------------------------------
def init_raw_params(key, num_classes):
    conv_cfg = [(1, 32, 3, 1), (32, 64, 5, 2), (64, 128, 5, 2)]
    eps = 1e-5
    conv_layers = []
    for cin, cout, ksize, stride in conv_cfg:
        key, k0, k1, k2, k3, k4, k5 = jax.random.split(key, 7)
        conv_layers.append(dict(
            gamma=1.0 + 0.1 * jax.random.normal(k0, (cin,), jnp.float32),
            beta=0.1 * jax.random.normal(k1, (cin,), jnp.float32),
            mean=0.1 * jax.random.normal(k2, (cin,), jnp.float32),
            var=jax.random.uniform(k3, (cin,), jnp.float32, 0.5, 1.5),
            eps=eps,
            w=jax.random.normal(k4, (cout, cin, ksize), jnp.float32) / jnp.sqrt(cin * ksize),
            b=0.1 * jax.random.normal(k5, (cout,), jnp.float32),
            alpha=jnp.float32(0.25),
            stride=stride))

    dense_cfg = [(384, 256), (256, 64), (64, num_classes)]
    dense_layers = []
    for fin, fout in dense_cfg:
        key, k0, k1 = jax.random.split(key, 3)
        dense_layers.append(dict(
            w=jax.random.normal(k0, (fout, fin), jnp.float32) / jnp.sqrt(fin),
            b=0.1 * jax.random.normal(k1, (fout,), jnp.float32),
            alpha=jnp.float32(0.25)))
    a_acti = jnp.float32(0.25)
    return conv_layers, dense_layers, a_acti


if __name__ == "__main__":
    B, L, num_classes = 2, 128, 5          # L=128 -> 126 -> 63 -> 30 -> 15 -> 6 -> 3, C=128
    key = jax.random.PRNGKey(0)
    kx, kp = jax.random.split(key)
    x = jax.random.normal(kx, (B, L), jnp.float32)

    raw = init_raw_params(kp, num_classes)
    prepped = prepare_params(raw)

    fwd = jax.jit(lambda xi: cnn1d_forward(xi, prepped))
    out = jax.block_until_ready(fwd(x))

    ref = cnn1d_ref(x, raw)
    assert out.shape == (B, num_classes), out.shape
    assert bool(jnp.all(jnp.isfinite(out)))
    assert bool(jnp.allclose(jnp.sum(out, axis=1), 1.0, atol=1e-4))
    assert bool(jnp.allclose(out, ref, atol=5e-3, rtol=5e-3)), (out, ref)
    print("KERNEL_OK")
</pallas_src>

<mosaic_0001>
module attributes {stable_mosaic.version = 11 : i64} {
  func.func @_cnn1d_fused_kernel(%arg0: i32, %arg1: memref<1x128x1xf32, #tpu.memory_space<vmem>>, %arg2: memref<7xf32, #tpu.memory_space<smem>>, %arg3: memref<3x32xf32, #tpu.memory_space<vmem>>, %arg4: memref<1x32xf32, #tpu.memory_space<vmem>>, %arg5: memref<160x64xf32, #tpu.memory_space<vmem>>, %arg6: memref<1x64xf32, #tpu.memory_space<vmem>>, %arg7: memref<320x128xf32, #tpu.memory_space<vmem>>, %arg8: memref<1x128xf32, #tpu.memory_space<vmem>>, %arg9: memref<384x256xf32, #tpu.memory_space<vmem>>, %arg10: memref<1x256xf32, #tpu.memory_space<vmem>>, %arg11: memref<256x64xf32, #tpu.memory_space<vmem>>, %arg12: memref<1x64xf32, #tpu.memory_space<vmem>>, %arg13: memref<64x5xf32, #tpu.memory_space<vmem>>, %arg14: memref<1x5xf32, #tpu.memory_space<vmem>>, %arg15: memref<1x1x5xf32, #tpu.memory_space<vmem>>, %arg16: memref<126x32xf32, #tpu.memory_space<vmem>>, %arg17: memref<30x64xf32, #tpu.memory_space<vmem>>) attributes {dimension_semantics = [#tpu.dimension_semantics<parallel>], iteration_bounds = array<i64: 2>, scalar_prefetch = 0 : i64, scratch_operands = 2 : i64, tpu.core_type = #tpu.core_type<tc>, window_params = [{transform_indices = @transform_0, window_bounds = array<i64: 1, 128, 1>}, {transform_indices = @transform_1, window_bounds = array<i64: 7>}, {pipeline_mode = #tpu.pipeline_mode<synchronous>, transform_indices = @transform_2, window_bounds = array<i64: 3, 32>}, {pipeline_mode = #tpu.pipeline_mode<synchronous>, transform_indices = @transform_3, window_bounds = array<i64: 1, 32>}, {pipeline_mode = #tpu.pipeline_mode<synchronous>, transform_indices = @transform_4, window_bounds = array<i64: 160, 64>}, {pipeline_mode = #tpu.pipeline_mode<synchronous>, transform_indices = @transform_5, window_bounds = array<i64: 1, 64>}, {pipeline_mode = #tpu.pipeline_mode<synchronous>, transform_indices = @transform_6, window_bounds = array<i64: 320, 128>}, {pipeline_mode = #tpu.pipeline_mode<synchronous>, transform_indices = @transform_7, window_bounds = array<i64: 1, 128>}, {pipeline_mode = #tpu.pipeline_mode<synchronous>, transform_indices = @transform_8, window_bounds = array<i64: 384, 256>}, {pipeline_mode = #tpu.pipeline_mode<synchronous>, transform_indices = @transform_9, window_bounds = array<i64: 1, 256>}, {pipeline_mode = #tpu.pipeline_mode<synchronous>, transform_indices = @transform_10, window_bounds = array<i64: 256, 64>}, {pipeline_mode = #tpu.pipeline_mode<synchronous>, transform_indices = @transform_11, window_bounds = array<i64: 1, 64>}, {pipeline_mode = #tpu.pipeline_mode<synchronous>, transform_indices = @transform_12, window_bounds = array<i64: 64, 5>}, {pipeline_mode = #tpu.pipeline_mode<synchronous>, transform_indices = @transform_13, window_bounds = array<i64: 1, 5>}, {transform_indices = @transform_14, window_bounds = array<i64: 1, 1, 5>}]} {
    %c0 = arith.constant 0 : index
    %0 = memref.load %arg2[%c0] : memref<7xf32, #tpu.memory_space<smem>>
    %c1 = arith.constant 1 : index
    %1 = memref.load %arg2[%c1] : memref<7xf32, #tpu.memory_space<smem>>
    %c2 = arith.constant 2 : index
    %2 = memref.load %arg2[%c2] : memref<7xf32, #tpu.memory_space<smem>>
    %c3 = arith.constant 3 : index
    %3 = memref.load %arg2[%c3] : memref<7xf32, #tpu.memory_space<smem>>
    %c4 = arith.constant 4 : index
    %4 = memref.load %arg2[%c4] : memref<7xf32, #tpu.memory_space<smem>>
    %c5 = arith.constant 5 : index
    %5 = memref.load %arg2[%c5] : memref<7xf32, #tpu.memory_space<smem>>
    %c6 = arith.constant 6 : index
    %6 = memref.load %arg2[%c6] : memref<7xf32, #tpu.memory_space<smem>>
    %c0_0 = arith.constant 0 : index
    %c0_1 = arith.constant 0 : index
    %c0_2 = arith.constant 0 : index
    %7 = vector.load %arg1[%c0_0, %c0_1, %c0_2] : memref<1x128x1xf32, #tpu.memory_space<vmem>>, vector<1x128x1xf32>
    %8 = vector.shape_cast %7 : vector<1x128x1xf32> to vector<128x1xf32>
    %9 = vector.extract_strided_slice %8 {offsets = [0, 0], sizes = [126, 1], strides = [1, 1]} : vector<128x1xf32> to vector<126x1xf32>
    %c0_3 = arith.constant 0 : index
    %c0_4 = arith.constant 0 : index
    %10 = vector.load %arg3[%c0_3, %c0_4] : memref<3x32xf32, #tpu.memory_space<vmem>>, vector<1x32xf32>
    %11 = vector.broadcast %9 : vector<126x1xf32> to vector<126x32xf32>
    %12 = vector.broadcast %10 : vector<1x32xf32> to vector<126x32xf32>
    %13 = arith.mulf %11, %12 : vector<126x32xf32>
    %14 = vector.extract_strided_slice %8 {offsets = [1, 0], sizes = [126, 1], strides = [1, 1]} : vector<128x1xf32> to vector<126x1xf32>
    %c1_5 = arith.constant 1 : index
    %c0_6 = arith.constant 0 : index
    %15 = vector.load %arg3[%c1_5, %c0_6] : memref<3x32xf32, #tpu.memory_space<vmem>>, vector<1x32xf32>
    %16 = vector.broadcast %14 : vector<126x1xf32> to vector<126x32xf32>
    %17 = vector.broadcast %15 : vector<1x32xf32> to vector<126x32xf32>
    %18 = arith.mulf %16, %17 : vector<126x32xf32>
    %19 = arith.addf %13, %18 : vector<126x32xf32>
    %20 = vector.extract_strided_slice %8 {offsets = [2, 0], sizes = [126, 1], strides = [1, 1]} : vector<128x1xf32> to vector<126x1xf32>
    %c2_7 = arith.constant 2 : index
    %c0_8 = arith.constant 0 : index
    %21 = vector.load %arg3[%c2_7, %c0_8] : memref<3x32xf32, #tpu.memory_space<vmem>>, vector<1x32xf32>
    %22 = vector.broadcast %20 : vector<126x1xf32> to vector<126x32xf32>
    %23 = vector.broadcast %21 : vector<1x32xf32> to vector<126x32xf32>
    %24 = arith.mulf %22, %23 : vector<126x32xf32>
    %25 = arith.addf %19, %24 : vector<126x32xf32>
    %c0_9 = arith.constant 0 : index
    %c0_10 = arith.constant 0 : index
    %26 = vector.load %arg4[%c0_9, %c0_10] : memref<1x32xf32, #tpu.memory_space<vmem>>, vector<1x32xf32>
    %27 = vector.broadcast %26 : vector<1x32xf32> to vector<126x32xf32>
    %28 = arith.addf %25, %27 : vector<126x32xf32>
    %cst = arith.constant 0.000000e+00 : f32
    %29 = vector.broadcast %cst : f32 to vector<126x32xf32>
    %30 = arith.cmpf ogt, %28, %29 : vector<126x32xf32>
    %31 = vector.broadcast %0 : f32 to vector<126x32xf32>
    %32 = arith.mulf %28, %31 : vector<126x32xf32>
    %33 = arith.select %30, %28, %32 : vector<126x32xi1>, vector<126x32xf32>
    %c0_11 = arith.constant 0 : index
    %c0_12 = arith.constant 0 : index
    %34 = vector.load %arg16[%c0_11, %c0_12] : memref<126x32xf32, #tpu.memory_space<vmem>>, vector<126x32xf32>
    tpu.vector_store %arg16[%c0_11, %c0_12], %33 {strides = array<i32>} : memref<126x32xf32, #tpu.memory_space<vmem>>, vector<126x32xf32>,
    %c0_13 = arith.constant 0 : index
    %c0_14 = arith.constant 0 : index
    %35 = tpu.strided_load %arg16[%c0_13, %c0_14] {strides = array<i32: 4, 1>} : memref<126x32xf32, #tpu.memory_space<vmem>>, vector<32x32xf32>
    %c1_15 = arith.constant 1 : index
    %c0_16 = arith.constant 0 : index
    %36 = tpu.strided_load %arg16[%c1_15, %c0_16] {strides = array<i32: 4, 1>} : memref<126x32xf32, #tpu.memory_space<vmem>>, vector<32x32xf32>
    %37 = arith.maximumf %35, %36 : vector<32x32xf32>
    %c2_17 = arith.constant 2 : index
    %c0_18 = arith.constant 0 : index
    %38 = tpu.strided_load %arg16[%c2_17, %c0_18] {strides = array<i32: 4, 1>} : memref<126x32xf32, #tpu.memory_space<vmem>>, vector<31x32xf32>
    %c3_19 = arith.constant 3 : index
    %c0_20 = arith.constant 0 : index
    %39 = tpu.strided_load %arg16[%c3_19, %c0_20] {strides = array<i32: 4, 1>} : memref<126x32xf32, #tpu.memory_space<vmem>>, vector<31x32xf32>
    %40 = arith.maximumf %38, %39 : vector<31x32xf32>
    %41 = vector.extract_strided_slice %37 {offsets = [0, 0], sizes = [30, 32], strides = [1, 1]} : vector<32x32xf32> to vector<30x32xf32>
    %42 = vector.extract_strided_slice %40 {offsets = [0, 0], sizes = [30, 32], strides = [1, 1]} : vector<31x32xf32> to vector<30x32xf32>
    %43 = vector.extract_strided_slice %37 {offsets = [1, 0], sizes = [30, 32], strides = [1, 1]} : vector<32x32xf32> to vector<30x32xf32>
    %44 = vector.extract_strided_slice %40 {offsets = [1, 0], sizes = [30, 32], strides = [1, 1]} : vector<31x32xf32> to vector<30x32xf32>
    %45 = vector.extract_strided_slice %37 {offsets = [2, 0], sizes = [30, 32], strides = [1, 1]} : vector<32x32xf32> to vector<30x32xf32>
    %46 = tpu.concatenate %41, %42, %43, %44, %45 in 1 : vector<30x32xf32>, vector<30x32xf32>, vector<30x32xf32>, vector<30x32xf32>, vector<30x32xf32> -> vector<30x160xf32>
    %c0_21 = arith.constant 0 : index
    %c0_22 = arith.constant 0 : index
    %47 = vector.load %arg5[%c0_21, %c0_22] : memref<160x64xf32, #tpu.memory_space<vmem>>, vector<160x64xf32>
    %cst_23 = arith.constant dense<0.000000e+00> : vector<30x64xf32>
    %48 = tpu.matmul %46, %47, %cst_23 {dimension_numbers = #tpu.dot_dimension_numbers<[1], [0], [0], [1], [0, 0, 1, 1], [], []>, precision = #tpu.contract_precision<fp32>} : vector<30x160xf32>, vector<160x64xf32>, vector<30x64xf32> -> vector<30x64xf32>
    %c0_24 = arith.constant 0 : index
    %c0_25 = arith.constant 0 : index
    %49 = vector.load %arg6[%c0_24, %c0_25] : memref<1x64xf32, #tpu.memory_space<vmem>>, vector<1x64xf32>
    %50 = vector.broadcast %49 : vector<1x64xf32> to vector<30x64xf32>
    %51 = arith.addf %48, %50 : vector<30x64xf32>
    %cst_26 = arith.constant 0.000000e+00 : f32
    %52 = vector.broadcast %cst_26 : f32 to vector<30x64xf32>
    %53 = arith.cmpf ogt, %51, %52 : vector<30x64xf32>
    %54 = vector.broadcast %1 : f32 to vector<30x64xf32>
    %55 = arith.mulf %51, %54 : vector<30x64xf32>
    %56 = arith.select %53, %51, %55 : vector<30x64xi1>, vector<30x64xf32>
    %c0_27 = arith.constant 0 : index
    %c0_28 = arith.constant 0 : index
    %57 = vector.load %arg17[%c0_27, %c0_28] : memref<30x64xf32, #tpu.memory_space<vmem>>, vector<30x64xf32>
    tpu.vector_store %arg17[%c0_27, %c0_28], %56 {strides = array<i32>} : memref<30x64xf32, #tpu.memory_space<vmem>>, vector<30x64xf32>,
    %c0_29 = arith.constant 0 : index
    %c0_30 = arith.constant 0 : index
    %58 = tpu.strided_load %arg17[%c0_29, %c0_30] {strides = array<i32: 4, 1>} : memref<30x64xf32, #tpu.memory_space<vmem>>, vector<8x64xf32>
    %c1_31 = arith.constant 1 : index
    %c0_32 = arith.constant 0 : index
    %59 = tpu.strided_load %arg17[%c1_31, %c0_32] {strides = array<i32: 4, 1>} : memref<30x64xf32, #tpu.memory_space<vmem>>, vector<8x64xf32>
    %60 = arith.maximumf %58, %59 : vector<8x64xf32>
    %c2_33 = arith.constant 2 : index
    %c0_34 = arith.constant 0 : index
    %61 = tpu.strided_load %arg17[%c2_33, %c0_34] {strides = array<i32: 4, 1>} : memref<30x64xf32, #tpu.memory_space<vmem>>, vector<7x64xf32>
    %c3_35 = arith.constant 3 : index
    %c0_36 = arith.constant 0 : index
    %62 = tpu.strided_load %arg17[%c3_35, %c0_36] {strides = array<i32: 4, 1>} : memref<30x64xf32, #tpu.memory_space<vmem>>, vector<7x64xf32>
    %63 = arith.maximumf %61, %62 : vector<7x64xf32>
    %64 = vector.extract_strided_slice %60 {offsets = [0, 0], sizes = [6, 64], strides = [1, 1]} : vector<8x64xf32> to vector<6x64xf32>
    %65 = vector.extract_strided_slice %63 {offsets = [0, 0], sizes = [6, 64], strides = [1, 1]} : vector<7x64xf32> to vector<6x64xf32>
    %66 = vector.extract_strided_slice %60 {offsets = [1, 0], sizes = [6, 64], strides = [1, 1]} : vector<8x64xf32> to vector<6x64xf32>
    %67 = vector.extract_strided_slice %63 {offsets = [1, 0], sizes = [6, 64], strides = [1, 1]} : vector<7x64xf32> to vector<6x64xf32>
    %68 = vector.extract_strided_slice %60 {offsets = [2, 0], sizes = [6, 64], strides = [1, 1]} : vector<8x64xf32> to vector<6x64xf32>
    %69 = tpu.concatenate %64, %65, %66, %67, %68 in 1 : vector<6x64xf32>, vector<6x64xf32>, vector<6x64xf32>, vector<6x64xf32>, vector<6x64xf32> -> vector<6x320xf32>
    %c0_37 = arith.constant 0 : index
    %c0_38 = arith.constant 0 : index
    %70 = vector.load %arg7[%c0_37, %c0_38] : memref<320x128xf32, #tpu.memory_space<vmem>>, vector<320x128xf32>
    %cst_39 = arith.constant dense<0.000000e+00> : vector<6x128xf32>
    %71 = tpu.matmul %69, %70, %cst_39 {dimension_numbers = #tpu.dot_dimension_numbers<[1], [0], [0], [1], [0, 0, 1, 1], [], []>, precision = #tpu.contract_precision<fp32>} : vector<6x320xf32>, vector<320x128xf32>, vector<6x128xf32> -> vector<6x128xf32>
    %c0_40 = arith.constant 0 : index
    %c0_41 = arith.constant 0 : index
    %72 = vector.load %arg8[%c0_40, %c0_41] : memref<1x128xf32, #tpu.memory_space<vmem>>, vector<1x128xf32>
    %73 = vector.broadcast %72 : vector<1x128xf32> to vector<6x128xf32>
    %74 = arith.addf %71, %73 : vector<6x128xf32>
    %cst_42 = arith.constant 0.000000e+00 : f32
    %75 = vector.broadcast %cst_42 : f32 to vector<6x128xf32>
    %76 = arith.cmpf ogt, %74, %75 : vector<6x128xf32>
    %77 = vector.broadcast %2 : f32 to vector<6x128xf32>
    %78 = arith.mulf %74, %77 : vector<6x128xf32>
    %79 = arith.select %76, %74, %78 : vector<6x128xi1>, vector<6x128xf32>
    %80 = vector.extract_strided_slice %79 {offsets = [0, 0], sizes = [1, 128], strides = [1, 1]} : vector<6x128xf32> to vector<1x128xf32>
    %81 = vector.extract_strided_slice %79 {offsets = [1, 0], sizes = [1, 128], strides = [1, 1]} : vector<6x128xf32> to vector<1x128xf32>
    %82 = arith.maximumf %80, %81 : vector<1x128xf32>
    %83 = vector.extract_strided_slice %79 {offsets = [2, 0], sizes = [1, 128], strides = [1, 1]} : vector<6x128xf32> to vector<1x128xf32>
    %84 = vector.extract_strided_slice %79 {offsets = [3, 0], sizes = [1, 128], strides = [1, 1]} : vector<6x128xf32> to vector<1x128xf32>
    %85 = arith.maximumf %83, %84 : vector<1x128xf32>
    %86 = vector.extract_strided_slice %79 {offsets = [4, 0], sizes = [1, 128], strides = [1, 1]} : vector<6x128xf32> to vector<1x128xf32>
    %87 = vector.extract_strided_slice %79 {offsets = [5, 0], sizes = [1, 128], strides = [1, 1]} : vector<6x128xf32> to vector<1x128xf32>
    %88 = arith.maximumf %86, %87 : vector<1x128xf32>
    %89 = tpu.concatenate %82, %85, %88 in 1 : vector<1x128xf32>, vector<1x128xf32>, vector<1x128xf32> -> vector<1x384xf32>
    %c0_43 = arith.constant 0 : index
    %c0_44 = arith.constant 0 : index
    %90 = vector.load %arg9[%c0_43, %c0_44] : memref<384x256xf32, #tpu.memory_space<vmem>>, vector<384x256xf32>
    %cst_45 = arith.constant dense<0.000000e+00> : vector<1x256xf32>
    %91 = tpu.matmul %89, %90, %cst_45 {dimension_numbers = #tpu.dot_dimension_numbers<[1], [0], [0], [1], [0, 0, 1, 1], [], []>, precision = #tpu.contract_precision<fp32>} : vector<1x384xf32>, vector<384x256xf32>, vector<1x256xf32> -> vector<1x256xf32>
    %c0_46 = arith.constant 0 : index
    %c0_47 = arith.constant 0 : index
    %92 = vector.load %arg10[%c0_46, %c0_47] : memref<1x256xf32, #tpu.memory_space<vmem>>, vector<1x256xf32>
    %93 = arith.addf %91, %92 : vector<1x256xf32>
    %cst_48 = arith.constant 0.000000e+00 : f32
    %94 = vector.broadcast %cst_48 : f32 to vector<1x256xf32>
    %95 = arith.cmpf ogt, %93, %94 : vector<1x256xf32>
    %96 = vector.broadcast %3 : f32 to vector<1x256xf32>
    %97 = arith.mulf %93, %96 : vector<1x256xf32>
    %98 = arith.select %95, %93, %97 : vector<1x256xi1>, vector<1x256xf32>
    %c0_49 = arith.constant 0 : index
    %c0_50 = arith.constant 0 : index
    %99 = vector.load %arg11[%c0_49, %c0_50] : memref<256x64xf32, #tpu.memory_space<vmem>>, vector<256x64xf32>
    %cst_51 = arith.constant dense<0.000000e+00> : vector<1x64xf32>
    %100 = tpu.matmul %98, %99, %cst_51 {dimension_numbers = #tpu.dot_dimension_numbers<[1], [0], [0], [1], [0, 0, 1, 1], [], []>, precision = #tpu.contract_precision<fp32>} : vector<1x256xf32>, vector<256x64xf32>, vector<1x64xf32> -> vector<1x64xf32>
    %c0_52 = arith.constant 0 : index
    %c0_53 = arith.constant 0 : index
    %101 = vector.load %arg12[%c0_52, %c0_53] : memref<1x64xf32, #tpu.memory_space<vmem>>, vector<1x64xf32>
    %102 = arith.addf %100, %101 : vector<1x64xf32>
    %cst_54 = arith.constant 0.000000e+00 : f32
    %103 = vector.broadcast %cst_54 : f32 to vector<1x64xf32>
    %104 = arith.cmpf ogt, %102, %103 : vector<1x64xf32>
    %105 = vector.broadcast %4 : f32 to vector<1x64xf32>
    %106 = arith.mulf %102, %105 : vector<1x64xf32>
    %107 = arith.select %104, %102, %106 : vector<1x64xi1>, vector<1x64xf32>
    %c0_55 = arith.constant 0 : index
    %c0_56 = arith.constant 0 : index
    %108 = vector.load %arg13[%c0_55, %c0_56] : memref<64x5xf32, #tpu.memory_space<vmem>>, vector<64x5xf32>
    %cst_57 = arith.constant dense<0.000000e+00> : vector<1x5xf32>
    %109 = tpu.matmul %107, %108, %cst_57 {dimension_numbers = #tpu.dot_dimension_numbers<[1], [0], [0], [1], [0, 0, 1, 1], [], []>, precision = #tpu.contract_precision<fp32>} : vector<1x64xf32>, vector<64x5xf32>, vector<1x5xf32> -> vector<1x5xf32>
    %c0_58 = arith.constant 0 : index
    %c0_59 = arith.constant 0 : index
    %110 = vector.load %arg14[%c0_58, %c0_59] : memref<1x5xf32, #tpu.memory_space<vmem>>, vector<1x5xf32>
    %111 = arith.addf %109, %110 : vector<1x5xf32>
    %cst_60 = arith.constant 0.000000e+00 : f32
    %112 = vector.broadcast %cst_60 : f32 to vector<1x5xf32>
    %113 = arith.cmpf ogt, %111, %112 : vector<1x5xf32>
    %114 = vector.broadcast %5 : f32 to vector<1x5xf32>
    %115 = arith.mulf %111, %114 : vector<1x5xf32>
    %116 = arith.select %113, %111, %115 : vector<1x5xi1>, vector<1x5xf32>
    %cst_61 = arith.constant 0.000000e+00 : f32
    %117 = vector.broadcast %cst_61 : f32 to vector<1x5xf32>
    %118 = arith.cmpf ogt, %116, %117 : vector<1x5xf32>
    %119 = vector.broadcast %6 : f32 to vector<1x5xf32>
    %120 = arith.mulf %116, %119 : vector<1x5xf32>
    %121 = arith.select %118, %116, %120 : vector<1x5xi1>, vector<1x5xf32>
    %cst_62 = arith.constant dense<0xFF800000> : vector<1xf32>
    %122 = vector.multi_reduction <maximumf>, %121, %cst_62 [1] : vector<1x5xf32> to vector<1xf32>
    %123 = vector.shape_cast %122 : vector<1xf32> to vector<1x1xf32>
    %124 = vector.broadcast %123 : vector<1x1xf32> to vector<1x5xf32>
    %125 = arith.subf %121, %124 : vector<1x5xf32>
    %126 = math.exp %125 : vector<1x5xf32>
    %cst_63 = arith.constant dense<0.000000e+00> : vector<1xf32>
    %127 = vector.multi_reduction <add>, %126, %cst_63 [1] : vector<1x5xf32> to vector<1xf32>
    %128 = vector.shape_cast %127 : vector<1xf32> to vector<1x1xf32>
    %129 = vector.broadcast %128 : vector<1x1xf32> to vector<1x5xf32>
    %130 = arith.divf %126, %129 : vector<1x5xf32>
    %c0_64 = arith.constant 0 : index
    %c0_65 = arith.constant 0 : index
    %c0_66 = arith.constant 0 : index
    %131 = vector.load %arg15[%c0_64, %c0_65, %c0_66] : memref<1x1x5xf32, #tpu.memory_space<vmem>>, vector<1x1x5xf32>
    %132 = vector.shape_cast %131 : vector<1x1x5xf32> to vector<1x5xf32>
    %133 = vector.shape_cast %130 : vector<1x5xf32> to vector<1x1x5xf32>
    tpu.vector_store %arg15[%c0_64, %c0_65, %c0_66], %133 {strides = array<i32>} : memref<1x1x5xf32, #tpu.memory_space<vmem>>, vector<1x1x5xf32>,
    return
  }
  func.func @transform_0(%arg0: i32) -> (i32, i32, i32) {
    %c0_i32 = arith.constant 0 : i32
    %c0_i32_0 = arith.constant 0 : i32
    %c0_i32_1 = arith.constant 0 : i32
    return %arg0, %c0_i32, %c0_i32_0 : i32, i32, i32
  }
  func.func @transform_1(%arg0: i32) -> i32 {
    %c0_i32 = arith.constant 0 : i32
    %c0_i32_0 = arith.constant 0 : i32
    return %c0_i32 : i32
  }
  func.func @transform_2(%arg0: i32) -> (i32, i32) {
    %c0_i32 = arith.constant 0 : i32
    %c0_i32_0 = arith.constant 0 : i32
    %c0_i32_1 = arith.constant 0 : i32
    return %c0_i32, %c0_i32_0 : i32, i32
  }
  func.func @transform_3(%arg0: i32) -> (i32, i32) {
    %c0_i32 = arith.constant 0 : i32
    %c0_i32_0 = arith.constant 0 : i32
    %c0_i32_1 = arith.constant 0 : i32
    return %c0_i32, %c0_i32_0 : i32, i32
  }
  func.func @transform_4(%arg0: i32) -> (i32, i32) {
    %c0_i32 = arith.constant 0 : i32
    %c0_i32_0 = arith.constant 0 : i32
    %c0_i32_1 = arith.constant 0 : i32
    return %c0_i32, %c0_i32_0 : i32, i32
  }
  func.func @transform_5(%arg0: i32) -> (i32, i32) {
    %c0_i32 = arith.constant 0 : i32
    %c0_i32_0 = arith.constant 0 : i32
    %c0_i32_1 = arith.constant 0 : i32
    return %c0_i32, %c0_i32_0 : i32, i32
  }
  func.func @transform_6(%arg0: i32) -> (i32, i32) {
    %c0_i32 = arith.constant 0 : i32
    %c0_i32_0 = arith.constant 0 : i32
    %c0_i32_1 = arith.constant 0 : i32
    return %c0_i32, %c0_i32_0 : i32, i32
  }
  func.func @transform_7(%arg0: i32) -> (i32, i32) {
    %c0_i32 = arith.constant 0 : i32
    %c0_i32_0 = arith.constant 0 : i32
    %c0_i32_1 = arith.constant 0 : i32
    return %c0_i32, %c0_i32_0 : i32, i32
  }
  func.func @transform_8(%arg0: i32) -> (i32, i32) {
    %c0_i32 = arith.constant 0 : i32
    %c0_i32_0 = arith.constant 0 : i32
    %c0_i32_1 = arith.constant 0 : i32
    return %c0_i32, %c0_i32_0 : i32, i32
  }
  func.func @transform_9(%arg0: i32) -> (i32, i32) {
    %c0_i32 = arith.constant 0 : i32
    %c0_i32_0 = arith.constant 0 : i32
    %c0_i32_1 = arith.constant 0 : i32
    return %c0_i32, %c0_i32_0 : i32, i32
  }
  func.func @transform_10(%arg0: i32) -> (i32, i32) {
    %c0_i32 = arith.constant 0 : i32
    %c0_i32_0 = arith.constant 0 : i32
    %c0_i32_1 = arith.constant 0 : i32
    return %c0_i32, %c0_i32_0 : i32, i32
  }
  func.func @transform_11(%arg0: i32) -> (i32, i32) {
    %c0_i32 = arith.constant 0 : i32
    %c0_i32_0 = arith.constant 0 : i32
    %c0_i32_1 = arith.constant 0 : i32
    return %c0_i32, %c0_i32_0 : i32, i32
  }
  func.func @transform_12(%arg0: i32) -> (i32, i32) {
    %c0_i32 = arith.constant 0 : i32
    %c0_i32_0 = arith.constant 0 : i32
    %c0_i32_1 = arith.constant 0 : i32
    return %c0_i32, %c0_i32_0 : i32, i32
  }
  func.func @transform_13(%arg0: i32) -> (i32, i32) {
    %c0_i32 = arith.constant 0 : i32
    %c0_i32_0 = arith.constant 0 : i32
    %c0_i32_1 = arith.constant 0 : i32
    return %c0_i32, %c0_i32_0 : i32, i32
  }
  func.func @transform_14(%arg0: i32) -> (i32, i32, i32) {
    %c0_i32 = arith.constant 0 : i32
    %c0_i32_0 = arith.constant 0 : i32
    %c0_i32_1 = arith.constant 0 : i32
    return %arg0, %c0_i32, %c0_i32_0 : i32, i32, i32
  }
}

</mosaic_0001>

<bundles_post_ra>
// kernel: _lambda_.1
= control target key start
LH: loop header
LB: loop body
LE: loop exit
PB: predicated region body
PF: predicated region fallthrough
CT: control target
= control target key end

     0   :  { %s13471_s0 = inlined_call_operand.vmem [shape: f32[2,128,1], index: 0, kind: input, shape index: {}]   ;;  %s13472_s1 = inlined_call_operand.vmem [shape: f32[7], index: 1, kind: input, shape index: {}]   ;;  %s13473_s2 = inlined_call_operand.vmem [shape: f32[3,32], index: 2, kind: input, shape index: {}]   ;;  %s13474_s3 = inlined_call_operand.vmem [shape: f32[1,32], index: 3, kind: input, shape index: {}]   ;;  %s13475_s4 = inlined_call_operand.hbm [shape: f32[160,64], index: 4, kind: input, shape index: {}]   ;;  %s13476_s5 = inlined_call_operand.vmem [shape: f32[1,64], index: 5, kind: input, shape index: {}]   ;;  %s13477_s6 = inlined_call_operand.hbm [shape: f32[320,128], index: 6, kind: input, shape index: {}]   ;;  %s13478_s7 = inlined_call_operand.vmem [shape: f32[1,128], index: 7, kind: input, shape index: {}]   ;;  %s13479_s8 = inlined_call_operand.hbm [shape: f32[384,256], index: 8, kind: input, shape index: {}]   ;;  %s13480_s9 = inlined_call_operand.vmem [shape: f32[1,256], index: 9, kind: input, shape index: {}]   ;;  %s13481_s10 = inlined_call_operand.vmem [shape: f32[256,64], index: 10, kind: input, shape index: {}]   ;;  %s13482_s11 = inlined_call_operand.vmem [shape: f32[1,64], index: 11, kind: input, shape index: {}]   ;;  %s13483_s12 = inlined_call_operand.hbm [shape: f32[64,5], index: 12, kind: input, shape index: {}]   ;;  %s13484_s13 = inlined_call_operand.vmem [shape: f32[1,5], index: 13, kind: input, shape index: {}]   ;;  %s13485_s14 = inlined_call_operand.hbm [shape: f32[2,1,5], index: 14, kind: output, shape index: {}]  }
   0x1   :  { %13886 = sst [smem:[#allocation98_spill]] %s13472_s1 }
   0x2   :  { %13887 = sst [smem:[#allocation99_spill]] %s13475_s4 }
   0x3   :  { %13888 = sst [smem:[#allocation100_spill]] %s13477_s6 }
   0x4   :  { %13889 = sst [smem:[#allocation101_spill]] %s13485_s14 }
   0x5   :  { %19 = vsyncpa [#allocation7], 0 }
   0x6   :  { %20 = vsyncpa [#allocation5], 0 }
   0x7   :  { %21 = vsyncpa [#allocation10], 0 }
   0x8   :  { %22 = vsyncpa [#allocation13], 0 }
   0x9   :  { %23 = vsyncpa [#allocation6], 0 }
   0xa   :  { %25 = vsyncpa [#allocation6 + $0x1], 0  ;;  %s9895_s29 = smov 0   ;;  %s9897_s30 = smov 0  }
   0xb   :  { %s9899_s15 = smov 0   ;;  %s9901_s16 = smov 0  }
   0xc LB: > { %13890 = sst [smem:[#allocation20_spill]] %s9789_s29  ;;  %s9916_s17 = sadd.s32 4294967295, %s9801_s16   ;;  %s9801_s16 = sphi %s9901_s16, %s14503_s16   ;;  %s9797_s15 = sphi %s9899_s15, %s14506_s15   ;;  %s9793_s30 = sphi %s9897_s30, %s14505_s30   ;;  %s9789_s29 = sphi %s9895_s29, %s14504_s29  }
   0xd   : > { %13891 = sst [smem:[#allocation21_spill]] %s9793_s30  ;;  %s7327_s18 = sadd.s32 4294967294, %s9801_s16  }
   0xe   : > { %13892 = sst [smem:[#allocation22_spill]] %s9797_s15  ;;  %s9920_s19 = sadd.s32 1, %s9801_s16  }
   0xf   : > { %13893 = sst [smem:[#allocation23_spill]] %s9801_s16  ;;  %s337_s20 = sadd.s32 1, %s9797_s15 }
  0x10   : > { %13894 = sst [smem:[#allocation24_spill]] %s9920_s19  ;;  %s334_s21 = ssub.s32 %s9801_s16, %s9920_s19 }
  0x11   : > { %p347_p0 = scmp.ne.s32.totalorder %s9797_s15, %s9793_s30  ;;  %p335_p1 = scmp.eq.s32.totalorder %s334_s21, 0 }
  0x12   : > { %p348_p2 = scmp.eq.s32.totalorder %s9916_s17, 1  ;;  %p353_p3 = scmp.ne.s32.totalorder %s9793_s30, %s9789_s29 }
  0x13   : > { %p354_p4 = scmp.eq.s32.totalorder %s7327_s18, 1  ;;  %p7328_p7 = scmp.ge.s32.totalorder %s9801_s16, 1 }
  0x14   : > { %s9931_s22 = scalar_select %p335_p1, %s9797_s15, %s337_s20  }
  0x15   : > { %p9933_p5 = por %p348_p2, %p347_p0  ;;  %p9937_p6 = por %p354_p4, %p353_p3 }
  0x16   : > { %13895 = sst [smem:[#allocation25_spill]] %s9931_s22  ;;  %p361_p8 = scmp.lt.s32.totalorder %s9801_s16, 3 }
  0x17   : > { %s13896_s23 = scalar_select %p9933_p5, 1, 0 }
  0x18   : > { %s13898_s24 = scalar_select %p9937_p6, 1, 0 }
  0x19   : > { %13897 = sst [smem:[#allocation26_spill]] %s13896_s23  ;;  %p13492_p9 = scmp.eq.s32.totalorder %s9916_s17, 0 }
  0x1a   : > { %13899 = sst [smem:[#allocation27_spill]] %s13898_s24  ;;  %p9944_p10 = pnand %p7328_p7, %p361_p8 }
  0x1b   : > { %s9803_s26 = smov [#allocation9]   ;;  %s13901_s1 = sld [smem:[#allocation98_spill]] }
  0x1c   : > { %s13900_s25 = scalar_select %p9944_p10, 1, 0 }
  0x1d   : > { %p9511_p11 = pneg %p9944_p10  ;;  %s406_s27 = sshll.u32 %s9803_s26, 4  ;;  %s407_s27 = int_to_ptr.vmem [resolvable:$true] %s406_s27 }
  0x1e   : > { %s9804_s22 = smov [#allocation8]   ;;  %s13903_s6 = sld [smem:[#allocation100_spill]] }
  0x1f   : > { %p9955_p12 = pnand %p13492_p9, %p9511_p11  ;;  %s9961_s15 = sshll.u32 %s9804_s22, 4  ;;  %s391_s15 = int_to_ptr.vmem [resolvable:$true] %s9961_s15 }
  0x21   : > { %s374_s20 = sshll.u32 %s13901_s1, 4  ;;  %p9971_p0 = pneg %p9955_p12  ;;  %s9959_s20 = int_to_ptr.vmem [resolvable:$true] %s374_s20 }
  0x24   : > { %s9596_s26 = scalar_lea.hbm %s13903_s6, 5120 }
  0x25   : > { %p9597_p13 = scmp.ne.s32.totalorder %s13903_s6, %s9596_s26  ;;  %p9603_p3 = scmp.lt.u32.totalorder %s9596_s26, %s13903_s6 }
  0x27   : > { %p9599_p1 = pnand %p9971_p0, %p9597_p13 }
  0x29   : > { %p9600_p2 = pneg %p9599_p1 }
  0x2b   : > { %p9605_p4 = pnand %p9603_p3, %p9600_p2 }
  0x2d   : > { %9608 = shalt.err (!%p9605_p4)
}
  0x2e   : > { %s9609_s19 = scalar_lea.vmem %s407_s27, 5120  ;;  %p9617_p9 = scmp.lt.s32.totalorder %s407_s27, %s407_s27 }
  0x2f   : > { %p9610_p7 = scmp.ne.s32.totalorder %s407_s27, %s9609_s19  ;;  %p9618_p6 = scmp.lt.s32.totalorder %s9609_s19, %s9609_s19 }
  0x31   : > { %p9612_p8 = pnand %p9610_p7, %p9971_p0  ;;  %p9619_p5 = por %p9618_p6, %p9617_p9 }
  0x33   : > { %p9613_p11 = pneg %p9612_p8 }
  0x35   : > { %p9620_p10 = pnand %p9619_p5, %p9613_p11 }
  0x37   : > { %9623 = shalt.err (!%p9620_p10)
}
  0x38   : > { %s13495_s29 = smov 128   ;;  %s13497_s16 = smov 8  }
  0x39   : > { %9520 = dma.hbm_to_vmem [thread:$0]  (!%p9955_p12), %s13903_s6, 5120, %s407_s27, [#allocation10], %s13495_s29, %s13495_s29, %s13497_s16  }
  0x3a   : > { %s9624_s18 = scalar_lea.vmem %s9959_s20, 16  ;;  %p9632_p9 = scmp.lt.s32.totalorder %s9959_s20, %s9959_s20 }
  0x3b   : > { %p9625_p13 = scmp.ne.s32.totalorder %s9959_s20, %s9624_s18  ;;  %p9633_p10 = scmp.lt.s32.totalorder %s9624_s18, %s9624_s18 }
  0x3d   : > { %p9627_p5 = pnand %p9625_p13, %p9971_p0  ;;  %p9634_p1 = por %p9633_p10, %p9632_p9 }
  0x3f   : > { %p9628_p6 = pneg %p9627_p5 }
  0x41   : > { %p9635_p2 = pnand %p9634_p1, %p9628_p6 }
  0x43   : > { %9638 = shalt.err (!%p9635_p2)
}
  0x44   : > { %s9807_s22 = smov [#allocation4]   ;;  %s13905_s4 = sld [smem:[#allocation99_spill]] }
  0x45   : > { %9514 = dma.vmem_to_smem (!%p9955_p12), %s9959_s20, 16, %s9807_s22, [#allocation7]  }
  0x4a   : > { %s9639_s24 = scalar_lea.hbm %s13905_s4, 2560 }
  0x4b   : > { %p9640_p3 = scmp.ne.s32.totalorder %s13905_s4, %s9639_s24  ;;  %p9646_p8 = scmp.lt.u32.totalorder %s9639_s24, %s13905_s4 }
  0x4d   : > { %p9642_p4 = pnand %p9640_p3, %p9971_p0 }
  0x4f   : > { %p9643_p7 = pneg %p9642_p4 }
  0x51   : > { %p9648_p11 = pnand %p9646_p8, %p9643_p7 }
  0x53   : > { %9651 = shalt.err (!%p9648_p11)
}
  0x54   : > { %s9652_s1 = scalar_lea.vmem %s391_s15, 2560  ;;  %p9660_p9 = scmp.lt.s32.totalorder %s391_s15, %s391_s15 }
  0x55   : > { %p9653_p13 = scmp.ne.s32.totalorder %s391_s15, %s9652_s1  ;;  %p9661_p10 = scmp.lt.s32.totalorder %s9652_s1, %s9652_s1 }
  0x57   : > { %p9655_p5 = pnand %p9653_p13, %p9971_p0  ;;  %p9662_p1 = por %p9661_p10, %p9660_p9 }
  0x59   : > { %p9656_p6 = pneg %p9655_p5 }
  0x5b   : > { %p9663_p2 = pnand %p9662_p1, %p9656_p6 }
  0x5d   : > { %9666 = shalt.err (!%p9663_p2)
}
  0x5e   : > { %s13906_s20 = smov 8   ;;  %s13907_s29 = smov 128  }
  0x5f   : > { %9517 = dma.hbm_to_vmem [thread:$0]  (!%p9955_p12), %s13905_s4, 2560, %s391_s15, [#allocation5], %s13907_s29, %s13907_s29, %s13906_s20  }
  0x60   : > { %s9808_s27 = smov [#allocation11]   ;;  %s9667_s1 = scalar_lea.hbm %s13479_s8, 12288 }
  0x61   : > { %s422_s19 = sshll.u32 %s9808_s27, 4  ;;  %p9668_p3 = scmp.ne.s32.totalorder %s13479_s8, %s9667_s1  ;;  %s423_s19 = int_to_ptr.vmem [resolvable:$true] %s422_s19 }
  0x62   : > { %p9674_p8 = scmp.lt.u32.totalorder %s9667_s1, %s13479_s8 }
  0x63   : > { %p9670_p4 = pnand %p9668_p3, %p9971_p0 }
  0x65   : > { %p9671_p7 = pneg %p9670_p4 }
  0x67   : > { %p9676_p11 = pnand %p9674_p8, %p9671_p7 }
  0x69   : > { %9679 = shalt.err (!%p9676_p11)
}
  0x6a   : > { %s9680_s15 = scalar_lea.vmem %s423_s19, 12288  ;;  %p9688_p9 = scmp.lt.s32.totalorder %s423_s19, %s423_s19 }
  0x6b   : > { %p9681_p13 = scmp.ne.s32.totalorder %s423_s19, %s9680_s15  ;;  %p9689_p10 = scmp.lt.s32.totalorder %s9680_s15, %s9680_s15 }
  0x6d   : > { %p9683_p5 = pnand %p9681_p13, %p9971_p0  ;;  %p9690_p1 = por %p9689_p10, %p9688_p9 }
  0x6f   : > { %p9684_p6 = pneg %p9683_p5 }
  0x71   : > { %p9691_p2 = pnand %p9690_p1, %p9684_p6 }
  0x73   : > { %9694 = shalt.err (!%p9691_p2)
}
  0x74   : > { %s9809_s6 = smov 256   ;;  %s9810_s16 = smov 16  }
  0x75   : > { %9523 = dma.hbm_to_vmem [thread:$0]  (!%p9955_p12), %s13479_s8, 12288, %s423_s19, [#allocation10], %s9809_s6, %s9809_s6, %s9810_s16  }
  0x76   : > { %s9811_s22 = smov [#allocation12]   ;;  %s9695_s1 = scalar_lea.hbm %s13483_s12, 1024 }
  0x77   : > { %s444_s27 = sshll.u32 %s9811_s22, 4  ;;  %p9696_p3 = scmp.ne.s32.totalorder %s13483_s12, %s9695_s1  ;;  %s445_s27 = int_to_ptr.vmem [resolvable:$true] %s444_s27 }
  0x78   : > { %p9702_p8 = scmp.lt.u32.totalorder %s9695_s1, %s13483_s12 }
  0x79   : > { %p9698_p4 = pnand %p9696_p3, %p9971_p0 }
  0x7b   : > { %p9699_p7 = pneg %p9698_p4 }
  0x7d   : > { %p9704_p11 = pnand %p9702_p8, %p9699_p7 }
  0x7f   : > { %9707 = shalt.err (!%p9704_p11)
}
  0x80   : > { %s9708_s19 = scalar_lea.vmem %s445_s27, 1024  ;;  %p9716_p9 = scmp.lt.s32.totalorder %s445_s27, %s445_s27 }
  0x81   : > { %p9709_p13 = scmp.ne.s32.totalorder %s445_s27, %s9708_s19  ;;  %p9717_p10 = scmp.lt.s32.totalorder %s9708_s19, %s9708_s19 }
  0x83   : > { %p9711_p5 = pnand %p9709_p13, %p9971_p0  ;;  %p9718_p1 = por %p9717_p10, %p9716_p9 }
  0x85   : > { %p9712_p6 = pneg %p9711_p5 }
  0x87   : > { %p9719_p2 = pnand %p9718_p1, %p9712_p6 }
  0x89   : > { %9722 = shalt.err (!%p9719_p2)
}
  0x8a   : > { %9526 = dma.hbm_to_vmem [thread:$0]  (!%p9955_p12), %s13483_s12, 1024, %s445_s27, [#allocation13], %s13907_s29, %s13907_s29, %s13906_s20  }
  0x8b   : > { %p13908_p3 = scmp.ne.s32.totalorder %s13900_s25, 0 }
  0x8d   : > { %471 = sbr.rel (%p13908_p3) target bundleno = 3169 (0xc61), region = 76 }
  0x94   : > { %p13909_p0 = scmp.eq.s32.totalorder %s9916_s17, 0 }
  0x96   : > { %9768 = dma.done.wait (%p13909_p0), [#allocation7], 16   ;;  %p13910_p4 = pmov %p13909_p0 }
  0x97   : > { %p13911_p7 = pmov %p13909_p0 }
  0x98   : > { %9770 = vsyncadd (%p13910_p4), [#allocation7], 4294967280 }
  0x99   : > { %9772 = dma.done.wait (%p13911_p7), [#allocation5], 2560   ;;  %p13912_p8 = pmov %p13909_p0 }
  0x9a   : > { %p13913_p11 = pmov %p13909_p0 }
  0x9b   : > { %9774 = vsyncadd (%p13912_p8), [#allocation5], 4294964736 }
  0x9c   : > { %9776 = dma.done.wait (%p13913_p11), [#allocation10], 17408   ;;  %p13914_p12 = pmov %p13909_p0 }
  0x9d   : > { %p13915_p13 = pmov %p13909_p0 }
  0x9e   : > { %9778 = vsyncadd (%p13914_p12), [#allocation10], 4294949888 }
  0x9f   : > { %9780 = dma.done.wait (%p13915_p13), [#allocation13], 1024   ;;  %p13916_p5 = pmov %p13909_p0 }
  0xa1   : > { %9782 = vsyncadd (%p13916_p5), [#allocation13], 4294966272 }
  0xa2   : > { %493 = sfence }
  0xa3   : > { %p533_p6 = scmp.lt.s32.totalorder %s9916_s17, 1  ;;  %v9812_v0 = vmov 0   ;;  %v1072_v17 = vld [vmem:[#allocation8] sm:$0xff]  ;;  %v1073_v18 = vld [vmem:[#allocation8 + $0x8] sm:$0xff]  ;;  %v1074_v19 = vld [vmem:[#allocation8 + $0x10] sm:$0xff]  ;;  %v13524_v20 = vmov 0.0|0.0  }
  0xa4   : > { %9591 = vset.pattern.permute.xlu1 %v9812_v0  ;;  %9590 = vset.pattern.permute.xlu0 %v9812_v0  ;;  %v1108_v21 = vand.u32 4294901760, %v1072_v17  ;;  %v1111_v22 = vand.u32 4294901760, %v1073_v18  ;;  %v1075_v23 = vld [vmem:[#allocation8 + $0x18] sm:$0xff]  ;;  %v1114_v24 = vand.u32 4294901760, %v1074_v19  ;;  %v1076_v25 = vld [vmem:[#allocation8 + $0x20] sm:$0xff]  ;;  %v1077_v26 = vld [vmem:[#allocation8 + $0x28] sm:$0xff] }
  0xa5   : > { %s534_s25 = scalar_select %p533_p6, %s9916_s17, 1  ;;  %8115 = vmatprep.subr.bf16.mxu0 %v13524_v20  ;;  %v1117_v27 = vand.u32 4294901760, %v1075_v23  ;;  %v1120_v28 = vand.u32 4294901760, %v1076_v25  ;;  %v1123_v29 = vand.u32 4294901760, %v1077_v26  ;;  %v1078_v30 = vld [vmem:[#allocation8 + $0x30] sm:$0xff]  ;;  %v1079_v31 = vld [vmem:[#allocation8 + $0x38] sm:$0xff] }
  0xa6   : > { %v1080_v32 = vld [vmem:[#allocation8 + $0x40] sm:$0xff]  ;;  %v10084_v33 = vpack.c.bf16 %v1111_v22, %v1108_v21  ;;  %v10086_v34 = vsub.f32 %v1072_v17, %v1108_v21  ;;  %v10088_v35 = vsub.f32 %v1073_v18, %v1111_v22  ;;  %v10090_v36 = vsub.f32 %v1074_v19, %v1114_v24  ;;  %v1081_v37 = vld [vmem:[#allocation8 + $0x48] sm:$0xff]  ;;  %s538_s6 = sld [smem:[#allocation4]]  ;;  %s9814_s18 = smov 32  }
  0xa7   : > { %s7358_s21 = sshll.u32 %s534_s25, 7  ;;  %v10092_v38 = vpack.c.bf16 %v1117_v27, %v1114_v24  ;;  %v10094_v39 = vsub.f32 %v1075_v23, %v1117_v27  ;;  %v10096_v40 = vsub.f32 %v1076_v25, %v1120_v28  ;;  %v10099_v41 = vsub.f32 %v1077_v26, %v1123_v29  ;;  %v10127_v53 = vld [vmem:[%s13473_s2 + $0x1] ss:$0 sm:$0xff]  ;;  %v10132_v54 = vld [vmem:[%s13473_s2 + $0x2] ss:$0 sm:$0xff]  ;;  %s9815_s15 = smov 96  }
  0xa8   : > { %s537_s29 = scalar_lea.vmem %s13471_s0, %s7358_s21  ;;  %8117 = vmatpush1.bf16.msra.mxu0 %v10084_v33  ;;  %v1126_v42 = vand.u32 4294901760, %v1078_v30  ;;  %v1129_v43 = vand.u32 4294901760, %v1079_v31  ;;  %v1132_v44 = vand.u32 4294901760, %v1080_v32  ;;  %v1135_v45 = vand.u32 4294901760, %v1081_v37  ;;  %v10139_v59 = vld [vmem:[%s13473_s2] ss:$0 sm:$0xff] }
  0xa9   : > { %v547_v1 = vld [vmem:[%s537_s29 + $0x10] sm:$0xff]  ;;  %v545_v2 = vld [vmem:[%s537_s29] sm:$0xff]  ;;  %v548_v3 = vld [vmem:[%s537_s29 + $0x18] sm:$0xff]  ;;  %8118 = vmatprep.subr.bf16.mxu0 %v13524_v20  ;;  %v10111_v50 = vpack.c.bf16 %v1123_v29, %v1120_v28  ;;  %vm699_vm0 = vcmask 1046528   ;;  %vm800_vm1 = vcmask 1045504   ;;  %vm936_vm2 = vcmask 261120  }
  0xaa   : > { %574 = vperm.xlu1 %9591, %v547_v1   ;;  %564 = vperm.xlu0 %9590, %v545_v2   ;;  %v546_v4 = vld [vmem:[%s537_s29 + $0x8] sm:$0xff]  ;;  %v549_v6 = vld [vmem:[%s537_s29 + $0x20] sm:$0xff]  ;;  %v552_v7 = vld [vmem:[%s537_s29 + $0x38] sm:$0xff]  ;;  %v10102_v46 = vsub.f32 %v1078_v30, %v1126_v42  ;;  %v10104_v47 = vsub.f32 %v1079_v31, %v1129_v43  ;;  %v10106_v48 = vsub.f32 %v1080_v32, %v1132_v44  ;;  %vm952_vm14 = vcmask 259072   ;;  %s9816_s19 = smov 64   ;;  %s7343_s4 = sld [smem:[#allocation4 + $0x1]] }
  0xab   : > { %v550_v5 = vld [vmem:[%s537_s29 + $0x28] sm:$0xff]  ;;  %v551_v8 = vld [vmem:[%s537_s29 + $0x30] sm:$0xff]  ;;  %v553_v10 = vld [vmem:[%s537_s29 + $0x40] sm:$0xff]  ;;  %v10108_v49 = vsub.f32 %v1081_v37, %v1135_v45  ;;  %v10115_v51 = vpack.c.bf16 %v1129_v43, %v1126_v42  ;;  %v10119_v52 = vpack.c.bf16 %v1135_v45, %v1132_v44  ;;  %s7344_s20 = sld [smem:[#allocation4 + $0x2]]  ;;  %s7345_s1 = sld [smem:[#allocation4 + $0x3]] }
  0xac   : > { %v554_v9 = vld [vmem:[%s537_s29 + $0x48] sm:$0xff]  ;;  %v556_v11 = vld [vmem:[%s537_s29 + $0x58] sm:$0xff]  ;;  %v555_v12 = vld [vmem:[%s537_s29 + $0x50] sm:$0xff]  ;;  %8120 = vmatpush1.bf16.msra.mxu0 %v10092_v38  ;;  %v10143_v62 = vstv %s538_s6  ;;  %s7348_s30 = sld [smem:[#allocation4 + $0x6]]  ;;  %s14495_s28 = sld [smem:[#allocation21_spill]] }
  0xad   : > { %v558_v13 = vld [vmem:[%s537_s29 + $0x68] sm:$0xff]  ;;  %v557_v14 = vld [vmem:[%s537_s29 + $0x60] sm:$0xff]  ;;  %v560_v15 = vld [vmem:[%s537_s29 + $0x78] sm:$0xff]  ;;  %8121 = vmatprep.subr.bf16.mxu0 %v13524_v20  ;;  %s7355_s6 = sshll.u32 %s9916_s17, 4  ;;  %s14497_s27 = sld [smem:[#allocation101_spill]] }
  0xae   : > { %579 = vperm.xlu1 %9591, %v548_v3   ;;  %569 = vperm.xlu0 %9590, %v546_v4   ;;  %v559_v16 = vld [vmem:[%s537_s29 + $0x70] sm:$0xff]  ;;  %v10167_v28 = vld [vmem:[%s13474_s3] ss:$0 sm:$0xff]  ;;  %s9819_s17 = smov [#allocation14]  }
  0xb0   : > { %8123 = vmatpush1.bf16.msra.mxu0 %v10111_v50 }
  0xb1   : > { %8124 = vmatprep.subr.bf16.mxu0 %v13524_v20 }
  0xb2   : > { %589 = vperm.xlu1 %9591, %v550_v5   ;;  %584 = vperm.xlu0 %9590, %v549_v6   ;;  %s531_s29 = sand.u32 1, %s14495_s28  }
  0xb3   : > { %s532_s16 = scalar_lea.vmem [#allocation14], %s531_s29  ;;  %s13428_s24 = scalar_lea.hbm %s14497_s27, %s7355_s6 }
  0xb4   : > { %8126 = vmatpush1.bf16.msra.mxu0 %v10115_v51  ;;  %s7219_s14 = sshll.u32 %s532_s16, 4  ;;  %s7207_s26 = scalar_lea.sflag [#allocation6], %s531_s29  ;;  %s13430_s14 = int_to_ptr.vmem [resolvable:$true] %s7219_s14 }
  0xb5   : > { %8127 = vmatprep.subr.bf16.mxu0 %v13524_v20 }
  0xb6   : > { %599 = vperm.xlu1 %9591, %v552_v7   ;;  %594 = vperm.xlu0 %9590, %v551_v8  }
  0xb8   : > { %8129 = vmatpush1.bf16.msra.mxu0 %v10119_v52 }
  0xb9   : > { %8130 = vmatprep.subr.bf16.mxu0 %v13524_v20 }
  0xba   : > { %609 = vperm.xlu1 %9591, %v554_v9   ;;  %604 = vperm.xlu0 %9590, %v553_v10  }
  0xbe   : > { %619 = vperm.xlu1 %9591, %v556_v11   ;;  %614 = vperm.xlu0 %9590, %v555_v12  }
  0xc2   : > { %629 = vperm.xlu1 %9591, %v558_v13   ;;  %624 = vperm.xlu0 %9590, %v557_v14  }
  0xc6   : > { %639 = vperm.xlu1 %9591, %v560_v15   ;;  %634 = vperm.xlu0 %9590, %v559_v16  }
 0x129   : > { %v575_v55 = vpop.permute.xlu1 %574  ;;  %v565_v56 = vpop.permute.xlu0 %564 }
 0x12a   : > { %v669_v57 = vmul.f32 %v10127_v53, %v575_v55  ;;  %v770_v58 = vmul.f32 %v10132_v54, %v575_v55  ;;  %v667_v60 = vmul.f32 %v10127_v53, %v565_v56  ;;  %v768_v61 = vmul.f32 %v10132_v54, %v565_v56 }
 0x12b   : > { %v648_v5 = vmul.f32 %v10139_v59, %v575_v55  ;;  %v646_v6 = vmul.f32 %v10139_v59, %v565_v56 }
 0x12c   : > { %v703_v1 = vrot.slane %v669_v57, 1  ;;  %v804_v2 = vrot.slane %v770_v58, 2  ;;  %v700_v9 = vrot.slane %v667_v60, 1  ;;  %v801_v10 = vrot.slane %v768_v61, 2 }
 0x12d   : > { %v580_v63 = vpop.permute.xlu1 %579  ;;  %v570_v0 = vpop.permute.xlu0 %569 }
 0x12e   : > { %v670_v3 = vmul.f32 %v10127_v53, %v580_v63  ;;  %v771_v4 = vmul.f32 %v10132_v54, %v580_v63  ;;  %v668_v7 = vmul.f32 %v10127_v53, %v570_v0  ;;  %v769_v8 = vmul.f32 %v10132_v54, %v570_v0 }
 0x12f   : > { %v649_v13 = vmul.f32 %v10139_v59, %v580_v63  ;;  %v647_v14 = vmul.f32 %v10139_v59, %v570_v0 }
 0x130   : > { %v705_v11 = vrot.slane %v670_v3, 1  ;;  %v806_v12 = vrot.slane %v771_v4, 2  ;;  %v701_v15 = vrot.slane %v668_v7, 1  ;;  %v802_v16 = vrot.slane %v769_v8, 2 }
 0x131   : > { %v590_v17 = vpop.permute.xlu1 %589  ;;  %v585_v18 = vpop.permute.xlu0 %584 }
 0x132   : > { %v706_v19 = vsel %vm699_vm0, %v703_v1, %v705_v11  ;;  %v807_v21 = vsel %vm800_vm1, %v804_v2, %v806_v12  ;;  %v10156_v22 = vmul.f32 %v10139_v59, %v590_v17  ;;  %v10159_v23 = vmul.f32 %v10127_v53, %v590_v17 }
 0x133   : > { %v749_v24 = vadd.f32 %v706_v19, %v648_v5  ;;  %v702_v25 = vsel %vm699_vm0, %v700_v9, %v701_v15  ;;  %v704_v26 = vsel %vm699_vm0, %v701_v15, %v703_v1  ;;  %v803_v27 = vsel %vm800_vm1, %v801_v10, %v802_v16 }
 0x134   : > { %v747_v29 = vadd.f32 %v702_v25, %v646_v6  ;;  %v748_v30 = vadd.f32 %v704_v26, %v647_v14  ;;  %v805_v31 = vsel %vm800_vm1, %v802_v16, %v804_v2  ;;  %v709_v32 = vrot.slane %v10159_v23, 1 }
 0x135   : > { %v850_v37 = vadd.f32 %v807_v21, %v749_v24  ;;  %v10172_v42 = vmul.f32 %v10132_v54, %v590_v17  ;;  %v650_v43 = vmul.f32 %v10139_v59, %v585_v18  ;;  %v671_v44 = vmul.f32 %v10127_v53, %v585_v18  ;;  %v600_v45 = vpop.permute.xlu1 %599  ;;  %v595_v60 = vpop.permute.xlu0 %594 }
 0x136   : > { %v848_v55 = vadd.f32 %v803_v27, %v747_v29  ;;  %v849_v56 = vadd.f32 %v805_v31, %v748_v30  ;;  %v772_v57 = vmul.f32 %v10132_v54, %v585_v18  ;;  %v10178_v58 = vmul.f32 %v10139_v59, %v600_v45 }
 0x137   : > { %v873_v61 = vadd.f32 %v10167_v28, %v850_v37  ;;  %v810_v63 = vrot.slane %v10172_v42, 2  ;;  %v707_v0 = vrot.slane %v671_v44, 1  ;;  %v10183_v1 = vmul.f32 %v10127_v53, %v600_v45 }
 0x138   : > { %v871_v2 = vadd.f32 %v10167_v28, %v848_v55  ;;  %v872_v3 = vadd.f32 %v10167_v28, %v849_v56  ;;  %v808_v4 = vrot.slane %v772_v57, 2  ;;  %v10188_v5 = vmul.f32 %v10132_v54, %v600_v45 }
 0x139   : > { %vm889_vm3 = vcmp.gt.f32.partialorder %v873_v61, 0.0  ;;  %v906_v6 = vmul.f32 %v10143_v62, %v873_v61  ;;  %v708_v7 = vsel %vm699_vm0, %v705_v11, %v707_v0  ;;  %v710_v8 = vsel %vm699_vm0, %v707_v0, %v709_v32  ;;  %v610_v18 = vpop.permute.xlu1 %609  ;;  %v605_v24 = vpop.permute.xlu0 %604 }
 0x13a   : > { %vm887_vm4 = vcmp.gt.f32.partialorder %v871_v2, 0.0  ;;  %vm888_vm5 = vcmp.gt.f32.partialorder %v872_v3, 0.0  ;;  %v904_v9 = vmul.f32 %v10143_v62, %v871_v2  ;;  %v905_v10 = vmul.f32 %v10143_v62, %v872_v3 }
 0x13b   : > { %v922_v14 = vsel %vm889_vm3, %v873_v61, %v906_v6  ;;  %v750_v15 = vadd.f32 %v708_v7, %v649_v13  ;;  %v751_v16 = vadd.f32 %v710_v8, %v650_v43  ;;  %v809_v17 = vsel %vm800_vm1, %v806_v12, %v808_v4 }
 0x13c   : > { %939 = vst.msk [vmem:[#allocation2 + $0x10] sm:$0xff] %vm936_vm2, %v922_v14  ;;  %v920_v19 = vsel %vm887_vm4, %v871_v2, %v904_v9  ;;  %v921_v21 = vsel %vm888_vm5, %v872_v3, %v905_v10  ;;  %v811_v11 = vsel %vm800_vm1, %v808_v4, %v810_v63  ;;  %v713_v23 = vrot.slane %v10183_v1, 1 }
 0x13d   : > { %937 = vst.msk [vmem:[#allocation2] sm:$0xff] %vm936_vm2, %v920_v19  ;;  %938 = vst.msk [vmem:[#allocation2 + $0x8] sm:$0xff] %vm936_vm2, %v921_v21  ;;  %v851_v25 = vadd.f32 %v809_v17, %v750_v15  ;;  %v852_v26 = vadd.f32 %v811_v11, %v751_v16  ;;  %v814_v13 = vrot.slane %v10188_v5, 2  ;;  %v652_v12 = vmul.f32 %v10139_v59, %v595_v60  ;;  %v620_v0 = vpop.permute.xlu1 %619  ;;  %v615_v9 = vpop.permute.xlu0 %614 }
 0x13e   : > { %v673_v27 = vmul.f32 %v10127_v53, %v595_v60  ;;  %v774_v29 = vmul.f32 %v10132_v54, %v595_v60  ;;  %v10206_v30 = vmul.f32 %v10139_v59, %v610_v18  ;;  %v10209_v31 = vmul.f32 %v10127_v53, %v610_v18 }
 0x13f   : > { %v874_v37 = vadd.f32 %v10167_v28, %v851_v25  ;;  %v875_v42 = vadd.f32 %v10167_v28, %v852_v26  ;;  %v10214_v43 = vmul.f32 %v10132_v54, %v610_v18  ;;  %v654_v44 = vmul.f32 %v10139_v59, %v605_v24 }
 0x140   : > { %v711_v45 = vrot.slane %v673_v27, 1  ;;  %v812_v55 = vrot.slane %v774_v29, 2  ;;  %v717_v56 = vrot.slane %v10209_v31, 1  ;;  %v675_v57 = vmul.f32 %v10127_v53, %v605_v24 }
 0x141   : > { %vm890_vm6 = vcmp.gt.f32.partialorder %v874_v37, 0.0  ;;  %vm891_vm7 = vcmp.gt.f32.partialorder %v875_v42, 0.0  ;;  %v907_v60 = vmul.f32 %v10143_v62, %v874_v37  ;;  %v908_v61 = vmul.f32 %v10143_v62, %v875_v42 }
 0x142   : > { %v712_v1 = vsel %vm699_vm0, %v709_v32, %v711_v45  ;;  %v714_v2 = vsel %vm699_vm0, %v711_v45, %v713_v23  ;;  %v813_v3 = vsel %vm800_vm1, %v810_v63, %v812_v55  ;;  %v815_v4 = vsel %vm800_vm1, %v812_v55, %v814_v13 }
 0x143   : > { %v923_v5 = vsel %vm890_vm6, %v874_v37, %v907_v60  ;;  %v924_v6 = vsel %vm891_vm7, %v875_v42, %v908_v61  ;;  %v752_v7 = vadd.f32 %v712_v1, %v10156_v22  ;;  %v753_v8 = vadd.f32 %v714_v2, %v652_v12  ;;  %v630_v42 = vpop.permute.xlu1 %629 }
 0x144   : > { %940 = vst.msk [vmem:[#allocation2 + $0x18] sm:$0xff] %vm936_vm2, %v923_v5  ;;  %941 = vst.msk [vmem:[#allocation2 + $0x20] sm:$0xff] %vm936_vm2, %v924_v6  ;;  %v818_v10 = vrot.slane %v10214_v43, 2  ;;  %v715_v14 = vrot.slane %v675_v57, 1  ;;  %v776_v32 = vmul.f32 %v10132_v54, %v605_v24  ;;  %v10231_v15 = vmul.f32 %v10139_v59, %v620_v0 }
 0x145   : > { %v853_v63 = vadd.f32 %v813_v3, %v752_v7  ;;  %v854_v16 = vadd.f32 %v815_v4, %v753_v8  ;;  %v10234_v17 = vmul.f32 %v10127_v53, %v620_v0  ;;  %v10237_v22 = vmul.f32 %v10132_v54, %v620_v0 }
 0x146   : > { %v716_v18 = vsel %vm699_vm0, %v713_v23, %v715_v14  ;;  %v718_v19 = vsel %vm699_vm0, %v715_v14, %v717_v56  ;;  %v816_v21 = vrot.slane %v776_v32, 2  ;;  %v656_v11 = vmul.f32 %v10139_v59, %v615_v9 }
 0x147   : > { %v876_v24 = vadd.f32 %v10167_v28, %v853_v63  ;;  %v877_v25 = vadd.f32 %v10167_v28, %v854_v16  ;;  %v754_v26 = vadd.f32 %v716_v18, %v10178_v58  ;;  %v755_v12 = vadd.f32 %v718_v19, %v654_v44  ;;  %v640_v63 = vpop.permute.xlu1 %639 }
 0x148   : > { %v817_v27 = vsel %vm800_vm1, %v814_v13, %v816_v21  ;;  %v819_v29 = vsel %vm800_vm1, %v816_v21, %v818_v10  ;;  %v721_v23 = vrot.slane %v10234_v17, 1  ;;  %v822_v37 = vrot.slane %v10237_v22, 2  ;;  %v625_v13 = vpop.permute.xlu0 %624 }
 0x149   : > { %vm892_vm8 = vcmp.gt.f32.partialorder %v876_v24, 0.0  ;;  %vm893_vm9 = vcmp.gt.f32.partialorder %v877_v25, 0.0  ;;  %v909_v43 = vmul.f32 %v10143_v62, %v876_v24  ;;  %v910_v45 = vmul.f32 %v10143_v62, %v877_v25 }
 0x14a   : > { %v855_v55 = vadd.f32 %v817_v27, %v754_v26  ;;  %v856_v57 = vadd.f32 %v819_v29, %v755_v12  ;;  %v677_v58 = vmul.f32 %v10127_v53, %v615_v9  ;;  %v778_v44 = vmul.f32 %v10132_v54, %v615_v9 }
 0x14b   : > { %v925_v60 = vsel %vm892_vm8, %v876_v24, %v909_v43  ;;  %v926_v61 = vsel %vm893_vm9, %v877_v25, %v910_v45  ;;  %v10256_v0 = vmul.f32 %v10139_v59, %v630_v42  ;;  %v10259_v1 = vmul.f32 %v10127_v53, %v630_v42 }
 0x14c   : > { %942 = vst.msk [vmem:[#allocation2 + $0x28] sm:$0xff] %vm936_vm2, %v925_v60  ;;  %943 = vst.msk [vmem:[#allocation2 + $0x30] sm:$0xff] %vm936_vm2, %v926_v61  ;;  %v878_v2 = vadd.f32 %v10167_v28, %v855_v55  ;;  %v879_v3 = vadd.f32 %v10167_v28, %v856_v57  ;;  %v719_v4 = vrot.slane %v677_v58, 1  ;;  %v820_v5 = vrot.slane %v778_v44, 2  ;;  %v635_v26 = vpop.permute.xlu0 %634 }
 0x14d   : > { %v725_v6 = vrot.slane %v10259_v1, 1  ;;  %v10267_v7 = vmul.f32 %v10132_v54, %v630_v42  ;;  %v658_v8 = vmul.f32 %v10139_v59, %v625_v13  ;;  %v679_v9 = vmul.f32 %v10127_v53, %v625_v13 }
 0x14e   : > { %vm894_vm10 = vcmp.gt.f32.partialorder %v878_v2, 0.0  ;;  %vm895_vm11 = vcmp.gt.f32.partialorder %v879_v3, 0.0  ;;  %v911_v14 = vmul.f32 %v10143_v62, %v878_v2  ;;  %v912_v32 = vmul.f32 %v10143_v62, %v879_v3 }
 0x14f   : > { %v720_v16 = vsel %vm699_vm0, %v717_v56, %v719_v4  ;;  %v722_v17 = vsel %vm699_vm0, %v719_v4, %v721_v23  ;;  %v821_v22 = vsel %vm800_vm1, %v818_v10, %v820_v5  ;;  %v823_v18 = vsel %vm800_vm1, %v820_v5, %v822_v37  ;;  %v982_v4 = vld [vmem:[#allocation2 + $0x3] ss:$4 sm:$0xff] }
 0x150   : > { %v927_v19 = vsel %vm894_vm10, %v878_v2, %v911_v14  ;;  %v928_v21 = vsel %vm895_vm11, %v879_v3, %v912_v32  ;;  %v756_v24 = vadd.f32 %v720_v16, %v10206_v30  ;;  %v757_v25 = vadd.f32 %v722_v17, %v656_v11  ;;  %v974_v3 = vld [vmem:[#allocation2 + $0x2] ss:$4 sm:$0xff]  ;;  %v962_v14 = vld [vmem:[#allocation2 + $0x1] ss:$4 sm:$0xff] }
 0x151   : > { %944 = vst.msk [vmem:[#allocation2 + $0x38] sm:$0xff] %vm936_vm2, %v927_v19  ;;  %945 = vst.msk [vmem:[#allocation2 + $0x40] sm:$0xff] %vm936_vm2, %v928_v21  ;;  %v826_v31 = vrot.slane %v10267_v7, 2  ;;  %v723_v12 = vrot.slane %v679_v9, 1  ;;  %v780_v56 = vmul.f32 %v10132_v54, %v625_v13  ;;  %v661_v27 = vmul.f32 %v10139_v59, %v640_v63 }
 0x152   : > { %v857_v10 = vadd.f32 %v821_v22, %v756_v24  ;;  %v858_v29 = vadd.f32 %v823_v18, %v757_v25  ;;  %v682_v42 = vmul.f32 %v10127_v53, %v640_v63  ;;  %v10287_v43 = vmul.f32 %v10132_v54, %v640_v63 }
 0x153   : > { %v724_v30 = vsel %vm699_vm0, %v721_v23, %v723_v12  ;;  %v726_v11 = vsel %vm699_vm0, %v723_v12, %v725_v6  ;;  %v824_v45 = vrot.slane %v780_v56, 2  ;;  %v660_v55 = vmul.f32 %v10139_v59, %v635_v26 }
 0x154   : > { %v880_v57 = vadd.f32 %v10167_v28, %v857_v10  ;;  %v881_v58 = vadd.f32 %v10167_v28, %v858_v29  ;;  %v758_v44 = vadd.f32 %v724_v30, %v10231_v15  ;;  %v759_v13 = vadd.f32 %v726_v11, %v658_v8 }
 0x155   : > { %v825_v60 = vsel %vm800_vm1, %v822_v37, %v824_v45  ;;  %v827_v61 = vsel %vm800_vm1, %v824_v45, %v826_v31  ;;  %v729_v2 = vrot.slane %v682_v42, 1  ;;  %v830_v23 = vrot.slane %v10287_v43, 2  ;;  %v954_v37 = vld [vmem:[#allocation2] ss:$4 sm:$0xff] }
 0x156   : > { %vm896_vm12 = vcmp.gt.f32.partialorder %v880_v57, 0.0  ;;  %vm897_vm13 = vcmp.gt.f32.partialorder %v881_v58, 0.0  ;;  %v913_v59 = vmul.f32 %v10143_v62, %v880_v57  ;;  %v914_v5 = vmul.f32 %v10143_v62, %v881_v58 }
 0x157   : > { %v859_v7 = vadd.f32 %v825_v60, %v758_v44  ;;  %v860_v9 = vadd.f32 %v827_v61, %v759_v13  ;;  %v762_v15 = vadd.f32 %v729_v2, %v661_v27  ;;  %v681_v8 = vmul.f32 %v10127_v53, %v635_v26  ;;  %v1082_v13 = vld [vmem:[#allocation8 + $0x50] sm:$0xff] }
 0x158   : > { %v929_v32 = vsel %vm896_vm12, %v880_v57, %v913_v59  ;;  %v930_v63 = vsel %vm897_vm13, %v881_v58, %v914_v5  ;;  %v782_v16 = vmul.f32 %v10132_v54, %v635_v26  ;;  %v989_v17 = vmax.f32 %v974_v3, %v982_v4  ;;  %v976_v22 = vld [vmem:[#allocation2 + $0x22] ss:$4 sm:$0xff]  ;;  %v984_v18 = vld [vmem:[#allocation2 + $0x23] ss:$4 sm:$0xff]  ;;  %v956_v30 = vld [vmem:[#allocation2 + $0x20] ss:$4 sm:$0xff] }
 0x159   : > { %946 = vst.msk [vmem:[#allocation2 + $0x48] sm:$0xff] %vm936_vm2, %v929_v32  ;;  %947 = vst.msk [vmem:[#allocation2 + $0x50] sm:$0xff] %vm936_vm2, %v930_v63  ;;  %v882_v19 = vadd.f32 %v10167_v28, %v859_v7  ;;  %v883_v21 = vadd.f32 %v10167_v28, %v860_v9  ;;  %v863_v24 = vadd.f32 %v830_v23, %v762_v15  ;;  %v727_v25 = vrot.slane %v681_v8, 1  ;;  %v964_v11 = vld [vmem:[#allocation2 + $0x21] ss:$4 sm:$0xff] }
 0x15a   : > { %v828_v53 = vrot.slane %v782_v16, 2  ;;  %997 = vrot.lane.b32.xlu0 %v989_v17, %s9814_s18  ;;  %v1032_v12 = vrot.slane %v989_v17, 1  ;;  %v10309_v56 = vmax.f32 %v976_v22, %v984_v18  ;;  %v10311_v54 = vmax.f32 %v954_v37, %v962_v14  ;;  %v1085_v4 = vld [vmem:[#allocation8 + $0x68] sm:$0xff] }
 0x15b   : > { %vm898_vm15 = vcmp.gt.f32.partialorder %v882_v19, 0.0  ;;  %vm899_vm3 = vcmp.gt.f32.partialorder %v883_v21, 0.0  ;;  %v915_v26 = vmul.f32 %v10143_v62, %v882_v19  ;;  %v916_v27 = vmul.f32 %v10143_v62, %v883_v21 }
 0x15c   : > { %v886_v10 = vadd.f32 %v10167_v28, %v863_v24  ;;  %v728_v29 = vsel %vm699_vm0, %v725_v6, %v727_v25  ;;  %v730_v42 = vsel %vm699_vm0, %v727_v25, %v729_v2  ;;  %v829_v43 = vsel %vm800_vm1, %v826_v31, %v828_v53  ;;  %v1086_v24 = vld [vmem:[#allocation8 + $0x70] sm:$0xff]  ;;  %v1087_v25 = vld [vmem:[#allocation8 + $0x78] sm:$0xff] }
 0x15d   : > { %v931_v45 = vsel %vm898_vm15, %v882_v19, %v915_v26  ;;  %v932_v57 = vsel %vm899_vm3, %v883_v21, %v916_v27  ;;  %v760_v58 = vadd.f32 %v728_v29, %v10256_v0  ;;  %v761_v44 = vadd.f32 %v730_v42, %v660_v55  ;;  %v1083_v0 = vld [vmem:[#allocation8 + $0x58] sm:$0xff]  ;;  %v1084_v55 = vld [vmem:[#allocation8 + $0x60] sm:$0xff] }
 0x15e   : > { %948 = vst.msk [vmem:[#allocation2 + $0x58] sm:$0xff] %vm936_vm2, %v931_v45  ;;  %949 = vst.msk [vmem:[#allocation2 + $0x60] sm:$0xff] %vm936_vm2, %v932_v57  ;;  %vm902_vm4 = vcmp.gt.f32.partialorder %v886_v10, 0.0  ;;  %v919_v1 = vmul.f32 %v10143_v62, %v886_v10  ;;  %v831_v6 = vsel %vm800_vm1, %v828_v53, %v830_v23  ;;  %v1033_v60 = vrot.slane %v10309_v56, 1  ;;  %v1088_v53 = vld [vmem:[#allocation8 + $0x80] sm:$0xff]  ;;  %v1089_v57 = vld [vmem:[#allocation8 + $0x88] sm:$0xff] }
 0x15f   : > { %v861_v31 = vadd.f32 %v829_v43, %v760_v58  ;;  %v862_v61 = vadd.f32 %v831_v6, %v761_v44  ;;  %v10327_v2 = vmax.f32 %v956_v30, %v964_v11  ;;  %v1013_v3 = vrot.slane %v10311_v54, 1 }
 0x160   : > { %v935_v59 = vsel %vm902_vm4, %v886_v10, %v919_v1  ;;  %v1034_v5 = vsel %vm699_vm0, %v1032_v12, %v1033_v60  ;;  %v1051_v7 = vrot.slane %v10311_v54, 2  ;;  %v1138_v9 = vand.u32 4294901760, %v1082_v13 }
 0x161   : > { %953 = vst.msk [vmem:[#allocation2 + $0x78] sm:$0x3f] %vm952_vm14, %v935_v59  ;;  %v884_v23 = vadd.f32 %v10167_v28, %v861_v31  ;;  %v885_v15 = vadd.f32 %v10167_v28, %v862_v61  ;;  %1039 = vrot.lane.b32.xlu0 %v1034_v5, %s9815_s15  ;;  %v1014_v8 = vrot.slane %v10327_v2, 1  ;;  %v1052_v37 = vrot.slane %v10327_v2, 2  ;;  %v1091_v59 = vld [vmem:[#allocation8 + $0x98] sm:$0xff] }
 0x162   : > { %v1141_v14 = vand.u32 4294901760, %v1083_v0  ;;  %v10340_v32 = vsub.f32 %v1082_v13, %v1138_v9  ;;  %v1144_v63 = vand.u32 4294901760, %v1084_v55  ;;  %v1147_v16 = vand.u32 4294901760, %v1085_v4 }
 0x163   : > { %vm900_vm5 = vcmp.gt.f32.partialorder %v884_v23, 0.0  ;;  %vm901_vm6 = vcmp.gt.f32.partialorder %v885_v15, 0.0  ;;  %v917_v17 = vmul.f32 %v10143_v62, %v884_v23  ;;  %v918_v22 = vmul.f32 %v10143_v62, %v885_v15 }
 0x164   : > { %v1015_v28 = vsel %vm699_vm0, %v1013_v3, %v1014_v8  ;;  %v1053_v18 = vsel %vm800_vm1, %v1051_v7, %v1052_v37  ;;  %v10348_v19 = vpack.c.bf16 %v1141_v14, %v1138_v9  ;;  %v10350_v21 = vsub.f32 %v1083_v0, %v1141_v14 }
 0x165   : > { %v933_v12 = vsel %vm900_vm5, %v884_v23, %v917_v17  ;;  %v934_v26 = vsel %vm901_vm6, %v885_v15, %v918_v22  ;;  %1020 = vrot.lane.b32.xlu1 %v1015_v28, %s9816_s19  ;;  %v978_v27 = vld [vmem:[#allocation2 + $0x42] ss:$4 sm:$0xff]  ;;  %v986_v62 = vld [vmem:[#allocation2 + $0x43] ss:$4 sm:$0xff]  ;;  %v958_v10 = vld [vmem:[#allocation2 + $0x40] ss:$4 sm:$0xff]  ;;  %v10353_v29 = vsub.f32 %v1084_v55, %v1144_v63  ;;  %v10361_v11 = vpack.c.bf16 %v1147_v16, %v1144_v63 }
 0x166   : > { %950 = vst.msk [vmem:[#allocation2 + $0x68] sm:$0xff] %vm936_vm2, %v933_v12  ;;  %951 = vst.msk [vmem:[#allocation2 + $0x70] sm:$0xff] %vm936_vm2, %v934_v26  ;;  %v10357_v42 = vmax.f32 %v978_v27, %v986_v62  ;;  %v966_v43 = vld [vmem:[#allocation2 + $0x41] ss:$4 sm:$0xff]  ;;  %v1099_v30 = vsel %vm936_vm2, %v1053_v18, 0  ;;  %8132 = vmatpush1.bf16.msra.mxu0 %v10348_v19  ;;  %v10363_v45 = vsub.f32 %v1085_v4, %v1147_v16  ;;  %v1150_v13 = vand.u32 4294901760, %v1086_v24 }
 0x167   : > { %v10365_v58 = vmax.f32 %v958_v10, %v966_v43  ;;  %v10367_v44 = vand.u32 4294901760, %v1099_v30  ;;  %8133 = vmatprep.subr.bf16.mxu0 %v13524_v20  ;;  %v1153_v6 = vand.u32 4294901760, %v1087_v25  ;;  %v1156_v31 = vand.u32 4294901760, %v1088_v53  ;;  %v1090_v4 = vld [vmem:[#allocation8 + $0x90] sm:$0xff] }
 0x168   : > { %1001 = vrot.lane.b32.xlu0 %v10357_v42, %s9814_s18  ;;  %v1035_v1 = vrot.slane %v10357_v42, 1  ;;  %v10379_v0 = vsub.f32 %v1086_v24, %v1150_v13  ;;  %v1159_v55 = vand.u32 4294901760, %v1089_v57  ;;  %v13522_v16 = vand.u32 4294901760, %v10086_v34 }
 0x169   : > { %999 = vrot.lane.b32.xlu1 %v10309_v56, %s9814_s18  ;;  %v1016_v61 = vrot.slane %v10365_v58, 1  ;;  %v10377_v3 = vsub.f32 %v1099_v30, %v10367_v44  ;;  %v10385_v7 = vpack.c.bf16 %v1153_v6, %v1150_v13  ;;  %v10387_v9 = vsub.f32 %v1087_v25, %v1153_v6 }
 0x16a   : > { %v1036_v5 = vsel %vm699_vm0, %v1033_v60, %v1035_v1  ;;  %8135 = vmatpush1.bf16.msra.mxu0 %v10361_v11  ;;  %v10392_v14 = vsub.f32 %v1088_v53, %v1156_v31  ;;  %v10394_v63 = vsub.f32 %v1089_v57, %v1159_v55  ;;  %v1162_v56 = vand.u32 4294901760, %v1090_v4 }
 0x16b   : > { %v1017_v23 = vsel %vm699_vm0, %v1014_v8, %v1016_v61  ;;  %v13523_v15 = vand.u32 4294901760, %v10377_v3  ;;  %8136 = vmatprep.subr.bf16.mxu0 %v13524_v20  ;;  %v1165_v60 = vand.u32 4294901760, %v1091_v59  ;;  %v13521_v17 = vand.u32 4294901760, %v10088_v35 }
 0x16c   : > { %1022 = vrot.lane.b32.xlu0 %v1017_v23, %s9816_s19  ;;  %v13520_v18 = vand.u32 4294901760, %v10090_v36  ;;  %v13519_v24 = vand.u32 4294901760, %v10094_v39  ;;  %v10408_v26 = vpack.c.bf16 %v1159_v55, %v1156_v31  ;;  %v10410_v27 = vsub.f32 %v1090_v4, %v1162_v56 }
 0x16d   : > { %1041 = vrot.lane.b32.xlu1 %v1036_v5, %s9815_s15  ;;  %v1194_v8 = vsub.f32 %v10377_v3, %v13523_v15  ;;  %v960_v22 = vld [vmem:[#allocation2 + $0x60] ss:$4 sm:$0xff]  ;;  %v968_v28 = vld [vmem:[#allocation2 + $0x61] ss:$4 sm:$0xff]  ;;  %v10412_v62 = vsub.f32 %v1091_v59, %v1165_v60  ;;  %v1256_v43 = vsub.f32 %v10086_v34, %v13522_v16  ;;  %v1263_v30 = vsub.f32 %v10088_v35, %v13521_v17 }
 0x16e   : > { %v10405_v25 = vmax.f32 %v960_v22, %v968_v28  ;;  %v980_v53 = vld [vmem:[#allocation2 + $0x62] ss:$4 sm:$0x7f]  ;;  %v988_v12 = vld [vmem:[#allocation2 + $0x63] ss:$4 sm:$0x7f]  ;;  %8138 = vmatpush1.bf16.msra.mxu0 %v10385_v7  ;;  %v1270_v13 = vsub.f32 %v10090_v36, %v13520_v18  ;;  %v10425_v31 = vpack.c.bf16 %v1165_v60, %v1162_v56  ;;  %v1277_v23 = vsub.f32 %v10094_v39, %v13519_v24 }
 0x16f   : > { %13917 = vst [vmem:[#allocation28_spill] sm:$0xff] %v10408_v26  ;;  %v1195_v10 = vand.u32 4294901760, %v1194_v8  ;;  %v992_v42 = vmax.f32 %v980_v53, %v988_v12  ;;  %8139 = vmatprep.subr.bf16.mxu0 %v13524_v20  ;;  %v1257_v55 = vand.u32 4294901760, %v1256_v43  ;;  %v1264_v4 = vand.u32 4294901760, %v1263_v30 }
 0x170   : > { %v1018_v57 = vrot.slane %v10405_v25, 1  ;;  %13918 = vst [vmem:[#allocation29_spill] sm:$0xff] %v10425_v31  ;;  %v1271_v5 = vand.u32 4294901760, %v1270_v13  ;;  %v13514_v8 = vand.u32 4294901760, %v10096_v40  ;;  %v13509_v60 = vand.u32 4294901760, %v10099_v41 }
 0x171   : > { %1196 = vmatprep.mubr.f32.mxu0 %v1195_v10  ;;  %v1037_v6 = vrot.slane %v992_v42, 1  ;;  %v10436_v56 = vpack.c.bf16 %v1264_v4, %v1257_v55  ;;  %v13507_v53 = vand.u32 4294901760, %v10102_v46  ;;  %v1056_v18 = vrot.slane %v10405_v25, 2 }
 0x172   : > { %v1019_v59 = vsel %vm699_vm0, %v1016_v61, %v1018_v57  ;;  %8141 = vmatpush1.bf16.msra.mxu0 %v10408_v26  ;;  %v1278_v61 = vand.u32 4294901760, %v1277_v23  ;;  %v1284_v28 = vsub.f32 %v10096_v40, %v13514_v8  ;;  %v1291_v12 = vsub.f32 %v10099_v41, %v13509_v60 }
 0x173   : > { %1024 = vrot.lane.b32.xlu1 %v1019_v59, %s9816_s19  ;;  %v1038_v22 = vsel %vm699_vm0, %v1035_v1, %v1037_v6  ;;  %8142 = vmatprep.subr.bf16.mxu0 %v13524_v20  ;;  %v13505_v1 = vand.u32 4294901760, %v10104_v47  ;;  %v1298_v30 = vsub.f32 %v10102_v46, %v13507_v53  ;;  %v13504_v59 = vand.u32 4294901760, %v10106_v48 }
 0x174   : > { %1043 = vrot.lane.b32.xlu0 %v1038_v22, %s9815_s15  ;;  %v10449_v10 = vpack.c.bf16 %v1278_v61, %v1271_v5  ;;  %v1285_v43 = vand.u32 4294901760, %v1284_v28  ;;  %v1292_v13 = vand.u32 4294901760, %v1291_v12  ;;  %v13503_v22 = vand.u32 4294901760, %v10108_v49 }
 0x175   : > { %v1305_v55 = vsub.f32 %v10104_v47, %v13505_v1  ;;  %v1299_v4 = vand.u32 4294901760, %v1298_v30  ;;  %v13506_v61 = vand.u32 4294901760, %v10340_v32  ;;  %v13508_v12 = vand.u32 4294901760, %v10350_v21 }
 0x176   : > { %8144 = vmatpush1.bf16.msra.mxu0 %v10425_v31  ;;  %v10461_v5 = vpack.c.bf16 %v1292_v13, %v1285_v43  ;;  %v13510_v43 = vand.u32 4294901760, %v10353_v29  ;;  %v13513_v53 = vand.u32 4294901760, %v10387_v9  ;;  %vm1062_vm0 = vcmask 523264  }
 0x177   : > { %1003 = vrot.lane.b32.xlu1 %v992_v42, %s9814_s18  ;;  %8145 = vmatprep.subr.bf16.mxu0 %v13524_v20  ;;  %v1306_v23 = vand.u32 4294901760, %v1305_v55  ;;  %v1312_v42 = vsub.f32 %v10106_v48, %v13504_v59  ;;  %v1326_v13 = vsub.f32 %v10340_v32, %v13506_v61  ;;  %vm1067_vm7 = vcmask 785408   ;;  %s9727_s18 = sshll.u32 %s9819_s17, 4  ;;  %s9728_s18 = int_to_ptr.vmem [resolvable:$false] %s9727_s18 }
 0x178   : > { %1026 = vrot.lane.b32.xlu0 %v1018_v57, %s9816_s19  ;;  %v1319_v57 = vsub.f32 %v10108_v49, %v13503_v22  ;;  %vm1997_vm10 = vcmask 521216   ;;  %vm9817_vm11 = vmmov 0   ;;  %vm7193_vm5 = vcmask 32768   ;;  %p9730_p3 = scmp.lt.s32.totalorder %s13430_s14, %s9728_s18 }
 0x179   : > { %v10469_v28 = vpack.c.bf16 %v1306_v23, %v1299_v4  ;;  %v1313_v30 = vand.u32 4294901760, %v1312_v42  ;;  %v1340_v4 = vsub.f32 %v10353_v29, %v13510_v43  ;;  %v13511_v23 = vand.u32 4294901760, %v10363_v45 }
 0x17a   : > { %v1320_v55 = vand.u32 4294901760, %v1319_v57  ;;  %v1327_v22 = vand.u32 4294901760, %v1326_v13  ;;  %v13512_v57 = vand.u32 4294901760, %v10379_v0 }
 0x17b   : > { %1045 = vrot.lane.b32.xlu1 %v1037_v6, %s9815_s15  ;;  %v1333_v6 = vsub.f32 %v10350_v21, %v13508_v12  ;;  %v1341_v42 = vand.u32 4294901760, %v1340_v4  ;;  %v1347_v61 = vsub.f32 %v10363_v45, %v13511_v23  ;;  %s9729_s15 = scalar_lea.vmem %s9728_s18, 32 }
 0x17c   : > { %v10486_v59 = vpack.c.bf16 %v1320_v55, %v1313_v30  ;;  %v1354_v43 = vsub.f32 %v10379_v0, %v13512_v57  ;;  %v1361_v30 = vsub.f32 %v10387_v9, %v13513_v53  ;;  %v13515_v55 = vand.u32 4294901760, %v10392_v14 }
 0x17d   : > { %v1334_v1 = vand.u32 4294901760, %v1333_v6  ;;  %v1348_v60 = vand.u32 4294901760, %v1347_v61  ;;  %v13516_v6 = vand.u32 4294901760, %v10394_v63 }
 0x17e   : > { %v1355_v4 = vand.u32 4294901760, %v1354_v43  ;;  %v1362_v23 = vand.u32 4294901760, %v1361_v30 }
 0x17f   : > { %v10493_v12 = vpack.c.bf16 %v1334_v1, %v1327_v22  ;;  %v10501_v13 = vpack.c.bf16 %v1348_v60, %v1341_v42  ;;  %v1368_v1 = vsub.f32 %v10392_v14, %v13515_v55  ;;  %v1375_v22 = vsub.f32 %v10394_v63, %v13516_v6 }
 0x180   : > { %v10511_v61 = vpack.c.bf16 %v1362_v23, %v1355_v4  ;;  %v13518_v60 = vand.u32 4294901760, %v10410_v27  ;;  %v13517_v42 = vand.u32 4294901760, %v10412_v62 }
 0x181   : > { %v1369_v57 = vand.u32 4294901760, %v1368_v1  ;;  %v1376_v53 = vand.u32 4294901760, %v1375_v22 }
 0x182   : > { %v1382_v43 = vsub.f32 %v10410_v27, %v13518_v60  ;;  %v1389_v30 = vsub.f32 %v10412_v62, %v13517_v42  ;;  %v1054_v60 = vrot.slane %v10365_v58, 2 }
 0x183   : > { %v10515_v8 = vpack.c.bf16 %v1376_v53, %v1369_v57 }
 0x184   : > { %v1383_v55 = vand.u32 4294901760, %v1382_v43  ;;  %v1390_v6 = vand.u32 4294901760, %v1389_v30  ;;  %v1055_v24 = vsel %vm800_vm1, %v1052_v37, %v1054_v60 }
 0x185   : > { %v1101_v16 = vsel %vm936_vm2, %v1055_v24, 0 }
 0x186   : > { %v10523_v23 = vpack.c.bf16 %v1390_v6, %v1383_v55  ;;  %v10551_v15 = vand.u32 4294901760, %v1101_v16  ;;  %v1057_v55 = vsel %vm800_vm1, %v1054_v60, %v1056_v18 }
 0x187   : > { %v1103_v37 = vsel %vm936_vm2, %v1057_v55, 0 }
 0x188   : > { %v10557_v43 = vsub.f32 %v1101_v16, %v10551_v15  ;;  %v10564_v1 = vand.u32 4294901760, %v1103_v37 }
 0x18a   : > { %v13530_v4 = vand.u32 4294901760, %v10557_v43 }
 0x18c   : > { %v1209_v20 = vsub.f32 %v10557_v43, %v13530_v4 }
 0x1cc   : > { %v998_v17 = vpop.permute.xlu0 %997 }
 0x1cd   : > { %v1058_v42 = vsel %vm936_vm2, %v10311_v54, %v998_v17 }
 0x1d3   : > { %v1040_v6 = vpop.permute.xlu0 %1039 }
 0x1d7   : > { %v1021_v30 = vpop.permute.xlu1 %1020 }
 0x1d8   : > { %v1063_v22 = vsel %vm1062_vm0, %v1058_v42, %v1021_v30  ;;  %v10574_v42 = vsub.f32 %v1103_v37, %v10564_v1 }
 0x1d9   : > { %v1068_v24 = vsel %vm1067_vm7, %v1063_v22, %v1040_v6  ;;  %v1105_v22 = vsel %vm936_vm2, %v1056_v18, 0  ;;  %v13919_v18 = vmov 0.0|0.0  }
 0x1da   : > { %v10562_v57 = vand.u32 4294901760, %v1068_v24  ;;  %v1002_v53 = vpop.permute.xlu0 %1001  ;;  %v10587_v31 = vand.u32 4294901760, %v1105_v22 }
 0x1db   : > { %v1000_v60 = vpop.permute.xlu1 %999 }
 0x1dc   : > { %v10568_v54 = vsub.f32 %v1068_v24, %v10562_v57  ;;  %v1059_v16 = vsel %vm936_vm2, %v10327_v2, %v1000_v60  ;;  %v10598_v4 = vsub.f32 %v1105_v22, %v10587_v31 }
 0x1de   : > { %v1023_v17 = vpop.permute.xlu0 %1022  ;;  %v13531_v55 = vand.u32 4294901760, %v10568_v54 }
 0x1df   : > { %v1042_v6 = vpop.permute.xlu1 %1041  ;;  %v1064_v30 = vsel %vm1062_vm0, %v1059_v16, %v1023_v17  ;;  %v1210_v16 = vand.u32 4294901760, %v1209_v20  ;;  %v1060_v17 = vsel %vm936_vm2, %v10365_v58, %v1002_v53  ;;  %v13920_v20 = vand.u32 4294901760, %v10574_v42 }
 0x1e0   : > { %v1069_v24 = vsel %vm1067_vm7, %v1064_v30, %v1042_v6  ;;  %v1200_v2 = vsub.f32 %v10568_v54, %v13531_v55 }
 0x1e1   : > { %v10585_v60 = vand.u32 4294901760, %v1069_v24 }
 0x1e2   : > { %v1201_v37 = vand.u32 4294901760, %v1200_v2 }
 0x1e3   : > { %v10591_v26 = vsub.f32 %v1069_v24, %v10585_v60  ;;  %v1224_v24 = vsub.f32 %v10574_v42, %v13920_v20 }
 0x1e4   : > { %1202 = vmatmul.mubr.f32.vlgmr.msra.gmra.mrb[0].mxu0 %v1201_v37 }
 0x1e5   : > { %v1025_v6 = vpop.permute.xlu1 %1024  ;;  %8147 = vmatpush1.bf16.msra.mxu0 %v10436_v56  ;;  %1211 = vmatprep.mubr.f32.mxu0 %v1210_v16  ;;  %v13532_v30 = vand.u32 4294901760, %v10591_v26  ;;  %v1238_v16 = vand.u32 4294901760, %v10598_v4 }
 0x1e6   : > { %v1065_v2 = vsel %vm1062_vm0, %v1060_v17, %v1025_v6  ;;  %v1044_v55 = vpop.permute.xlu0 %1043  ;;  %8148 = vmatprep.subr.bf16.mxu0 %v13919_v18 }
 0x1e7   : > { %v1070_v58 = vsel %vm1067_vm7, %v1065_v2, %v1044_v55  ;;  %v1215_v56 = vsub.f32 %v10591_v26, %v13532_v30  ;;  %v1225_v55 = vand.u32 4294901760, %v1224_v24 }
 0x1e8   : > { %v10609_v53 = vand.u32 4294901760, %v1070_v58 }
 0x1e9   : > { %v1004_v37 = vpop.permute.xlu1 %1003  ;;  %8150 = vmatpush1.bf16.msra.mxu0 %v10449_v10  ;;  %v1216_v22 = vand.u32 4294901760, %v1215_v56 }
 0x1ea   : > { %v10614_v17 = vsub.f32 %v1070_v58, %v10609_v53  ;;  %v1061_v6 = vsel %vm936_vm2, %v10405_v25, %v1004_v37  ;;  %v1027_v20 = vpop.permute.xlu0 %1026  ;;  %8151 = vmatprep.subr.bf16.mxu0 %v13919_v18  ;;  %v1239_v58 = vsub.f32 %v10598_v4, %v1238_v16 }
 0x1eb   : > { %1217 = vmatmul.mubr.f32.gmra.mrb[2].mxu0 %v1216_v22  ;;  %v1066_v30 = vsel %vm1062_vm0, %v1061_v6, %v1027_v20 }
 0x1ec   : > { %1226 = vmatprep.mubr.f32.mxu0 %v1225_v55  ;;  %v1229_v2 = vand.u32 4294901760, %v10614_v17  ;;  %v13928_v55 = vpack.c.bf16 %v10387_v9, %v10379_v0 }
 0x1ed   : > { %v1046_v10 = vpop.permute.xlu1 %1045  ;;  %8153 = vmatpush1.bf16.msra.mxu0 %v10461_v5  ;;  %v1240_v5 = vand.u32 4294901760, %v1239_v58  ;;  %v13930_v58 = vpack.c.bf16 %v10412_v62, %v10410_v27 }
 0x1ee   : > { %v1071_v56 = vsel %vm1067_vm7, %v1066_v30, %v1046_v10  ;;  %8154 = vmatprep.subr.bf16.mxu0 %v13919_v18  ;;  %v1230_v25 = vsub.f32 %v10614_v17, %v1229_v2  ;;  %v13929_v10 = vpack.c.bf16 %v10394_v63, %v10392_v14 }
 0x1ef   : > { %v10630_v24 = vand.u32 4294901760, %v1071_v56 }
 0x1f0   : > { %v1231_v37 = vand.u32 4294901760, %v1230_v25  ;;  %v13933_v25 = vld [vmem:[#allocation29_spill] sm:$0xff] }
 0x1f1   : > { %v10633_v22 = vsub.f32 %v1071_v56, %v10630_v24  ;;  %8156 = vmatpush1.bf16.msra.mxu0 %v10469_v28  ;;  %v13923_v28 = vpack.c.bf16 %v10099_v41, %v10096_v40  ;;  %v13931_v56 = vand.u32 4294901760, %v10377_v3 }
 0x1f2   : > { %1232 = vmatmul.mubr.f32.gmra.mrb[4].mxu0 %v1231_v37  ;;  %8157 = vmatprep.subr.bf16.mxu0 %v13919_v18  ;;  %v13934_v37 = vand.u32 4294901760, %v10086_v34 }
 0x1f3   : > { %1241 = vmatprep.mubr.f32.mxu0 %v1240_v5  ;;  %v1244_v30 = vand.u32 4294901760, %v10633_v22  ;;  %v13935_v5 = vand.u32 4294901760, %v10088_v35 }
 0x1f5   : > { %8159 = vmatpush1.bf16.msra.mxu0 %v10486_v59  ;;  %v1245_v6 = vsub.f32 %v10633_v22, %v1244_v30  ;;  %v13921_v59 = vpack.c.bf16 %v10088_v35, %v10086_v34  ;;  %v13940_v34 = vand.u32 4294901760, %v10591_v26  ;;  %v13941_v35 = vand.u32 4294901760, %v10574_v42 }
 0x1f6   : > { %8160 = vmatprep.subr.bf16.mxu0 %v13919_v18 }
 0x1f7   : > { %v1246_v20 = vand.u32 4294901760, %v1245_v6  ;;  %v8236_v6 = vpack.c.bf16 %v13935_v5, %v13934_v37 }
 0x1f9   : > { %1247 = vmatmul.mubr.f32.gmra.mrb[6].mxu0 %v1246_v20  ;;  %v13936_v20 = vand.u32 4294901760, %v10568_v54 }
 0x1fa   : > { %8162 = vmatpush1.bf16.msra.mxu0 %v10493_v12  ;;  %1417 = vmatprep.mubr.f32.mxu0 %v10367_v44  ;;  %v13924_v12 = vpack.c.bf16 %v10104_v47, %v10102_v46 }
 0x1fb   : > { %8163 = vmatprep.subr.bf16.mxu0 %v13919_v18 }
 0x1fe   : > { %8165 = vmatpush1.bf16.msra.mxu0 %v10501_v13  ;;  %v13925_v13 = vpack.c.bf16 %v10108_v49, %v10106_v48 }
 0x1ff   : > { %8166 = vmatprep.subr.bf16.mxu0 %v13919_v18 }
 0x202   : > { %8168 = vmatpush1.bf16.msra.mxu0 %v10511_v61  ;;  %v13926_v61 = vpack.c.bf16 %v10350_v21, %v10340_v32 }
 0x203   : > { %8169 = vmatprep.subr.bf16.mxu0 %v13919_v18 }
 0x206   : > { %8171 = vmatpush1.bf16.msra.mxu0 %v10515_v8  ;;  %v13922_v8 = vpack.c.bf16 %v10094_v39, %v10090_v36 }
 0x207   : > { %8172 = vmatprep.subr.bf16.mxu0 %v13919_v18 }
 0x20a   : > { %8174 = vmatpush1.bf16.msra.mxu0 %v10523_v23  ;;  %v13927_v23 = vpack.c.bf16 %v10363_v45, %v10353_v29 }
 0x20b   : > { %8175 = vmatprep.subr.bf16.mxu0 %v13919_v18 }
 0x20d   : > { %1419 = vmatmul.mubr.f32.vlgmr.msra.gmra.mrb[0].mxu0 %v10562_v57 }
 0x20e   : > { %1424 = vmatprep.mubr.f32.mxu0 %v10551_v15  ;;  %8177 = vmatpush1.bf16.msra.mxu0 %v13921_v59  ;;  %v13937_v59 = vand.u32 4294901760, %v10557_v43 }
 0x20f   : > { %8178 = vmatprep.subr.bf16.mxu0 %v13919_v18 }
 0x211   : > { %1426 = vmatmul.mubr.f32.gmra.mrb[2].mxu0 %v10585_v60 }
 0x212   : > { %1431 = vmatprep.mubr.f32.mxu0 %v10564_v1  ;;  %8180 = vmatpush1.bf16.msra.mxu0 %v13922_v8  ;;  %v13938_v8 = vand.u32 4294901760, %v10090_v36  ;;  %v13944_v36 = vand.u32 4294901760, %v10102_v46  ;;  %v13948_v46 = vand.u32 4294901760, %v10340_v32  ;;  %v13954_v32 = vand.u32 4294901760, %v10392_v14  ;;  %v2024_v14 = vld [vmem:[#allocation9 + $0x10] sm:$0xff] }
 0x213   : > { %8181 = vmatprep.subr.bf16.mxu0 %v13919_v18 }
 0x215   : > { %1433 = vmatmul.mubr.f32.gmra.mrb[4].mxu0 %v10609_v53 }
 0x216   : > { %1438 = vmatprep.mubr.f32.mxu0 %v10587_v31  ;;  %8183 = vmatpush1.bf16.msra.mxu0 %v13923_v28  ;;  %v13939_v28 = vand.u32 4294901760, %v10094_v39  ;;  %v13945_v39 = vand.u32 4294901760, %v10104_v47  ;;  %v13949_v47 = vand.u32 4294901760, %v10350_v21  ;;  %v13955_v21 = vand.u32 4294901760, %v10394_v63  ;;  %v2025_v63 = vld [vmem:[#allocation9 + $0x18] sm:$0xff] }
 0x217   : > { %8184 = vmatprep.subr.bf16.mxu0 %v13919_v18  ;;  %v2081_v37 = vand.u32 4294901760, %v2025_v63 }
 0x219   : > { %1440 = vmatmul.mubr.f32.gmra.mrb[6].mxu0 %v10630_v24 }
 0x21a   : > { %8186 = vmatpush1.bf16.msra.mxu0 %v13924_v12  ;;  %1551 = vmatprep.mubr.f32.mxu0 %v10377_v3  ;;  %v13932_v3 = vld [vmem:[#allocation28_spill] sm:$0xff]  ;;  %v8239_v12 = vpack.c.bf16 %v13939_v28, %v13938_v8 }
 0x21b   : > { %8187 = vmatprep.subr.bf16.mxu0 %v13919_v18 }
 0x21e   : > { %8189 = vmatpush1.bf16.msra.mxu0 %v13925_v13 }
 0x21f   : > { %8190 = vmatprep.subr.bf16.mxu0 %v13919_v18 }
 0x222   : > { %8192 = vmatpush1.bf16.msra.mxu0 %v13926_v61 }
 0x223   : > { %8193 = vmatprep.subr.bf16.mxu0 %v13919_v18 }
 0x226   : > { %8195 = vmatpush1.bf16.msra.mxu0 %v13927_v23 }
 0x227   : > { %8196 = vmatprep.subr.bf16.mxu0 %v13919_v18 }
 0x22a   : > { %8198 = vmatpush1.bf16.msra.mxu0 %v13928_v55 }
 0x22b   : > { %8199 = vmatprep.subr.bf16.mxu0 %v13919_v18 }
 0x22e   : > { %8201 = vmatpush1.bf16.msra.mxu0 %v13929_v10 }
 0x22f   : > { %8202 = vmatprep.subr.bf16.mxu0 %v13919_v18 }
 0x232   : > { %8204 = vmatpush1.bf16.msra.mxu0 %v13930_v58 }
 0x233   : > { %8205 = vmatprep.subr.bf16.mxu0 %v13919_v18 }
 0x235   : > { %1554 = vmatmul.mubr.f32.vlgmr.msra.gmra.mrb[0].mxu0 %v10568_v54  ;;  %v13942_v54 = vand.u32 4294901760, %v10096_v40  ;;  %v13946_v40 = vand.u32 4294901760, %v10106_v48  ;;  %v13952_v48 = vand.u32 4294901760, %v10379_v0  ;;  %v2041_v0 = vld [vmem:[#allocation9 + $0x98] sm:$0xff] }
 0x236   : > { %1560 = vmatprep.mubr.f32.mxu0 %v10557_v43  ;;  %8207 = vmatpush1.bf16.msra.mxu0 %v10084_v33  ;;  %v13943_v43 = vand.u32 4294901760, %v10099_v41  ;;  %v13947_v41 = vand.u32 4294901760, %v10108_v49  ;;  %v13953_v49 = vand.u32 4294901760, %v10387_v9 }
 0x237   : > { %8208 = vmatprep.subr.bf16.mxu0 %v13919_v18 }
 0x238   : > { %v8242_v13 = vpack.c.bf16 %v13943_v43, %v13942_v54  ;;  %v10855_v43 = vsub.f32 %v2025_v63, %v2081_v37 }
 0x239   : > { %1563 = vmatmul.mubr.f32.gmra.mrb[2].mxu0 %v10591_v26  ;;  %v8245_v26 = vpack.c.bf16 %v13945_v39, %v13944_v36  ;;  %v2046_v36 = vld [vmem:[#allocation9 + $0xc0] sm:$0xff]  ;;  %v2047_v39 = vld [vmem:[#allocation9 + $0xc8] sm:$0xff] }
 0x23a   : > { %1569 = vmatprep.mubr.f32.mxu0 %v10574_v42  ;;  %8210 = vmatpush1.bf16.msra.mxu0 %v10092_v38  ;;  %v8251_v42 = vpack.c.bf16 %v13949_v47, %v13948_v46  ;;  %v2031_v47 = vld [vmem:[#allocation9 + $0x48] sm:$0xff] }
 0x23b   : > { %8211 = vmatprep.subr.bf16.mxu0 %v13919_v18 }
 0x23d   : > { %1572 = vmatmul.mubr.f32.gmra.mrb[4].mxu0 %v10614_v17  ;;  %v13951_v17 = vand.u32 4294901760, %v10363_v45  ;;  %v13957_v45 = vand.u32 4294901760, %v10412_v62 }
 0x23e   : > { %1578 = vmatprep.mubr.f32.mxu0 %v10598_v4  ;;  %8213 = vmatpush1.bf16.msra.mxu0 %v10111_v50  ;;  %v8248_v4 = vpack.c.bf16 %v13947_v41, %v13946_v40 }
 0x23f   : > { %8214 = vmatprep.subr.bf16.mxu0 %v13919_v18 }
 0x241   : > { %1581 = vmatmul.mubr.f32.gmra.mrb[6].mxu0 %v10633_v22  ;;  %v8257_v22 = vpack.c.bf16 %v13953_v49, %v13952_v48  ;;  %v2144_v49 = vand.u32 4294901760, %v2046_v36 }
 0x242   : > { %8216 = vmatpush1.bf16.msra.mxu0 %v10115_v51  ;;  %1673 = vmatprep.mubr.f32.mxu0 %v13931_v56  ;;  %v2044_v56 = vld [vmem:[#allocation9 + $0xb0] sm:$0xff] }
 0x243   : > { %8217 = vmatprep.subr.bf16.mxu0 %v13919_v18  ;;  %v2138_v28 = vand.u32 4294901760, %v2044_v56 }
 0x246   : > { %8219 = vmatpush1.bf16.msra.mxu0 %v10119_v52 }
 0x247   : > { %8220 = vmatprep.subr.bf16.mxu0 %v13919_v18 }
 0x24a   : > { %8222 = vmatpush1.bf16.msra.mxu0 %v10348_v19 }
 0x24b   : > { %8223 = vmatprep.subr.bf16.mxu0 %v13919_v18 }
 0x24e   : > { %8225 = vmatpush1.bf16.msra.mxu0 %v10361_v11 }
 0x24f   : > { %8226 = vmatprep.subr.bf16.mxu0 %v13919_v18 }
 0x252   : > { %8228 = vmatpush1.bf16.msra.mxu0 %v10385_v7 }
 0x253   : > { %8229 = vmatprep.subr.bf16.mxu0 %v13919_v18 }
 0x256   : > { %8231 = vmatpush1.bf16.msra.mxu0 %v13932_v3 }
 0x257   : > { %8232 = vmatprep.subr.bf16.mxu0 %v13919_v18 }
 0x25a   : > { %8234 = vmatpush1.bf16.msra.mxu0 %v13933_v25 }
 0x25b   : > { %8235 = vmatprep.subr.bf16.mxu0 %v13919_v18 }
 0x25d   : > { %1677 = vmatmul.mubr.f32.vlgmr.msra.gmra.mrb[0].mxu0 %v13936_v20 }
 0x25e   : > { %1684 = vmatprep.mubr.f32.mxu0 %v13937_v59  ;;  %8237 = vmatpush1.bf16.msra.mxu0 %v8236_v6  ;;  %v2045_v6 = vld [vmem:[#allocation9 + $0xb8] sm:$0xff] }
 0x25f   : > { %8238 = vmatprep.subr.bf16.mxu0 %v13919_v18 }
 0x261   : > { %1688 = vmatmul.mubr.f32.gmra.mrb[2].mxu0 %v13940_v34  ;;  %v2029_v34 = vld [vmem:[#allocation9 + $0x38] sm:$0xff] }
 0x262   : > { %1695 = vmatprep.mubr.f32.mxu0 %v13941_v35  ;;  %8240 = vmatpush1.bf16.msra.mxu0 %v8239_v12  ;;  %v2028_v12 = vld [vmem:[#allocation9 + $0x30] sm:$0xff]  ;;  %v2093_v48 = vand.u32 4294901760, %v2029_v34 }
 0x263   : > { %8241 = vmatprep.subr.bf16.mxu0 %v13919_v18 }
 0x265   : > { %1699 = vmatmul.mubr.f32.gmra.mrb[4].mxu0 %v1229_v2 }
 0x266   : > { %1706 = vmatprep.mubr.f32.mxu0 %v1238_v16  ;;  %8243 = vmatpush1.bf16.msra.mxu0 %v8242_v13  ;;  %v13950_v16 = vand.u32 4294901760, %v10353_v29  ;;  %v13956_v29 = vand.u32 4294901760, %v10410_v27  ;;  %v2042_v27 = vld [vmem:[#allocation9 + $0xa0] sm:$0xff] }
 0x267   : > { %8244 = vmatprep.subr.bf16.mxu0 %v13919_v18  ;;  %v2132_v5 = vand.u32 4294901760, %v2042_v27 }
 0x268   : > { %v8254_v2 = vpack.c.bf16 %v13951_v17, %v13950_v16  ;;  %v8263_v61 = vpack.c.bf16 %v13957_v45, %v13956_v29  ;;  %v2141_v16 = vand.u32 4294901760, %v2045_v6  ;;  %v10869_v17 = vsub.f32 %v2044_v56, %v2138_v28 }
 0x269   : > { %1710 = vmatmul.mubr.f32.gmra.mrb[6].mxu0 %v1244_v30  ;;  %v8260_v30 = vpack.c.bf16 %v13955_v21, %v13954_v32  ;;  %v10857_v13 = vsub.f32 %v2042_v27, %v2132_v5  ;;  %v2099_v45 = vand.u32 4294901760, %v2031_v47 }
 0x26a   : > { %8246 = vmatpush1.bf16.msra.mxu0 %v8245_v26  ;;  %1840 = vmatprep.mubr.f32.mxu0 %v10367_v44  ;;  %v2030_v26 = vld [vmem:[#allocation9 + $0x40] sm:$0xff]  ;;  %v10873_v21 = vpack.c.bf16 %v2141_v16, %v2138_v28 }
 0x26b   : > { %8247 = vmatprep.subr.bf16.mxu0 %v13919_v18  ;;  %v2096_v32 = vand.u32 4294901760, %v2030_v26 }
 0x26c   : > { %13962 = vst [vmem:[#allocation32_spill] sm:$0xff] %v10873_v21 }
 0x26e   : > { %8249 = vmatpush1.bf16.msra.mxu0 %v8248_v4 }
 0x26f   : > { %8250 = vmatprep.subr.bf16.mxu0 %v13919_v18 }
 0x272   : > { %8252 = vmatpush1.bf16.msra.mxu0 %v8251_v42 }
 0x273   : > { %8253 = vmatprep.subr.bf16.mxu0 %v13919_v18 }
 0x276   : > { %8255 = vmatpush1.bf16.msra.mxu0 %v8254_v2  ;;  %v2090_v2 = vand.u32 4294901760, %v2028_v12 }
 0x277   : > { %8256 = vmatprep.subr.bf16.mxu0 %v13919_v18 }
 0x278   : > { %v10877_v29 = vsub.f32 %v2028_v12, %v2090_v2 }
 0x27a   : > { %8258 = vmatpush1.bf16.msra.mxu0 %v8257_v22  ;;  %v2147_v22 = vand.u32 4294901760, %v2047_v39 }
 0x27b   : > { %8259 = vmatprep.subr.bf16.mxu0 %v13919_v18 }
 0x27e   : > { %8261 = vmatpush1.bf16.msra.mxu0 %v8260_v30  ;;  %v10875_v30 = vsub.f32 %v2045_v6, %v2141_v16  ;;  %v2032_v16 = vld [vmem:[#allocation9 + $0x50] sm:$0xff] }
 0x27f   : > { %8262 = vmatprep.subr.bf16.mxu0 %v13919_v18 }
 0x282   : > { %8264 = vmatpush1.bf16.msra.mxu0 %v8263_v61  ;;  %v10879_v61 = vsub.f32 %v2029_v34, %v2093_v48  ;;  %v2048_v34 = vld [vmem:[#allocation9 + $0xd0] sm:$0xff] }
 0x283   : > { %8265 = vmatprep.subr.bf16.mxu0 %v13919_v18 }
 0x285   : > { %1842 = vmatmul.mubr.f32.vlgmr.msra.gmra.mrb[0].mxu0 %v10562_v57 }
 0x286   : > { %1847 = vmatprep.mubr.f32.mxu0 %v10551_v15  ;;  %8267 = vmatpush1.bf16.msra.mxu0 %v10084_v33  ;;  %v2038_v33 = vld [vmem:[#allocation9 + $0x80] sm:$0xff] }
 0x287   : > { %8268 = vmatprep.subr.bf16.mxu0 %v13919_v18 }
 0x289   : > { %1849 = vmatmul.mubr.f32.gmra.mrb[2].mxu0 %v10585_v60 }
 0x28a   : > { %1854 = vmatprep.mubr.f32.mxu0 %v10564_v1  ;;  %8270 = vmatpush1.bf16.msra.mxu0 %v10092_v38  ;;  %v2039_v38 = vld [vmem:[#allocation9 + $0x88] sm:$0xff] }
 0x28b   : > { %8271 = vmatprep.subr.bf16.mxu0 %v13919_v18 }
 0x28d   : > { %1856 = vmatmul.mubr.f32.gmra.mrb[4].mxu0 %v10609_v53 }
 0x28e   : > { %1861 = vmatprep.mubr.f32.mxu0 %v10587_v31  ;;  %8273 = vmatpush1.bf16.msra.mxu0 %v10111_v50  ;;  %v2022_v50 = vld [vmem:[#allocation9] sm:$0xff] }
 0x28f   : > { %8274 = vmatprep.subr.bf16.mxu0 %v13919_v18 }
 0x291   : > { %1863 = vmatmul.mubr.f32.gmra.mrb[6].mxu0 %v10630_v24 }
 0x292   : > { %8276 = vmatpush1.bf16.msra.mxu0 %v10115_v51  ;;  %1953 = vmatprep.mubr.f32.mxu0 %v10367_v44  ;;  %v2120_v51 = vand.u32 4294901760, %v2038_v33  ;;  %v2040_v44 = vld [vmem:[#allocation9 + $0x90] sm:$0xff] }
 0x293   : > { %8277 = vmatprep.subr.bf16.mxu0 %v13919_v18  ;;  %v2126_v9 = vand.u32 4294901760, %v2040_v44 }
 0x295   : > { %v10844_v58 = vsub.f32 %v2040_v44, %v2126_v9  ;;  %v7353_v44 = vld [vmem:[%s13476_s5] ss:$0 sm:$0xff] }
 0x296   : > { %8279 = vmatpush1.bf16.msra.mxu0 %v10119_v52  ;;  %v2123_v52 = vand.u32 4294901760, %v2039_v38 }
 0x297   : > { %8280 = vmatprep.subr.bf16.mxu0 %v13919_v18 }
 0x298   : > { %v10830_v62 = vpack.c.bf16 %v2123_v52, %v2120_v51 }
 0x29a   : > { %8282 = vmatpush1.bf16.msra.mxu0 %v10348_v19  ;;  %v2023_v19 = vld [vmem:[#allocation9 + $0x8] sm:$0xff]  ;;  %8296 = vmatprep.subr.bf16.mxu1 %v10830_v62 }
 0x29b   : > { %8283 = vmatprep.subr.bf16.mxu0 %v13919_v18 }
 0x29e   : > { %8285 = vmatpush1.bf16.msra.mxu0 %v10361_v11  ;;  %v2072_v11 = vand.u32 4294901760, %v2022_v50 }
 0x29f   : > { %8286 = vmatprep.subr.bf16.mxu0 %v13919_v18 }
 0x2a2   : > { %8288 = vmatpush1.bf16.msra.mxu0 %v10385_v7  ;;  %v2075_v7 = vand.u32 4294901760, %v2023_v19 }
 0x2a3   : > { %8289 = vmatprep.subr.bf16.mxu0 %v13919_v18 }
 0x2a4   : > { %v10838_v23 = vpack.c.bf16 %v2075_v7, %v2072_v11  ;;  %v10840_v55 = vsub.f32 %v2023_v19, %v2075_v7  ;;  %v10893_v19 = vpack.c.bf16 %v2147_v22, %v2144_v49  ;;  %v1985_v7 = vstv %s7343_s4  ;;  %s7347_s4 = sld [smem:[#allocation4 + $0x5]] }
 0x2a6   : > { %8291 = vmatpush1.bf16.msra.mxu0 %v13932_v3  ;;  %8298 = vmatpush3.bf16.msra.mxu1 %v10838_v23  ;;  %13968 = vst [vmem:[#allocation38_spill] sm:$0xff] %v10893_v19 }
 0x2a7   : > { %8292 = vmatprep.subr.bf16.mxu0 %v13919_v18  ;;  %v13544_v18 = vand.u32 4294901760, %v10857_v13 }
 0x2aa   : > { %8294 = vmatpush1.bf16.msra.mxu0 %v13933_v25  ;;  %v2078_v25 = vand.u32 4294901760, %v2024_v14 }
 0x2ac   : > { %v10851_v35 = vpack.c.bf16 %v2081_v37, %v2078_v25  ;;  %v10853_v54 = vsub.f32 %v2024_v14, %v2078_v25 }
 0x2ad   : > { %1955 = vmatmul.mubr.f32.vlgmr.msra.gmra.mrb[0].mxu0 %v10562_v57  ;;  %v10836_v57 = vsub.f32 %v2022_v50, %v2072_v11  ;;  %v10885_v50 = vsub.f32 %v2030_v26, %v2096_v32  ;;  %v10896_v11 = vpack.c.bf16 %v2099_v45, %v2096_v32  ;;  %v2150_v26 = vand.u32 4294901760, %v2048_v34 }
 0x2ae   : > { %1960 = vmatprep.mubr.f32.mxu0 %v10551_v15  ;;  %v2129_v15 = vand.u32 4294901760, %v2041_v0  ;;  %13959 = vst [vmem:[#allocation29_spill] sm:$0xff] %v10851_v35 }
 0x2af   : > { %13965 = vst [vmem:[#allocation35_spill] sm:$0xff] %v10885_v50  ;;  %13969 = vst [vmem:[#allocation39_spill] sm:$0xff] %v10896_v11  ;;  %v10908_v32 = vsub.f32 %v2048_v34, %v2150_v26 }
 0x2b0   : > { %v10842_v10 = vpack.c.bf16 %v2129_v15, %v2126_v9  ;;  %v10847_v3 = vsub.f32 %v2041_v0, %v2129_v15 }
 0x2b1   : > { %1962 = vmatmul.mubr.f32.gmra.mrb[2].mxu0 %v10585_v60  ;;  %v2043_v60 = vld [vmem:[#allocation9 + $0xa8] sm:$0xff] }
 0x2b2   : > { %1967 = vmatprep.mubr.f32.mxu0 %v10564_v1  ;;  %v10834_v1 = vsub.f32 %v2039_v38, %v2123_v52  ;;  %13958 = vst [vmem:[#allocation28_spill] sm:$0xff] %v10842_v10  ;;  %v2135_v20 = vand.u32 4294901760, %v2043_v60  ;;  %8300 = vmatprep.subr.bf16.mxu1 %v10842_v10  ;;  %v10883_v38 = vsub.f32 %v2047_v39, %v2147_v22 }
 0x2b3   : > { %8302 = vmatpush3.bf16.msra.mxu1 %v10851_v35  ;;  %v10890_v52 = vpack.c.bf16 %v2093_v48, %v2090_v2  ;;  %v2033_v2 = vld [vmem:[#allocation9 + $0x58] sm:$0xff]  ;;  %v2102_v48 = vand.u32 4294901760, %v2032_v16 }
 0x2b4   : > { %v10859_v40 = vpack.c.bf16 %v2135_v20, %v2132_v5  ;;  %v10861_v41 = vsub.f32 %v2043_v60, %v2135_v20  ;;  %13964 = vst [vmem:[#allocation34_spill] sm:$0xff] %v10883_v38 }
 0x2b5   : > { %1969 = vmatmul.mubr.f32.gmra.mrb[4].mxu0 %v10609_v53  ;;  %v2026_v53 = vld [vmem:[#allocation9 + $0x20] sm:$0xff]  ;;  %13967 = vst [vmem:[#allocation37_spill] sm:$0xff] %v10890_v52 }
 0x2b6   : > { %1974 = vmatprep.mubr.f32.mxu0 %v10587_v31  ;;  %v10832_v31 = vsub.f32 %v2038_v33, %v2120_v51  ;;  %v2084_v59 = vand.u32 4294901760, %v2026_v53  ;;  %13960 = vst [vmem:[#allocation30_spill] sm:$0xff] %v10859_v40  ;;  %8304 = vmatprep.subr.bf16.mxu1 %v10859_v40  ;;  %v10881_v33 = vsub.f32 %v2046_v36, %v2144_v49  ;;  %v2049_v36 = vld [vmem:[#allocation9 + $0xd8] sm:$0xff]  ;;  %v2105_v49 = vand.u32 4294901760, %v2033_v2 }
 0x2b7   : > { %v10887_v51 = vsub.f32 %v2031_v47, %v2099_v45  ;;  %v2153_v47 = vand.u32 4294901760, %v2049_v36 }
 0x2b8   : > { %v10865_v46 = vsub.f32 %v2026_v53, %v2084_v59  ;;  %13963 = vst [vmem:[#allocation33_spill] sm:$0xff] %v10881_v33 }
 0x2b9   : > { %1976 = vmatmul.mubr.f32.gmra.mrb[6].mxu0 %v10630_v24  ;;  %v2027_v24 = vld [vmem:[#allocation9 + $0x28] sm:$0xff]  ;;  %13966 = vst [vmem:[#allocation36_spill] sm:$0xff] %v10887_v51  ;;  %v10906_v22 = vpack.c.bf16 %v2153_v47, %v2150_v26  ;;  %v10910_v45 = vsub.f32 %v2049_v36, %v2153_v47 }
 0x2ba   : > { %v2087_v8 = vand.u32 4294901760, %v2027_v24 }
 0x2bb   : > { %13970 = vst [vmem:[#allocation40_spill] sm:$0xff] %v10906_v22  ;;  %13971 = vst [vmem:[#allocation41_spill] sm:$0xff] %v10910_v45 }
 0x2bc   : > { %v10863_v4 = vpack.c.bf16 %v2087_v8, %v2084_v59  ;;  %v10867_v42 = vsub.f32 %v2027_v24, %v2087_v8 }
 0x2be   : > { %13961 = vst [vmem:[#allocation31_spill] sm:$0xff] %v10863_v4  ;;  %8306 = vmatpush3.bf16.msra.mxu1 %v10863_v4 }
 0x2bf   : > { %8308 = vmatprep.subr.bf16.mxu1 %v10873_v21 }
 0x2c2   : > { %8310 = vmatpush3.bf16.msra.mxu1 %v10890_v52 }
 0x2c3   : > { %8312 = vmatprep.subr.bf16.mxu1 %v10893_v19 }
 0x2c6   : > { %8314 = vmatpush3.bf16.msra.mxu1 %v10896_v11  ;;  %v13571_v11 = vand.u32 4294901760, %v10910_v45 }
 0x2c7   : > { %8316 = vmatprep.subr.bf16.mxu1 %v10906_v22 }
 0x380   : > { %v1956_v0 = vpop.f32.mrb[0].mxu0 }
 0x381   : > { %v9399_v9 = vadd.f32 %v7353_v44, %v1956_v0  ;;  %v1958_v15 = vpop.f32.mrb[1].mxu0  ;;  %v10914_v0 = vsub.f32 %v2032_v16, %v2102_v48 }
 0x382   : > { %v2051_v15 = vld [vmem:[#allocation9 + $0xe8] sm:$0xff] }
 0x383   : > { %vm1981_vm1 = vcmp.gt.f32.partialorder %v9399_v9, 0.0  ;;  %v1986_v14 = vmul.f32 %v9399_v9, %v1985_v7  ;;  %13973 = vst [vmem:[#allocation43_spill] sm:$0xff] %v10914_v0 }
 0x384   : > { %v1963_v63 = vpop.f32.mrb[2].mxu0 }
 0x385   : > { %v1990_v27 = vsel %vm1981_vm1, %v9399_v9, %v1986_v14  ;;  %v9400_v60 = vadd.f32 %v7353_v44, %v1963_v63  ;;  %v1965_v53 = vpop.f32.mrb[3].mxu0  ;;  %v2050_v9 = vld [vmem:[#allocation9 + $0xe0] sm:$0xff] }
 0x386   : > { %1994 = vst.msk [vmem:[#allocation3] sm:$0xff] %vm1062_vm0, %v1990_v27  ;;  %v2034_v14 = vld [vmem:[#allocation9 + $0x60] sm:$0xff]  ;;  %v2156_v63 = vand.u32 4294901760, %v2050_v9  ;;  %v2159_v27 = vand.u32 4294901760, %v2051_v15 }
 0x387   : > { %vm1982_vm2 = vcmp.gt.f32.partialorder %v9400_v60, 0.0  ;;  %v1987_v24 = vmul.f32 %v9400_v60, %v1985_v7  ;;  %v2108_v53 = vand.u32 4294901760, %v2034_v14 }
 0x388   : > { %v1970_v56 = vpop.f32.mrb[4].mxu0 }
 0x389   : > { %v1991_v25 = vsel %vm1982_vm2, %v9400_v60, %v1987_v24  ;;  %v9401_v37 = vadd.f32 %v7353_v44, %v1970_v56  ;;  %v1972_v5 = vpop.f32.mrb[5].mxu0  ;;  %v2035_v60 = vld [vmem:[#allocation9 + $0x68] sm:$0xff]  ;;  %v2052_v24 = vld [vmem:[#allocation9 + $0xf0] sm:$0xff]  ;;  %v2053_v56 = vld [vmem:[#allocation9 + $0xf8] sm:$0xff] }
 0x38a   : > { %1995 = vst.msk [vmem:[#allocation3 + $0x8] sm:$0xff] %vm1062_vm0, %v1991_v25  ;;  %v2111_v25 = vand.u32 4294901760, %v2035_v60  ;;  %v2165_v5 = vand.u32 4294901760, %v2053_v56 }
 0x38b   : > { %vm1983_vm8 = vcmp.gt.f32.partialorder %v9401_v37, 0.0  ;;  %v1988_v6 = vmul.f32 %v9401_v37, %v1985_v7 }
 0x38c   : > { %v1977_v20 = vpop.f32.mrb[6].mxu0  ;;  %v10928_v34 = vpack.c.bf16 %v2111_v25, %v2108_v53  ;;  %v10930_v36 = vsub.f32 %v2035_v60, %v2111_v25 }
 0x38d   : > { %v1992_v59 = vsel %vm1983_vm8, %v9401_v37, %v1988_v6  ;;  %v9402_v8 = vadd.f32 %v7353_v44, %v1977_v20  ;;  %v1979_v28 = vpop.f32.mrb[7].mxu0  ;;  %v10912_v44 = vpack.c.bf16 %v2105_v49, %v2102_v48  ;;  %v2162_v37 = vand.u32 4294901760, %v2052_v24 }
 0x38e   : > { %1996 = vst.msk [vmem:[#allocation3 + $0x10] sm:$0xff] %vm1062_vm0, %v1992_v59  ;;  %v10920_v6 = vpack.c.bf16 %v2159_v27, %v2156_v63  ;;  %v10922_v20 = vsub.f32 %v2050_v9, %v2156_v63  ;;  %v10924_v59 = vsub.f32 %v2051_v15, %v2159_v27  ;;  %v2036_v28 = vld [vmem:[#allocation9 + $0x70] sm:$0xff]  ;;  %13979 = vst [vmem:[#allocation49_spill] sm:$0xff] %v10928_v34  ;;  %v13535_v15 = vand.u32 4294901760, %v10832_v31 }
 0x38f   : > { %vm1984_vm9 = vcmp.gt.f32.partialorder %v9402_v8, 0.0  ;;  %v1989_v12 = vmul.f32 %v9402_v8, %v1985_v7  ;;  %13972 = vst [vmem:[#allocation42_spill] sm:$0xff] %v10912_v44  ;;  %v10916_v7 = vsub.f32 %v2033_v2, %v2105_v49  ;;  %8318 = vmatpush3.bf16.msra.mxu1 %v10912_v44  ;;  %13980 = vst [vmem:[#allocation50_spill] sm:$0xff] %v10930_v36  ;;  %v2114_v49 = vand.u32 4294901760, %v2036_v28 }
 0x390   : > { %13975 = vst [vmem:[#allocation45_spill] sm:$0xff] %v10920_v6  ;;  %13976 = vst [vmem:[#allocation46_spill] sm:$0xff] %v10922_v20  ;;  %v10934_v26 = vsub.f32 %v2052_v24, %v2162_v37  ;;  %8320 = vmatprep.subr.bf16.mxu1 %v10920_v6  ;;  %v10937_v2 = vsub.f32 %v2053_v56, %v2165_v5  ;;  %v13533_v63 = vand.u32 4294901760, %v10836_v57  ;;  %v13566_v6 = vand.u32 4294901760, %v10887_v51 }
 0x391   : > { %v1993_v39 = vsel %vm1984_vm9, %v9402_v8, %v1989_v12  ;;  %13974 = vst [vmem:[#allocation44_spill] sm:$0xff] %v10916_v7  ;;  %13977 = vst [vmem:[#allocation47_spill] sm:$0xff] %v10924_v59  ;;  %v10926_v8 = vsub.f32 %v2034_v14, %v2108_v53  ;;  %v2037_v12 = vld [vmem:[#allocation9 + $0x78] sm:$0xff]  ;;  %v13534_v14 = vand.u32 4294901760, %v10834_v1  ;;  %v10947_v53 = vsub.f32 %v2036_v28, %v2114_v49 }
 0x392   : > { %1998 = vst.msk [vmem:[#allocation3 + $0x18] sm:$0x3f] %vm1997_vm10, %v1993_v39  ;;  %v10932_v39 = vpack.c.bf16 %v2165_v5, %v2162_v37  ;;  %13982 = vst [vmem:[#allocation52_spill] sm:$0xff] %v10934_v26  ;;  %v2117_v9 = vand.u32 4294901760, %v2037_v12  ;;  %v2299_v56 = vsub.f32 %v10832_v31, %v13535_v15  ;;  %v2187_v37 = vsub.f32 %v10836_v57, %v13533_v63 }
 0x393   : > { %13978 = vst [vmem:[#allocation48_spill] sm:$0xff] %v10926_v8  ;;  %13983 = vst [vmem:[#allocation53_spill] sm:$0xff] %v10937_v2  ;;  %8322 = vmatpush3.bf16.msra.mxu1 %v10928_v34  ;;  %v2306_v25 = vsub.f32 %v10834_v1, %v13534_v14  ;;  %v13537_v5 = vand.u32 4294901760, %v10840_v55  ;;  %v13540_v28 = vand.u32 4294901760, %v10844_v58  ;;  %v13580_v19 = vand.u32 4294901760, %v10926_v8 }
 0x394   : > { %13981 = vst [vmem:[#allocation51_spill] sm:$0xff] %v10932_v39  ;;  %8324 = vmatprep.subr.bf16.mxu1 %v10932_v39  ;;  %v10945_v60 = vpack.c.bf16 %v2117_v9, %v2114_v49  ;;  %13985 = vst [vmem:[#allocation55_spill] sm:$0xff] %v10947_v53  ;;  %v10949_v24 = vsub.f32 %v2037_v12, %v2117_v9  ;;  %v13541_v12 = vand.u32 4294901760, %v10847_v3  ;;  %v2188_v49 = vand.u32 4294901760, %v2187_v37 }
 0x395   : > { %v2194_v9 = vsub.f32 %v10840_v55, %v13537_v5  ;;  %v13547_v5 = vand.u32 4294901760, %v10861_v41  ;;  %v13553_v39 = vand.u32 4294901760, %v10875_v30  ;;  %v13591_v21 = vand.u32 4294901760, %v10947_v53 }
 0x396   : > { %13984 = vst [vmem:[#allocation54_spill] sm:$0xff] %v10945_v60  ;;  %13986 = vst [vmem:[#allocation56_spill] sm:$0xff] %v10949_v24  ;;  %v2320_v14 = vsub.f32 %v10847_v3, %v13541_v12 }
 0x397   : > { %8326 = vmatpush3.bf16.msra.mxu1 %v10945_v60  ;;  %v2195_v37 = vand.u32 4294901760, %v2194_v9  ;;  %v2327_v9 = vsub.f32 %v10857_v13, %v13544_v18 }
 0x398   : > { %v2321_v60 = vand.u32 4294901760, %v2320_v14 }
 0x399   : > { %v2004_v47 = vld [vmem:[#allocation3 + $0x2] ss:$4 sm:$0x7f]  ;;  %v2006_v16 = vld [vmem:[#allocation3 + $0x3] ss:$4 sm:$0x7f]  ;;  %v10985_v12 = vpack.c.bf16 %v2195_v37, %v2188_v49 }
 0x39a   : > { %v2007_v48 = vmax.f32 %v2004_v47, %v2006_v16  ;;  %v2300_v47 = vand.u32 4294901760, %v2299_v56  ;;  %v2307_v16 = vand.u32 4294901760, %v2306_v25  ;;  %v13542_v25 = vand.u32 4294901760, %v10855_v43 }
 0x39b   : > { %v13552_v49 = vand.u32 4294901760, %v10869_v17  ;;  %v2328_v37 = vand.u32 4294901760, %v2327_v9  ;;  %v2348_v9 = vsub.f32 %v10875_v30, %v13553_v39 }
 0x39c   : > { %2009 = vrot.lane.b32.xlu1 %v2007_v48, %s9816_s19  ;;  %v2015_v27 = vrot.slane %v2007_v48, 1  ;;  %v13543_v48 = vand.u32 4294901760, %v10853_v54  ;;  %v8327_v63 = vpack.c.bf16 %v2307_v16, %v2300_v47  ;;  %v2208_v47 = vsub.f32 %v10855_v43, %v13542_v25 }
 0x39d   : > { %v13550_v16 = vand.u32 4294901760, %v10865_v46 }
 0x39e   : > { %2016 = vrot.lane.b32.xlu0 %v2015_v27, %s9816_s19  ;;  %v2313_v27 = vsub.f32 %v10844_v58, %v13540_v28  ;;  %v2201_v56 = vsub.f32 %v10853_v54, %v13543_v48  ;;  %8328 = vmatprep.subr.bf16.mxu1 %v8327_v63  ;;  %v13551_v63 = vand.u32 4294901760, %v10867_v42  ;;  %s7346_s19 = sld [smem:[#allocation4 + $0x4]] }
 0x39f   : > { %v2215_v25 = vsub.f32 %v10865_v46, %v13550_v16 }
 0x3a0   : > { %v2314_v15 = vand.u32 4294901760, %v2313_v27  ;;  %v2202_v28 = vand.u32 4294901760, %v2201_v56  ;;  %v2334_v27 = vsub.f32 %v10861_v41, %v13547_v5  ;;  %v2209_v56 = vand.u32 4294901760, %v2208_v47 }
 0x3a1   : > { %v2222_v18 = vsub.f32 %v10867_v42, %v13551_v63  ;;  %v2216_v34 = vand.u32 4294901760, %v2215_v25  ;;  %v13560_v25 = vand.u32 4294901760, %v10881_v33 }
 0x3a2   : > { %v10994_v14 = vpack.c.bf16 %v2321_v60, %v2314_v15  ;;  %v2335_v48 = vand.u32 4294901760, %v2334_v27  ;;  %v11004_v5 = vpack.c.bf16 %v2209_v56, %v2202_v28  ;;  %v2341_v15 = vsub.f32 %v10869_v17, %v13552_v49 }
 0x3a3   : > { %v13554_v60 = vand.u32 4294901760, %v10877_v29  ;;  %v2223_v16 = vand.u32 4294901760, %v2222_v18  ;;  %v13557_v27 = vand.u32 4294901760, %v10879_v61  ;;  %v13563_v56 = vand.u32 4294901760, %v10883_v38 }
 0x3a4   : > { %v11010_v47 = vpack.c.bf16 %v2335_v48, %v2328_v37  ;;  %v2342_v63 = vand.u32 4294901760, %v2341_v15  ;;  %v2349_v48 = vand.u32 4294901760, %v2348_v9  ;;  %v13568_v37 = vand.u32 4294901760, %v10885_v50 }
 0x3a5   : > { %v2229_v28 = vsub.f32 %v10877_v29, %v13554_v60  ;;  %v11021_v49 = vpack.c.bf16 %v2223_v16, %v2216_v34  ;;  %v2236_v18 = vsub.f32 %v10879_v61, %v13557_v27  ;;  %v2355_v15 = vsub.f32 %v10881_v33, %v13560_v25 }
 0x3a6   : > { %v2362_v60 = vsub.f32 %v10883_v38, %v13563_v56  ;;  %v11034_v34 = vpack.c.bf16 %v2349_v48, %v2342_v63  ;;  %v2243_v9 = vsub.f32 %v10885_v50, %v13568_v37  ;;  %v13567_v25 = vand.u32 4294901760, %v10908_v32 }
 0x3a7   : > { %v2230_v39 = vand.u32 4294901760, %v2229_v28  ;;  %v2237_v16 = vand.u32 4294901760, %v2236_v18  ;;  %v2356_v27 = vand.u32 4294901760, %v2355_v15  ;;  %v2250_v28 = vsub.f32 %v10887_v51, %v13566_v6 }
 0x3a8   : > { %v2363_v44 = vand.u32 4294901760, %v2362_v60  ;;  %v2244_v56 = vand.u32 4294901760, %v2243_v9  ;;  %v13572_v63 = vand.u32 4294901760, %v10914_v0  ;;  %v2369_v60 = vsub.f32 %v10908_v32, %v13567_v25 }
 0x3a9   : > { %v11043_v22 = vpack.c.bf16 %v2237_v16, %v2230_v39  ;;  %v2251_v18 = vand.u32 4294901760, %v2250_v28  ;;  %v13573_v15 = vand.u32 4294901760, %v10916_v7  ;;  %v2376_v6 = vsub.f32 %v10910_v45, %v13571_v11 }
 0x3aa   : > { %v11047_v48 = vpack.c.bf16 %v2363_v44, %v2356_v27  ;;  %v2257_v39 = vsub.f32 %v10914_v0, %v13572_v63  ;;  %v2370_v9 = vand.u32 4294901760, %v2369_v60  ;;  %v13574_v27 = vand.u32 4294901760, %v10922_v20 }
 0x3ab   : > { %v11059_v16 = vpack.c.bf16 %v2251_v18, %v2244_v56  ;;  %v2264_v44 = vsub.f32 %v10916_v7, %v13573_v15  ;;  %v2377_v28 = vand.u32 4294901760, %v2376_v6  ;;  %v13579_v37 = vand.u32 4294901760, %v10924_v59 }
 0x3ac   : > { %v2258_v25 = vand.u32 4294901760, %v2257_v39  ;;  %v2383_v63 = vsub.f32 %v10922_v20, %v13574_v27  ;;  %v13581_v56 = vand.u32 4294901760, %v10930_v36  ;;  %v2271_v6 = vsub.f32 %v10926_v8, %v13580_v19 }
 0x3ad   : > { %v2265_v11 = vand.u32 4294901760, %v2264_v44  ;;  %v11071_v18 = vpack.c.bf16 %v2377_v28, %v2370_v9  ;;  %v2390_v60 = vsub.f32 %v10924_v59, %v13579_v37  ;;  %v13586_v27 = vand.u32 4294901760, %v10934_v26 }
 0x3ae   : > { %v2384_v15 = vand.u32 4294901760, %v2383_v63  ;;  %v2278_v44 = vsub.f32 %v10930_v36, %v13581_v56  ;;  %v2272_v9 = vand.u32 4294901760, %v2271_v6  ;;  %v13593_v28 = vand.u32 4294901760, %v10937_v2 }
 0x3af   : > { %v11079_v39 = vpack.c.bf16 %v2265_v11, %v2258_v25  ;;  %v2391_v52 = vand.u32 4294901760, %v2390_v60  ;;  %v2397_v19 = vsub.f32 %v10934_v26, %v13586_v27  ;;  %v13592_v11 = vand.u32 4294901760, %v10949_v24 }
 0x3b0   : > { %v2279_v37 = vand.u32 4294901760, %v2278_v44  ;;  %v2404_v63 = vsub.f32 %v10937_v2, %v13593_v28  ;;  %v2285_v60 = vsub.f32 %v10947_v53, %v13591_v21  ;;  %v8363_v21 = vpack.c.bf16 %v10847_v3, %v10844_v58 }
 0x3b1   : > { %v8351_v25 = vpack.c.bf16 %v2391_v52, %v2384_v15  ;;  %v2398_v56 = vand.u32 4294901760, %v2397_v19  ;;  %v2292_v44 = vsub.f32 %v10949_v24, %v13592_v11  ;;  %v8359_v52 = vpack.c.bf16 %v10834_v1, %v10832_v31 }
 0x3b2   : > { %v8353_v6 = vpack.c.bf16 %v2279_v37, %v2272_v9  ;;  %v2405_v4 = vand.u32 4294901760, %v2404_v63  ;;  %v2286_v40 = vand.u32 4294901760, %v2285_v60  ;;  %v8361_v15 = vpack.c.bf16 %v10840_v55, %v10836_v57 }
 0x3b3   : > { %v2293_v27 = vand.u32 4294901760, %v2292_v44  ;;  %v8365_v19 = vpack.c.bf16 %v10855_v43, %v10853_v54  ;;  %v8367_v37 = vpack.c.bf16 %v10861_v41, %v10857_v13  ;;  %v8369_v9 = vpack.c.bf16 %v10867_v42, %v10865_v46 }
 0x3b4   : > { %v8355_v35 = vpack.c.bf16 %v2405_v4, %v2398_v56  ;;  %v8373_v4 = vpack.c.bf16 %v10879_v61, %v10877_v29  ;;  %v8377_v56 = vpack.c.bf16 %v10887_v51, %v10885_v50  ;;  %v8379_v63 = vpack.c.bf16 %v10910_v45, %v10908_v32  ;;  %v2001_v51 = vld [vmem:[#allocation3 + $0x1] ss:$4 sm:$0xff] }
 0x3b5   : > { %v8357_v10 = vpack.c.bf16 %v2293_v27, %v2286_v40  ;;  %v8371_v40 = vpack.c.bf16 %v10875_v30, %v10869_v17  ;;  %v8375_v27 = vpack.c.bf16 %v10883_v38, %v10881_v33  ;;  %v8381_v60 = vpack.c.bf16 %v10916_v7, %v10914_v0  ;;  %v1999_v33 = vld [vmem:[#allocation3] ss:$4 sm:$0xff] }
 0x3b6   : > { %v8383_v44 = vpack.c.bf16 %v10924_v59, %v10922_v20  ;;  %v8385_v11 = vpack.c.bf16 %v10930_v36, %v10926_v8  ;;  %v8387_v28 = vpack.c.bf16 %v10937_v2, %v10934_v26  ;;  %v8389_v38 = vpack.c.bf16 %v10949_v24, %v10947_v53 }
 0x3b7   : > { %v11132_v50 = vmax.f32 %v1999_v33, %v2001_v51 }
 0x3b9   : > { %13987 = vst [vmem:[#allocation57_spill] sm:$0xff] %v11132_v50  ;;  %v2013_v0 = vrot.slane %v11132_v50, 1 }
 0x40e   : > { %v2010_v45 = vpop.permute.xlu1 %2009 }
 0x40f   : > { %v2020_v7 = vsel %vm1062_vm0, %v11132_v50, %v2010_v45 }
 0x410   : > { %v11137_v59 = vand.u32 4294901760, %v2020_v7  ;;  %v2017_v20 = vpop.permute.xlu0 %2016 }
 0x411   : > { %v2021_v36 = vsel %vm1062_vm0, %v2013_v0, %v2017_v20  ;;  %v13993_v0 = vld [vmem:[#allocation37_spill] sm:$0xff]  ;;  %v13996_v20 = vld [vmem:[#allocation40_spill] sm:$0xff] }
 0x412   : > { %v11141_v2 = vsub.f32 %v2020_v7, %v11137_v59  ;;  %v11143_v26 = vand.u32 4294901760, %v2021_v36  ;;  %v13995_v7 = vld [vmem:[#allocation39_spill] sm:$0xff] }
 0x414   : > { %v2168_v24 = vsub.f32 %v2021_v36, %v11143_v26  ;;  %v2175_v33 = vand.u32 4294901760, %v11141_v2  ;;  %v13998_v36 = vld [vmem:[#allocation45_spill] sm:$0xff] }
 0x416   : > { %v2169_v51 = vand.u32 4294901760, %v2168_v24  ;;  %v2176_v45 = vsub.f32 %v11141_v2, %v2175_v33 }
 0x418   : > { %v2170_v50 = vsub.f32 %v2168_v24, %v2169_v51  ;;  %v2177_v8 = vand.u32 4294901760, %v2176_v45 }
 0x41a   : > { %v2171_v53 = vand.u32 4294901760, %v2170_v50  ;;  %v13991_v50 = vld [vmem:[#allocation31_spill] sm:$0xff] }
 0x41c   : > { %2172 = vmatprep.mubr.f32.mxu1 %v2171_v53  ;;  %v13999_v53 = vld [vmem:[#allocation49_spill] sm:$0xff] }
 0x41d   : > { %2178 = vmatmul.mubr.f32.vlgmr.msra.gmra.mrb[0].mxu1 %v2177_v8  ;;  %v13997_v8 = vld [vmem:[#allocation42_spill] sm:$0xff] }
 0x41e   : > { %8330 = vmatpush3.bf16.msra.mxu1 %v10985_v12  ;;  %2408 = vmatprep.mubr.f32.mxu1 %v11143_v26  ;;  %v14002_v12 = vand.u32 4294901760, %v10834_v1  ;;  %v14009_v1 = vand.u32 4294901760, %v10855_v43  ;;  %v14016_v43 = vand.u32 4294901760, %v10877_v29 }
 0x41f   : > { %8332 = vmatprep.subr.bf16.mxu1 %v10994_v14 }
 0x422   : > { %8334 = vmatpush3.bf16.msra.mxu1 %v11004_v5  ;;  %v14001_v5 = vand.u32 4294901760, %v10832_v31  ;;  %v14008_v31 = vand.u32 4294901760, %v10853_v54  ;;  %v14015_v54 = vand.u32 4294901760, %v10875_v30  ;;  %v14026_v30 = vand.u32 4294901760, %v10908_v32 }
 0x423   : > { %8336 = vmatprep.subr.bf16.mxu1 %v11010_v47  ;;  %v14004_v47 = vand.u32 4294901760, %v10836_v57 }
 0x424   : > { %v8423_v14 = vpack.c.bf16 %v14002_v12, %v14001_v5  ;;  %v8429_v57 = vpack.c.bf16 %v14009_v1, %v14008_v31  ;;  %v14035_v5 = vld [vmem:[#allocation47_spill] sm:$0xff]  ;;  %v14043_v31 = vld [vmem:[#allocation53_spill] sm:$0xff] }
 0x425   : > { %v14036_v12 = vand.u32 4294901760, %v14035_v5  ;;  %v14044_v1 = vand.u32 4294901760, %v14043_v31 }
 0x426   : > { %8338 = vmatpush3.bf16.msra.mxu1 %v11021_v49  ;;  %v14003_v49 = vld [vmem:[#allocation54_spill] sm:$0xff] }
 0x427   : > { %8340 = vmatprep.subr.bf16.mxu1 %v11034_v34  ;;  %v14005_v34 = vand.u32 4294901760, %v10840_v55  ;;  %v14010_v55 = vand.u32 4294901760, %v10857_v13  ;;  %v14017_v13 = vand.u32 4294901760, %v10879_v61  ;;  %v14029_v61 = vld [vmem:[#allocation43_spill] sm:$0xff] }
 0x42a   : > { %8342 = vmatpush3.bf16.msra.mxu1 %v11043_v22  ;;  %v13992_v22 = vld [vmem:[#allocation32_spill] sm:$0xff] }
 0x42b   : > { %8344 = vmatprep.subr.bf16.mxu1 %v11047_v48  ;;  %v8425_v48 = vpack.c.bf16 %v14005_v34, %v14004_v47  ;;  %v14037_v47 = vld [vmem:[#allocation48_spill] sm:$0xff] }
 0x42c   : > { %v14038_v34 = vand.u32 4294901760, %v14037_v47 }
 0x42e   : > { %8346 = vmatpush3.bf16.msra.mxu1 %v11059_v16  ;;  %v14006_v16 = vand.u32 4294901760, %v10844_v58 }
 0x42f   : > { %8348 = vmatprep.subr.bf16.mxu1 %v11071_v18  ;;  %v14007_v18 = vand.u32 4294901760, %v10847_v3  ;;  %v14012_v3 = vand.u32 4294901760, %v10865_v46 }
 0x432   : > { %8350 = vmatpush3.bf16.msra.mxu1 %v11079_v39  ;;  %v8427_v39 = vpack.c.bf16 %v14007_v18, %v14006_v16  ;;  %v14041_v18 = vld [vmem:[#allocation52_spill] sm:$0xff] }
 0x433   : > { %8352 = vmatprep.subr.bf16.mxu1 %v8351_v25  ;;  %v14014_v25 = vand.u32 4294901760, %v10869_v17 }
 0x436   : > { %8354 = vmatpush3.bf16.msra.mxu1 %v8353_v6  ;;  %v8435_v6 = vpack.c.bf16 %v14015_v54, %v14014_v25  ;;  %v2058_v25 = vld [vmem:[#allocation9 + $0x120] sm:$0xff] }
 0x437   : > { %8356 = vmatprep.subr.bf16.mxu1 %v8355_v35  ;;  %v13989_v35 = vld [vmem:[#allocation29_spill] sm:$0xff] }
 0x43a   : > { %8358 = vmatpush3.bf16.msra.mxu1 %v8357_v10  ;;  %v13988_v10 = vld [vmem:[#allocation28_spill] sm:$0xff] }
 0x43b   : > { %8360 = vmatprep.subr.bf16.mxu1 %v8359_v52  ;;  %v8437_v52 = vpack.c.bf16 %v14017_v13, %v14016_v43  ;;  %v2060_v43 = vld [vmem:[#allocation9 + $0x130] sm:$0xff]  ;;  %v2061_v13 = vld [vmem:[#allocation9 + $0x138] sm:$0xff] }
 0x43d   : > { %2410 = vmatmul.mubr.f32.vlgmr.msra.gmra.mrb[2].mxu1 %v11137_v59 }
 0x43e   : > { %8362 = vmatpush3.bf16.msra.mxu1 %v8361_v15  ;;  %2545 = vmatprep.mubr.f32.mxu1 %v2168_v24  ;;  %v14000_v24 = vld [vmem:[#allocation51_spill] sm:$0xff] }
 0x43f   : > { %8364 = vmatprep.subr.bf16.mxu1 %v8363_v21  ;;  %v13990_v21 = vld [vmem:[#allocation30_spill] sm:$0xff] }
 0x442   : > { %8366 = vmatpush3.bf16.msra.mxu1 %v8365_v19  ;;  %v14020_v19 = vld [vmem:[#allocation34_spill] sm:$0xff] }
 0x443   : > { %8368 = vmatprep.subr.bf16.mxu1 %v8367_v37  ;;  %v14021_v46 = vand.u32 4294901760, %v14020_v19 }
 0x446   : > { %8370 = vmatpush3.bf16.msra.mxu1 %v8369_v9 }
 0x447   : > { %8372 = vmatprep.subr.bf16.mxu1 %v8371_v40  ;;  %v14024_v40 = vld [vmem:[#allocation36_spill] sm:$0xff] }
 0x448   : > { %v14025_v17 = vand.u32 4294901760, %v14024_v40 }
 0x44a   : > { %8374 = vmatpush3.bf16.msra.mxu1 %v8373_v4 }
 0x44b   : > { %8376 = vmatprep.subr.bf16.mxu1 %v8375_v27  ;;  %v14027_v27 = vld [vmem:[#allocation41_spill] sm:$0xff] }
 0x44c   : > { %v14028_v29 = vand.u32 4294901760, %v14027_v27 }
 0x44e   : > { %8378 = vmatpush3.bf16.msra.mxu1 %v8377_v56  ;;  %v8443_v56 = vpack.c.bf16 %v14028_v29, %v14026_v30 }
 0x44f   : > { %8380 = vmatprep.subr.bf16.mxu1 %v8379_v63  ;;  %v14030_v63 = vand.u32 4294901760, %v14029_v61 }
 0x452   : > { %8382 = vmatpush3.bf16.msra.mxu1 %v8381_v60  ;;  %v14031_v60 = vld [vmem:[#allocation44_spill] sm:$0xff] }
 0x453   : > { %8384 = vmatprep.subr.bf16.mxu1 %v8383_v44  ;;  %v14032_v44 = vand.u32 4294901760, %v14031_v60 }
 0x456   : > { %8386 = vmatpush3.bf16.msra.mxu1 %v8385_v11 }
 0x457   : > { %8388 = vmatprep.subr.bf16.mxu1 %v8387_v28  ;;  %v14011_v28 = vand.u32 4294901760, %v10861_v41  ;;  %v14018_v41 = vld [vmem:[#allocation33_spill] sm:$0xff] }
 0x458   : > { %v14019_v15 = vand.u32 4294901760, %v14018_v41 }
 0x459   : > { %v8431_v58 = vpack.c.bf16 %v14011_v28, %v14010_v55  ;;  %v14045_v55 = vld [vmem:[#allocation55_spill] sm:$0xff] }
 0x45a   : > { %8390 = vmatpush3.bf16.msra.mxu1 %v8389_v38  ;;  %v13994_v38 = vld [vmem:[#allocation38_spill] sm:$0xff]  ;;  %v8439_v37 = vpack.c.bf16 %v14021_v46, %v14019_v15  ;;  %v14046_v28 = vand.u32 4294901760, %v14045_v55  ;;  %v2946_v15 = vand.u32 4294901760, %v2058_v25  ;;  %v13610_v46 = vmov 0.0  }
 0x45b   : > { %8392 = vmatprep.subr.bf16.mxu1 %v10830_v62 }
 0x45c   : > { %v11303_v27 = vsub.f32 %v2058_v25, %v2946_v15  ;;  %v7354_v25 = vld [vmem:[%s13478_s7] ss:$0 sm:$0xff] }
 0x45d   : > { %2548 = vmatmul.mubr.f32.vlgmr.msra.gmra.mrb[4].mxu1 %v11141_v2  ;;  %v14013_v2 = vand.u32 4294901760, %v10867_v42  ;;  %v14022_v42 = vld [vmem:[#allocation35_spill] sm:$0xff] }
 0x45e   : > { %8394 = vmatpush3.bf16.msra.mxu1 %v10838_v23  ;;  %2652 = vmatprep.mubr.f32.mxu1 %v2169_v51  ;;  %v14023_v9 = vand.u32 4294901760, %v14022_v42  ;;  %v14033_v51 = vld [vmem:[#allocation46_spill] sm:$0xff]  ;;  %v2955_v42 = vand.u32 4294901760, %v2061_v13  ;;  %v3047_v5 = vand.u32 4294901760, %v11303_v27 }
 0x45f   : > { %8396 = vmatprep.subr.bf16.mxu1 %v13988_v10  ;;  %v8433_v11 = vpack.c.bf16 %v14013_v2, %v14012_v3  ;;  %v14034_v45 = vand.u32 4294901760, %v14033_v51 }
 0x460   : > { %v8441_v4 = vpack.c.bf16 %v14025_v17, %v14023_v9 }
 0x462   : > { %8398 = vmatpush3.bf16.msra.mxu1 %v13989_v35 }
 0x463   : > { %8400 = vmatprep.subr.bf16.mxu1 %v13990_v21 }
 0x466   : > { %8402 = vmatpush3.bf16.msra.mxu1 %v13991_v50 }
 0x467   : > { %8404 = vmatprep.subr.bf16.mxu1 %v13992_v22 }
 0x46a   : > { %8406 = vmatpush3.bf16.msra.mxu1 %v13993_v0 }
 0x46b   : > { %8408 = vmatprep.subr.bf16.mxu1 %v13994_v38 }
 0x46e   : > { %8410 = vmatpush3.bf16.msra.mxu1 %v13995_v7 }
 0x46f   : > { %8412 = vmatprep.subr.bf16.mxu1 %v13996_v20 }
 0x472   : > { %8414 = vmatpush3.bf16.msra.mxu1 %v13997_v8 }
 0x473   : > { %8416 = vmatprep.subr.bf16.mxu1 %v13998_v36 }
 0x476   : > { %8418 = vmatpush3.bf16.msra.mxu1 %v13999_v53 }
 0x477   : > { %8420 = vmatprep.subr.bf16.mxu1 %v14000_v24 }
 0x47a   : > { %8422 = vmatpush3.bf16.msra.mxu1 %v14003_v49 }
 0x47b   : > { %8424 = vmatprep.subr.bf16.mxu1 %v8423_v14  ;;  %v8447_v14 = vpack.c.bf16 %v14036_v12, %v14034_v45  ;;  %v11320_v45 = vsub.f32 %v2061_v13, %v2955_v42  ;;  %v3484_v13 = vld [vmem:[#allocation11 + $0x8] sm:$0xff] }
 0x47d   : > { %2656 = vmatmul.mubr.f32.vlgmr.msra.gmra.mrb[6].mxu1 %v2175_v33  ;;  %v8445_v33 = vpack.c.bf16 %v14032_v44, %v14030_v63 }
 0x47e   : > { %8426 = vmatpush3.bf16.msra.mxu1 %v8425_v48  ;;  %2822 = vmatprep.mubr.f32.mxu1 %v11143_v26  ;;  %v14039_v48 = vld [vmem:[#allocation50_spill] sm:$0xff] }
 0x47f   : > { %8428 = vmatprep.subr.bf16.mxu1 %v8427_v39  ;;  %v14040_v32 = vand.u32 4294901760, %v14039_v48  ;;  %v14042_v39 = vand.u32 4294901760, %v14041_v18 }
 0x481   : > { %v8449_v16 = vpack.c.bf16 %v14040_v32, %v14038_v34  ;;  %v3048_v32 = vsub.f32 %v11303_v27, %v3047_v5 }
 0x482   : > { %8430 = vmatpush3.bf16.msra.mxu1 %v8429_v57  ;;  %v8451_v57 = vpack.c.bf16 %v14044_v1, %v14042_v39  ;;  %v3068_v39 = vand.u32 4294901760, %v11320_v45 }
 0x483   : > { %8432 = vmatprep.subr.bf16.mxu1 %v8431_v58  ;;  %v14047_v58 = vld [vmem:[#allocation56_spill] sm:$0xff] }
 0x484   : > { %v14048_v3 = vand.u32 4294901760, %v14047_v58  ;;  %v3069_v58 = vsub.f32 %v11320_v45, %v3068_v39 }
 0x486   : > { %8434 = vmatpush3.bf16.msra.mxu1 %v8433_v11  ;;  %v8453_v2 = vpack.c.bf16 %v14048_v3, %v14046_v28 }
 0x487   : > { %8436 = vmatprep.subr.bf16.mxu1 %v8435_v6 }
 0x48a   : > { %8438 = vmatpush3.bf16.msra.mxu1 %v8437_v52 }
 0x48b   : > { %8440 = vmatprep.subr.bf16.mxu1 %v8439_v37  ;;  %v2952_v37 = vand.u32 4294901760, %v2060_v43 }
 0x48d   : > { %v11309_v61 = vpack.c.bf16 %v2955_v42, %v2952_v37  ;;  %v11318_v51 = vsub.f32 %v2060_v43, %v2952_v37  ;;  %v3488_v37 = vld [vmem:[#allocation11 + $0x28] sm:$0xff]  ;;  %v3490_v42 = vld [vmem:[#allocation11 + $0x38] sm:$0xff] }
 0x48e   : > { %8442 = vmatpush3.bf16.msra.mxu1 %v8441_v4 }
 0x48f   : > { %8444 = vmatprep.subr.bf16.mxu1 %v8443_v56  ;;  %v3061_v18 = vand.u32 4294901760, %v11318_v51 }
 0x491   : > { %v3062_v28 = vsub.f32 %v11318_v51, %v3061_v18 }
 0x492   : > { %8446 = vmatpush3.bf16.msra.mxu1 %v8445_v33 }
 0x493   : > { %8448 = vmatprep.subr.bf16.mxu1 %v8447_v14 }
 0x496   : > { %8450 = vmatpush3.bf16.msra.mxu1 %v8449_v16 }
 0x497   : > { %8452 = vmatprep.subr.bf16.mxu1 %v8451_v57  ;;  %v3049_v57 = vand.u32 4294901760, %v3048_v32 }
 0x49a   : > { %8454 = vmatpush3.bf16.msra.mxu1 %v8453_v2  ;;  %v3063_v2 = vand.u32 4294901760, %v3062_v28 }
 0x49b   : > { %8456 = vmatprep.subr.bf16.mxu1 %v10830_v62  ;;  %v2054_v62 = vld [vmem:[#allocation9 + $0x100] sm:$0xff] }
 0x49d   : > { %2824 = vmatmul.mubr.f32.vlgmr.msra.gmra.mrb[8].mxu1 %v11137_v59 }
 0x49e   : > { %8458 = vmatpush3.bf16.msra.mxu1 %v10838_v23  ;;  %2926 = vmatprep.mubr.f32.mxu1 %v11143_v26  ;;  %v2055_v23 = vld [vmem:[#allocation9 + $0x108] sm:$0xff] }
 0x49f   : > { %8460 = vmatprep.subr.bf16.mxu1 %v13988_v10  ;;  %v14049_v26 = vld [vmem:[#allocation57_spill] sm:$0xff] }
 0x4a0   : > { %v2019_v10 = vrot.slane %v14049_v26, 2 }
 0x4a2   : > { %8462 = vmatpush3.bf16.msra.mxu1 %v13989_v35  ;;  %v2934_v35 = vand.u32 4294901760, %v2054_v62 }
 0x4a3   : > { %8464 = vmatprep.subr.bf16.mxu1 %v13990_v21  ;;  %v2937_v21 = vand.u32 4294901760, %v2055_v23 }
 0x4a6   : > { %8466 = vmatpush3.bf16.msra.mxu1 %v13991_v50  ;;  %v2056_v50 = vld [vmem:[#allocation9 + $0x110] sm:$0xff] }
 0x4a7   : > { %8468 = vmatprep.subr.bf16.mxu1 %v13992_v22  ;;  %v2057_v22 = vld [vmem:[#allocation9 + $0x118] sm:$0xff] }
 0x4aa   : > { %8470 = vmatpush3.bf16.msra.mxu1 %v13993_v0  ;;  %v2069_v0 = vsel %vm1062_vm0, %v2019_v10, 0 }
 0x4ab   : > { %8472 = vmatprep.subr.bf16.mxu1 %v13994_v38  ;;  %v11266_v38 = vsub.f32 %v2054_v62, %v2934_v35  ;;  %v11273_v11 = vand.u32 4294901760, %v2069_v0  ;;  %v3070_v62 = vand.u32 4294901760, %v3069_v58 }
 0x4ae   : > { %8474 = vmatpush3.bf16.msra.mxu1 %v13995_v7  ;;  %v11268_v7 = vsub.f32 %v2055_v23, %v2937_v21  ;;  %v8509_v23 = vpack.c.bf16 %v3070_v62, %v3063_v2  ;;  %v11436_v2 = vld [vmem:[#allocation11 + $0x70] sm:$0xff] }
 0x4af   : > { %8476 = vmatprep.subr.bf16.mxu1 %v13996_v20  ;;  %v11271_v20 = vpack.c.bf16 %v2937_v21, %v2934_v35  ;;  %v8521_v21 = vpack.c.bf16 %v11320_v45, %v11318_v51 }
 0x4b0   : > { %v3026_v52 = vand.u32 4294901760, %v11268_v7  ;;  %v8512_v26 = vpack.c.bf16 %v11268_v7, %v11266_v38 }
 0x4b2   : > { %8478 = vmatpush3.bf16.msra.mxu1 %v13997_v8  ;;  %v2940_v8 = vand.u32 4294901760, %v2056_v50  ;;  %v3027_v40 = vsub.f32 %v11268_v7, %v3026_v52  ;;  %v8545_v7 = vpack.c.bf16 %v3068_v39, %v3061_v18 }
 0x4b3   : > { %8480 = vmatprep.subr.bf16.mxu1 %v13998_v36  ;;  %v2943_v36 = vand.u32 4294901760, %v2057_v22 }
 0x4b4   : > { %v11277_v54 = vsub.f32 %v2056_v50, %v2940_v8  ;;  %v3028_v60 = vand.u32 4294901760, %v3027_v40 }
 0x4b5   : > { %v11279_v6 = vsub.f32 %v2057_v22, %v2943_v36  ;;  %v11284_v41 = vpack.c.bf16 %v2943_v36, %v2940_v8 }
 0x4b6   : > { %8482 = vmatpush3.bf16.msra.mxu1 %v13999_v53  ;;  %v14050_v53 = vmov 0.0|0.0   ;;  %v3033_v17 = vand.u32 4294901760, %v11277_v54 }
 0x4b7   : > { %8484 = vmatprep.subr.bf16.mxu1 %v14000_v24  ;;  %v2059_v24 = vld [vmem:[#allocation9 + $0x128] sm:$0xff]  ;;  %v3040_v4 = vand.u32 4294901760, %v11279_v6  ;;  %v8515_v10 = vpack.c.bf16 %v11279_v6, %v11277_v54 }
 0x4b8   : > { %v2949_v19 = vand.u32 4294901760, %v2059_v24  ;;  %v3034_v44 = vsub.f32 %v11277_v54, %v3033_v17 }
 0x4b9   : > { %v3041_v33 = vsub.f32 %v11279_v6, %v3040_v4  ;;  %v8539_v36 = vpack.c.bf16 %v3040_v4, %v3033_v17  ;;  %v3599_v17 = vand.u32 4294901760, %v3488_v37  ;;  %v3603_v4 = vand.u32 4294901760, %v3490_v42 }
 0x4ba   : > { %8486 = vmatpush3.bf16.msra.mxu1 %v14003_v49  ;;  %v3019_v49 = vand.u32 4294901760, %v11266_v38  ;;  %v11301_v30 = vpack.c.bf16 %v2949_v19, %v2946_v15  ;;  %v11305_v29 = vsub.f32 %v2059_v24, %v2949_v19  ;;  %v3035_v34 = vand.u32 4294901760, %v3034_v44  ;;  %v3485_v19 = vld [vmem:[#allocation11 + $0x10] sm:$0xff]  ;;  %v3492_v44 = vld [vmem:[#allocation11 + $0x48] sm:$0xff] }
 0x4bb   : > { %8487 = vmatprep.subr.bf16.mxu1 %v14050_v53  ;;  %v3042_v48 = vand.u32 4294901760, %v3041_v33  ;;  %v3597_v40 = vand.u32 4294901760, %v3485_v19  ;;  %v11413_v51 = vsub.f32 %v3488_v37, %v3599_v17  ;;  %v11415_v45 = vsub.f32 %v3490_v42, %v3603_v4 }
 0x4bc   : > { %v3020_v9 = vsub.f32 %v11266_v38, %v3019_v49  ;;  %v3054_v12 = vand.u32 4294901760, %v11305_v29  ;;  %v8518_v35 = vpack.c.bf16 %v11305_v29, %v11303_v27  ;;  %v8536_v8 = vpack.c.bf16 %v3026_v52, %v3019_v49  ;;  %v3486_v49 = vld [vmem:[#allocation11 + $0x18] sm:$0xff]  ;;  %v3483_v52 = vld [vmem:[#allocation11] sm:$0xff] }
 0x4bd   : > { %2928 = vmatmul.mubr.f32.vlgmr.msra.gmra.mrb[10].mxu1 %v11137_v59  ;;  %v11290_v59 = vsub.f32 %v2069_v0, %v11273_v11  ;;  %v8503_v1 = vpack.c.bf16 %v3042_v48, %v3035_v34  ;;  %v3595_v15 = vand.u32 4294901760, %v3486_v49  ;;  %v3487_v27 = vld [vmem:[#allocation11 + $0x20] sm:$0xff]  ;;  %v11411_v33 = vsub.f32 %v3485_v19, %v3597_v40 }
 0x4be   : > { %8489 = vmatpush3.bf16.msra.mxu1 %v11271_v20  ;;  %7903 = vmatprep.mubr.msk.f32.mxu1 %vm9817_vm11, %v13610_v46  ;;  %v3021_v63 = vand.u32 4294901760, %v3020_v9  ;;  %v3055_v16 = vsub.f32 %v11305_v29, %v3054_v12  ;;  %v8542_v38 = vpack.c.bf16 %v3054_v12, %v3047_v5  ;;  %v3489_v29 = vld [vmem:[#allocation11 + $0x30] sm:$0xff]  ;;  %v3494_v12 = vld [vmem:[#allocation11 + $0x58] sm:$0xff]  ;;  %v8691_v18 = vpack.c.bf16 %v11415_v45, %v11413_v51 }
 0x4bf   : > { %8490 = vmatprep.subr.bf16.mxu1 %v14050_v53  ;;  %v3008_v56 = vand.u32 4294901760, %v11290_v59  ;;  %v3605_v5 = vand.u32 4294901760, %v3489_v29 }
 0x4c0   : > { %v8500_v47 = vpack.c.bf16 %v3028_v60, %v3021_v63  ;;  %v3056_v55 = vand.u32 4294901760, %v3055_v16  ;;  %v3601_v60 = vand.u32 4294901760, %v3487_v27 }
 0x4c1   : > { %v3009_v14 = vsub.f32 %v11290_v59, %v3008_v56  ;;  %v11430_v39 = vsub.f32 %v3489_v29, %v3605_v5 }
 0x4c2   : > { %8492 = vmatpush3.bf16.msra.mxu1 %v11284_v41  ;;  %v8506_v3 = vpack.c.bf16 %v3056_v55, %v3049_v57  ;;  %v11420_v48 = vsub.f32 %v3487_v27, %v3601_v60  ;;  %v3611_v55 = vand.u32 4294901760, %v3494_v12 }
 0x4c3   : > { %8493 = vmatprep.subr.bf16.mxu1 %v14050_v53  ;;  %v3010_v31 = vand.u32 4294901760, %v3009_v14  ;;  %v3491_v14 = vld [vmem:[#allocation11 + $0x40] sm:$0xff] }
 0x4c4   : > { %v3609_v28 = vand.u32 4294901760, %v3491_v14  ;;  %v8693_v62 = vpack.c.bf16 %v11430_v39, %v11420_v48 }
 0x4c6   : > { %8495 = vmatpush3.bf16.msra.mxu1 %v11301_v30 }
 0x4c7   : > { %8496 = vmatprep.subr.bf16.mxu1 %v14050_v53 }
 0x4ca   : > { %8498 = vmatpush3.bf16.msra.mxu1 %v11309_v61 }
 0x4cb   : > { %8499 = vmatprep.subr.bf16.mxu1 %v14050_v53 }
 0x4cd   : > { %7904 = vmatmul.mubr.f32.vlgmr.msra.gmra.mrb[12].mxu1 %v3010_v31  ;;  %v3607_v31 = vand.u32 4294901760, %v3492_v44 }
 0x4ce   : > { %8501 = vmatpush3.bf16.msra.mxu1 %v8500_v47  ;;  %7922 = vmatprep.mubr.msk.f32.mxu1 %vm9817_vm11, %v13610_v46  ;;  %v3493_v47 = vld [vmem:[#allocation11 + $0x50] sm:$0xff] }
 0x4cf   : > { %8502 = vmatprep.subr.bf16.mxu1 %v14050_v53  ;;  %v3613_v58 = vand.u32 4294901760, %v3493_v47 }
 0x4d2   : > { %8504 = vmatpush3.bf16.msra.mxu1 %v8503_v1  ;;  %v3498_v1 = vld [vmem:[#allocation11 + $0x78] sm:$0xff] }
 0x4d3   : > { %8505 = vmatprep.subr.bf16.mxu1 %v14050_v53 }
 0x4d6   : > { %8507 = vmatpush3.bf16.msra.mxu1 %v8506_v3  ;;  %v11434_v3 = vld [vmem:[#allocation11 + $0x60] sm:$0xff] }
 0x4d7   : > { %8508 = vmatprep.subr.bf16.mxu1 %v14050_v53 }
 0x4da   : > { %8510 = vmatpush3.bf16.msra.mxu1 %v8509_v23  ;;  %v11441_v23 = vsub.f32 %v3492_v44, %v3607_v31 }
 0x4db   : > { %8511 = vmatprep.subr.bf16.mxu1 %v14050_v53 }
 0x4dd   : > { %7923 = vmatmul.mubr.f32.vlgmr.msra.gmra.mrb[12].mxu1 %v11273_v11 }
 0x4de   : > { %8513 = vmatpush3.bf16.msra.mxu1 %v8512_v26  ;;  %7941 = vmatprep.mubr.msk.f32.mxu1 %vm9817_vm11, %v13610_v46  ;;  %v11443_v26 = vpack.c.bf16 %v3603_v4, %v3599_v17  ;;  %v11493_v17 = vld [vmem:[#allocation11 + $0xb0] sm:$0xff]  ;;  %v11495_v4 = vpack.c.bf16 %v3613_v58, %v3609_v28 }
 0x4df   : > { %8514 = vmatprep.subr.bf16.mxu1 %v14050_v53 }
 0x4e0   : > { %14053 = vst [vmem:[#allocation30_spill] sm:$0xff] %v11443_v26  ;;  %14056 = vst [vmem:[#allocation37_spill] sm:$0xff] %v11495_v4 }
 0x4e2   : > { %8516 = vmatpush3.bf16.msra.mxu1 %v8515_v10 }
 0x4e3   : > { %8517 = vmatprep.subr.bf16.mxu1 %v14050_v53 }
 0x4e6   : > { %8519 = vmatpush3.bf16.msra.mxu1 %v8518_v35  ;;  %v11447_v35 = vsub.f32 %v3494_v12, %v3611_v55 }
 0x4e7   : > { %8520 = vmatprep.subr.bf16.mxu1 %v14050_v53 }
 0x4ea   : > { %8522 = vmatpush3.bf16.msra.mxu1 %v8521_v21  ;;  %v11449_v21 = vsub.f32 %v3491_v14, %v3609_v28 }
 0x4eb   : > { %8523 = vmatprep.subr.bf16.mxu1 %v14050_v53 }
 0x4ed   : > { %7942 = vmatmul.mubr.f32.vlgmr.msra.gmra.mrb[12].mxu1 %v11290_v59  ;;  %v3593_v59 = vand.u32 4294901760, %v3483_v52 }
 0x4ee   : > { %8525 = vmatpush3.bf16.msra.mxu1 %v11271_v20  ;;  %7960 = vmatprep.mubr.msk.f32.mxu1 %vm9817_vm11, %v13610_v46 }
 0x4ef   : > { %8526 = vmatprep.subr.bf16.mxu1 %v14050_v53  ;;  %v11408_v63 = vsub.f32 %v3483_v52, %v3593_v59  ;;  %v11432_v57 = vpack.c.bf16 %v3597_v40, %v3593_v59  ;;  %v11487_v59 = vpack.c.bf16 %v3611_v55, %v3607_v31  ;;  %v11491_v40 = vld [vmem:[#allocation11 + $0xa0] sm:$0xff] }
 0x4f0   : > { %v7391_v50 = vpop.f32.mrb[0].mxu1 }
 0x4f1   : > { %v7392_v22 = vpop.f32.mrb[1].mxu1  ;;  %v8689_v16 = vpack.c.bf16 %v11411_v33, %v11408_v63  ;;  %14052 = vst [vmem:[#allocation29_spill] sm:$0xff] %v11432_v57  ;;  %14055 = vst [vmem:[#allocation32_spill] sm:$0xff] %v11487_v59 }
 0x4f2   : > { %v7393_v0 = vadd.f32 %v7392_v22, %v7391_v50  ;;  %8528 = vmatpush3.bf16.msra.mxu1 %v11284_v41  ;;  %v11451_v50 = vsub.f32 %v3493_v47, %v3613_v58  ;;  %v11453_v22 = vld [vmem:[#allocation11 + $0x88] sm:$0xff]  ;;  %v11511_v47 = vld [vmem:[#allocation11 + $0xd8] sm:$0xff]  ;;  %v11528_v58 = vld [vmem:[#allocation11 + $0xc0] sm:$0xff] }
 0x4f3   : > { %8529 = vmatprep.subr.bf16.mxu1 %v14050_v53 }
 0x4f4   : > { %v2180_v6 = vadd.f32 %v7393_v0, %v7354_v25  ;;  %v11455_v0 = vld [vmem:[#allocation11 + $0x98] sm:$0xff]  ;;  %v11464_v25 = vld [vmem:[#allocation11 + $0x90] sm:$0xff] }
 0x4f5   : > { %v3627_v52 = vand.u32 4294901760, %v11455_v0  ;;  %v3629_v42 = vand.u32 4294901760, %v11464_v25 }
 0x4f6   : > { %8531 = vmatpush3.bf16.msra.mxu1 %v11301_v30 }
 0x4f7   : > { %8532 = vmatprep.subr.bf16.mxu1 %v14050_v53  ;;  %v11501_v29 = vsub.f32 %v11455_v0, %v3627_v52 }
 0x4fa   : > { %8534 = vmatpush3.bf16.msra.mxu1 %v11309_v61 }
 0x4fb   : > { %8535 = vmatprep.subr.bf16.mxu1 %v14050_v53 }
 0x4fd   : > { %7961 = vmatmul.mubr.f32.vlgmr.msra.gmra.mrb[12].mxu1 %v3008_v56 }
 0x4fe   : > { %8537 = vmatpush3.bf16.msra.mxu1 %v8536_v8  ;;  %7979 = vmatprep.mubr.msk.f32.mxu1 %vm9817_vm11, %v13610_v46 }
 0x4ff   : > { %8538 = vmatprep.subr.bf16.mxu1 %v14050_v53 }
 0x502   : > { %8540 = vmatpush3.bf16.msra.mxu1 %v8539_v36  ;;  %v3617_v36 = vand.u32 4294901760, %v11434_v3 }
 0x503   : > { %8541 = vmatprep.subr.bf16.mxu1 %v14050_v53 }
 0x506   : > { %8543 = vmatpush3.bf16.msra.mxu1 %v8542_v38  ;;  %v3621_v38 = vand.u32 4294901760, %v11436_v2 }
 0x507   : > { %8544 = vmatprep.subr.bf16.mxu1 %v14050_v53 }
 0x50a   : > { %8546 = vmatpush3.bf16.msra.mxu1 %v8545_v7  ;;  %v11462_v7 = vld [vmem:[#allocation11 + $0x80] sm:$0xff] }
 0x50b   : > { %8547 = vmatprep.subr.bf16.mxu1 %v14050_v53  ;;  %v3625_v37 = vand.u32 4294901760, %v11462_v7 }
 0x50d   : > { %7980 = vmatmul.mubr.f32.vlgmr.msra.gmra.mrb[12].mxu1 %v11273_v11  ;;  %v11506_v44 = vsub.f32 %v11462_v7, %v3625_v37 }
 0x50e   : > { %8549 = vmatpush3.bf16.msra.mxu1 %v11271_v20  ;;  %7998 = vmatprep.mubr.msk.f32.mxu1 %vm9817_vm11, %v13610_v46  ;;  %v3591_v20 = vand.u32 4294901760, %v3484_v13  ;;  %v11571_v46 = vld [vmem:[#allocation11 + $0x118] sm:$0xff] }
 0x50f   : > { %8550 = vmatprep.subr.bf16.mxu1 %v14050_v53 }
 0x510   : > { %v7426_v24 = vpop.f32.mrb[2].mxu1  ;;  %v11404_v56 = vsub.f32 %v3484_v13, %v3591_v20  ;;  %v11422_v32 = vpack.c.bf16 %v3595_v15, %v3591_v20  ;;  %v11477_v13 = vsub.f32 %v11434_v3, %v3617_v36  ;;  %v3504_v20 = vld [vmem:[#allocation11 + $0xa8] sm:$0xff]  ;;  %v11530_v3 = vld [vmem:[#allocation11 + $0xd0] sm:$0xff] }
 0x511   : > { %v7427_v54 = vpop.f32.mrb[3].mxu1  ;;  %v3631_v12 = vand.u32 4294901760, %v3504_v20 }
 0x512   : > { %v7428_v43 = vadd.f32 %v7427_v54, %v7426_v24  ;;  %8552 = vmatpush3.bf16.msra.mxu1 %v11284_v41  ;;  %v11406_v41 = vsub.f32 %v3486_v49, %v3595_v15  ;;  %14051 = vst [vmem:[#allocation28_spill] sm:$0xff] %v11422_v32  ;;  %v8695_v24 = vpack.c.bf16 %v11447_v35, %v11441_v23  ;;  %v3506_v15 = vld [vmem:[#allocation11 + $0xb8] sm:$0xff] }
 0x513   : > { %8553 = vmatprep.subr.bf16.mxu1 %v14050_v53  ;;  %v8697_v54 = vpack.c.bf16 %v11451_v50, %v11449_v21  ;;  %v11480_v49 = vsub.f32 %v11436_v2, %v3621_v38  ;;  %v3635_v14 = vand.u32 4294901760, %v3506_v15  ;;  %v3643_v2 = vand.u32 4294901760, %v11511_v47 }
 0x514   : > { %v11402_v9 = vadd.f32 %v7428_v43, %v2180_v6  ;;  %v8687_v34 = vpack.c.bf16 %v11406_v41, %v11404_v56  ;;  %v11471_v6 = vpack.c.bf16 %v3605_v5, %v3601_v60  ;;  %v11503_v60 = vld [vmem:[#allocation11 + $0xc8] sm:$0xff]  ;;  %v11509_v5 = vsub.f32 %v11464_v25, %v3629_v42  ;;  %v11547_v25 = vld [vmem:[#allocation11 + $0xe0] sm:$0xff] }
 0x515   : > { %v11525_v55 = vsub.f32 %v3506_v15, %v3635_v14  ;;  %v3639_v28 = vand.u32 4294901760, %v11503_v60 }
 0x516   : > { %8555 = vmatpush3.bf16.msra.mxu1 %v11301_v30  ;;  %v11424_v30 = vld [vmem:[#allocation11 + $0x68] sm:$0xff]  ;;  %8688 = vmatprep.subr.bf16.mxu0 %v8687_v34  ;;  %14054 = vst [vmem:[#allocation31_spill] sm:$0xff] %v11471_v6  ;;  %v8701_v34 = vpack.c.bf16 %v11480_v49, %v11477_v13 }
 0x517   : > { %8556 = vmatprep.subr.bf16.mxu1 %v14050_v53  ;;  %8690 = vmatpush1.bf16.msra.mxu0 %v8689_v16  ;;  %v3615_v10 = vand.u32 4294901760, %v11424_v30  ;;  %v3633_v16 = vand.u32 4294901760, %v11491_v40  ;;  %14058 = vst [vmem:[#allocation39_spill] sm:$0xff] %v11525_v55  ;;  %v11575_v53 = vpack.c.bf16 %v3629_v42, %v3625_v37 }
 0x518   : > { %8692 = vmatprep.subr.bf16.mxu0 %v8691_v18  ;;  %v3637_v18 = vand.u32 4294901760, %v11493_v17 }
 0x519   : > { %v11458_v8 = vsub.f32 %v11424_v30, %v3615_v10  ;;  %v11542_v0 = vsub.f32 %v11491_v40, %v3633_v16  ;;  %14065 = vst [vmem:[#allocation33_spill] sm:$0xff] %v11575_v53 }
 0x51a   : > { %8558 = vmatpush3.bf16.msra.mxu1 %v11309_v61  ;;  %v3619_v61 = vand.u32 4294901760, %v3498_v1  ;;  %v11545_v7 = vsub.f32 %v11493_v17, %v3637_v18 }
 0x51b   : > { %8560 = vmatprep.subr.bf16.mxu1 %v11422_v32  ;;  %8694 = vmatpush1.bf16.msra.mxu0 %v8693_v62  ;;  %v11533_v62 = vld [vmem:[#allocation11 + $0xe8] sm:$0xff]  ;;  %14060 = vst [vmem:[#allocation42_spill] sm:$0xff] %v11542_v0 }
 0x51c   : > { %v11473_v43 = vsub.f32 %v3498_v1, %v3619_v61  ;;  %8696 = vmatprep.subr.bf16.mxu0 %v8695_v24  ;;  %v11516_v30 = vpack.c.bf16 %v3619_v61, %v3615_v10  ;;  %v11523_v1 = vsub.f32 %v3504_v20, %v3631_v12  ;;  %v11535_v10 = vld [vmem:[#allocation11 + $0xf8] sm:$0xff]  ;;  %v8705_v61 = vpack.c.bf16 %v11509_v5, %v11506_v44  ;;  %v11549_v24 = vld [vmem:[#allocation11 + $0xf0] sm:$0xff] }
 0x51d   : > { %7999 = vmatmul.mubr.f32.vlgmr.msra.gmra.mrb[12].mxu1 %v11273_v11  ;;  %v3623_v11 = vand.u32 4294901760, %v11453_v22  ;;  %14061 = vst [vmem:[#allocation45_spill] sm:$0xff] %v11545_v7  ;;  %v11556_v20 = vsub.f32 %v11511_v47, %v3643_v2  ;;  %v3647_v40 = vand.u32 4294901760, %v11533_v62  ;;  %v3651_v17 = vand.u32 4294901760, %v11535_v10 }
 0x51e   : > { %8562 = vmatpush1.bf16.msra.mxu1 %v11432_v57  ;;  %v8699_v19 = vpack.c.bf16 %v11473_v43, %v11458_v8  ;;  %14057 = vst [vmem:[#allocation38_spill] sm:$0xff] %v11516_v30  ;;  %v8707_v15 = vpack.c.bf16 %v11525_v55, %v11523_v1 }
 0x51f   : > { %8564 = vmatprep.subr.bf16.mxu1 %v11443_v26  ;;  %v11498_v27 = vsub.f32 %v11453_v22, %v3623_v11  ;;  %8698 = vmatpush1.bf16.msra.mxu0 %v8697_v54  ;;  %v11539_v22 = vpack.c.bf16 %v3621_v38, %v3617_v36  ;;  %v11553_v54 = vsub.f32 %v11503_v60, %v3639_v28  ;;  %v3641_v36 = vand.u32 4294901760, %v11528_v58  ;;  %v11588_v60 = vld [vmem:[#allocation11 + $0x100] sm:$0xff] }
 0x520   : > { %8700 = vmatprep.subr.bf16.mxu0 %v8699_v19  ;;  %14063 = vst [vmem:[#allocation51_spill] sm:$0xff] %v11556_v20  ;;  %v3645_v38 = vand.u32 4294901760, %v11530_v3  ;;  %v11563_v19 = vpack.c.bf16 %v3627_v52, %v3623_v11  ;;  %v11594_v37 = vsub.f32 %v11533_v62, %v3647_v40  ;;  %v11597_v42 = vsub.f32 %v11535_v10, %v3651_v17 }
 0x521   : > { %v8703_v31 = vpack.c.bf16 %v11501_v29, %v11498_v27  ;;  %14059 = vst [vmem:[#allocation40_spill] sm:$0xff] %v11539_v22  ;;  %14062 = vst [vmem:[#allocation49_spill] sm:$0xff] %v11553_v54  ;;  %v8711_v11 = vpack.c.bf16 %v11556_v20, %v11553_v54  ;;  %v11583_v52 = vsub.f32 %v11528_v58, %v3641_v36  ;;  %v11601_v58 = vld [vmem:[#allocation11 + $0x128] sm:$0xff] }
 0x522   : > { %8566 = vmatpush1.bf16.msra.mxu1 %v11471_v6  ;;  %14064 = vst [vmem:[#allocation54_spill] sm:$0xff] %v11563_v19  ;;  %v11586_v47 = vsub.f32 %v11530_v3, %v3645_v38  ;;  %14069 = vst [vmem:[#allocation41_spill] sm:$0xff] %v11594_v37  ;;  %v11603_v3 = vld [vmem:[#allocation11 + $0x138] sm:$0xff]  ;;  %v11615_v10 = vpack.c.bf16 %v3637_v18, %v3633_v16  ;;  %v11628_v16 = vld [vmem:[#allocation11 + $0x130] sm:$0xff]  ;;  %v8715_v18 = vpack.c.bf16 %v11597_v42, %v11594_v37 }
 0x523   : > { %8568 = vmatprep.subr.bf16.mxu1 %v11487_v59  ;;  %8702 = vmatpush1.bf16.msra.mxu0 %v8701_v34  ;;  %v11569_v34 = vld [vmem:[#allocation11 + $0x108] sm:$0xff]  ;;  %14067 = vst [vmem:[#allocation35_spill] sm:$0xff] %v11583_v52  ;;  %14070 = vst [vmem:[#allocation43_spill] sm:$0xff] %v11597_v42  ;;  %v3669_v42 = vand.u32 4294901760, %v11628_v16 }
 0x524   : > { %8704 = vmatprep.subr.bf16.mxu0 %v8703_v31  ;;  %v8709_v31 = vpack.c.bf16 %v11545_v7, %v11542_v0  ;;  %14068 = vst [vmem:[#allocation36_spill] sm:$0xff] %v11586_v47  ;;  %14075 = vst [vmem:[#allocation47_spill] sm:$0xff] %v11615_v10  ;;  %v8713_v54 = vpack.c.bf16 %v11586_v47, %v11583_v52  ;;  %v11622_v7 = vpack.c.bf16 %v3643_v2, %v3639_v28  ;;  %v11643_v52 = vld [vmem:[#allocation11 + $0x148] sm:$0xff] }
 0x525   : > { %v3667_v0 = vand.u32 4294901760, %v11603_v3  ;;  %v11641_v47 = vpack.c.bf16 %v3645_v38, %v3641_v36 }
 0x526   : > { %8570 = vmatpush1.bf16.msra.mxu1 %v11495_v4  ;;  %v11590_v4 = vld [vmem:[#allocation11 + $0x110] sm:$0xff]  ;;  %14076 = vst [vmem:[#allocation48_spill] sm:$0xff] %v11622_v7 }
 0x527   : > { %8572 = vmatprep.subr.bf16.mxu1 %v11516_v30  ;;  %v11577_v30 = vpack.c.bf16 %v3635_v14, %v3631_v12  ;;  %8706 = vmatpush1.bf16.msra.mxu0 %v8705_v61  ;;  %v3655_v12 = vand.u32 4294901760, %v11569_v34  ;;  %v3659_v14 = vand.u32 4294901760, %v11571_v46  ;;  %v14071_v61 = vand.u32 4294901760, %v11547_v25  ;;  %14079 = vst [vmem:[#allocation53_spill] sm:$0xff] %v11641_v47 }
 0x528   : > { %8708 = vmatprep.subr.bf16.mxu0 %v8707_v15  ;;  %v3661_v20 = vand.u32 4294901760, %v11590_v4  ;;  %v11660_v38 = vsub.f32 %v11603_v3, %v3667_v0  ;;  %v11672_v3 = vld [vmem:[#allocation11 + $0x178] sm:$0xff] }
 0x529   : > { %14066 = vst [vmem:[#allocation34_spill] sm:$0xff] %v11577_v30  ;;  %v11608_v15 = vsub.f32 %v11547_v25, %v14071_v61  ;;  %v3663_v61 = vand.u32 4294901760, %v11601_v58  ;;  %v11637_v28 = vsub.f32 %v11571_v46, %v3659_v14 }
 0x52a   : > { %8574 = vmatpush1.bf16.msra.mxu1 %v11539_v22  ;;  %v3657_v22 = vand.u32 4294901760, %v11588_v60  ;;  %14083 = vst [vmem:[#allocation58_spill] sm:$0xff] %v11660_v38 }
 0x52b   : > { %8576 = vmatprep.subr.bf16.mxu1 %v11563_v19  ;;  %14072 = vst [vmem:[#allocation44_spill] sm:$0xff] %v11608_v15  ;;  %v14073_v19 = vand.u32 4294901760, %v11549_v24  ;;  %8710 = vmatpush1.bf16.msra.mxu0 %v8709_v31  ;;  %v11634_v31 = vsub.f32 %v11569_v34, %v3655_v12  ;;  %14078 = vst [vmem:[#allocation52_spill] sm:$0xff] %v11637_v28  ;;  %v11651_v34 = vsub.f32 %v11590_v4, %v3661_v20 }
 0x52c   : > { %8712 = vmatprep.subr.bf16.mxu0 %v8711_v11  ;;  %v11645_v11 = vld [vmem:[#allocation11 + $0x158] sm:$0xff]  ;;  %v11648_v55 = vsub.f32 %v11588_v60, %v3657_v22  ;;  %v11657_v36 = vsub.f32 %v11601_v58, %v3663_v61  ;;  %v11665_v60 = vpack.c.bf16 %v3651_v17, %v3647_v40  ;;  %v11684_v17 = vsub.f32 %v11628_v16, %v3669_v42 }
 0x52d   : > { %v11613_v62 = vsub.f32 %v11549_v24, %v14073_v19  ;;  %v11626_v19 = vld [vmem:[#allocation11 + $0x120] sm:$0xff]  ;;  %14077 = vst [vmem:[#allocation50_spill] sm:$0xff] %v11634_v31  ;;  %14081 = vst [vmem:[#allocation56_spill] sm:$0xff] %v11651_v34  ;;  %v8719_v4 = vpack.c.bf16 %v11637_v28, %v11634_v31  ;;  %v3683_v16 = vand.u32 4294901760, %v11672_v3 }
 0x52e   : > { %8578 = vmatpush1.bf16.msra.mxu1 %v11575_v53  ;;  %14080 = vst [vmem:[#allocation55_spill] sm:$0xff] %v11648_v55  ;;  %v3665_v46 = vand.u32 4294901760, %v11626_v19  ;;  %14082 = vst [vmem:[#allocation57_spill] sm:$0xff] %v11657_v36 }
 0x52f   : > { %14074 = vst [vmem:[#allocation46_spill] sm:$0xff] %v11613_v62  ;;  %8580 = vmatprep.subr.bf16.mxu1 %v11577_v30  ;;  %v8717_v53 = vpack.c.bf16 %v11613_v62, %v11608_v15  ;;  %8714 = vmatpush1.bf16.msra.mxu0 %v8713_v54  ;;  %v3523_v62 = vld [vmem:[#allocation11 + $0x140] sm:$0xff]  ;;  %14084 = vst [vmem:[#allocation59_spill] sm:$0xff] %v11665_v60  ;;  %v3675_v54 = vand.u32 4294901760, %v11645_v11 }
 0x530   : > { %v7461_v2 = vpop.f32.mrb[4].mxu1  ;;  %8716 = vmatprep.subr.bf16.mxu0 %v8715_v18  ;;  %v14085_v18 = vand.u32 4294901760, %v11547_v25  ;;  %v11681_v40 = vsub.f32 %v11626_v19, %v3665_v46  ;;  %14089 = vst [vmem:[#allocation62_spill] sm:$0xff] %v11684_v17  ;;  %v3673_v28 = vand.u32 4294901760, %v3523_v62  ;;  %v8723_v25 = vpack.c.bf16 %v11660_v38, %v11657_v36 }
 0x531   : > { %v7462_v30 = vpop.f32.mrb[5].mxu1  ;;  %v11698_v19 = vsub.f32 %v11645_v11, %v3675_v54  ;;  %v11711_v11 = vpack.c.bf16 %v3667_v0, %v3663_v61 }
 0x532   : > { %v7463_v37 = vadd.f32 %v7462_v30, %v7461_v2  ;;  %8582 = vmatpush1.bf16.msra.mxu1 %v11615_v10  ;;  %v3671_v30 = vand.u32 4294901760, %v11643_v52  ;;  %v3525_v2 = vld [vmem:[#allocation11 + $0x150] sm:$0xff]  ;;  %v11670_v10 = vld [vmem:[#allocation11 + $0x168] sm:$0xff]  ;;  %14088 = vst [vmem:[#allocation61_spill] sm:$0xff] %v11681_v40 }
 0x533   : > { %8584 = vmatprep.subr.bf16.mxu1 %v11622_v7  ;;  %v14086_v7 = vand.u32 4294901760, %v11549_v24  ;;  %8718 = vmatpush1.bf16.msra.mxu0 %v8717_v53  ;;  %14092 = vst [vmem:[#allocation65_spill] sm:$0xff] %v11698_v19  ;;  %v3679_v53 = vand.u32 4294901760, %v11670_v10  ;;  %14096 = vst [vmem:[#allocation69_spill] sm:$0xff] %v11711_v11 }
 0x534   : > { %v2550_v58 = vadd.f32 %v7463_v37, %v11402_v9  ;;  %v8721_v9 = vpack.c.bf16 %v11651_v34, %v11648_v55  ;;  %v11691_v37 = vpack.c.bf16 %v3659_v14, %v3655_v12  ;;  %8720 = vmatprep.subr.bf16.mxu0 %v8719_v4  ;;  %v11695_v24 = vsub.f32 %v11643_v52, %v3671_v30 }
 0x535   : > { %v11678_v15 = vpack.c.bf16 %v14086_v7, %v14085_v18  ;;  %v3677_v7 = vand.u32 4294901760, %v3525_v2  ;;  %v3527_v18 = vld [vmem:[#allocation11 + $0x160] sm:$0xff]  ;;  %v8725_v12 = vpack.c.bf16 %v11684_v17, %v11681_v40  ;;  %v11704_v14 = vpack.c.bf16 %v3661_v20, %v3657_v22 }
 0x536   : > { %8586 = vmatpush1.bf16.msra.mxu1 %v11641_v47  ;;  %14090 = vst [vmem:[#allocation63_spill] sm:$0xff] %v11691_v37  ;;  %14091 = vst [vmem:[#allocation64_spill] sm:$0xff] %v11695_v24  ;;  %v3529_v47 = vld [vmem:[#allocation11 + $0x170] sm:$0xff]  ;;  %v11706_v4 = vsub.f32 %v3523_v62, %v3673_v28  ;;  %v8727_v36 = vpack.c.bf16 %v11698_v19, %v11695_v24  ;;  %v11717_v22 = vsub.f32 %v11670_v10, %v3679_v53  ;;  %v3544_v19 = vld [vmem:[#allocation11 + $0x1e8] sm:$0xff] }
 0x537   : > { %14087 = vst [vmem:[#allocation60_spill] sm:$0xff] %v11678_v15  ;;  %8588 = vmatprep.subr.bf16.mxu1 %v11665_v60  ;;  %14093 = vst [vmem:[#allocation66_spill] sm:$0xff] %v11704_v14  ;;  %8722 = vmatpush1.bf16.msra.mxu0 %v8721_v9  ;;  %v11709_v52 = vsub.f32 %v3525_v2, %v3677_v7  ;;  %v3681_v60 = vand.u32 4294901760, %v3527_v18  ;;  %v3685_v38 = vand.u32 4294901760, %v3529_v47  ;;  %v3545_v24 = vld [vmem:[#allocation11 + $0x1f0] sm:$0xff]  ;;  %v3711_v40 = vand.u32 4294901760, %v3544_v19 }
 0x538   : > { %14094 = vst [vmem:[#allocation67_spill] sm:$0xff] %v11706_v4  ;;  %8724 = vmatprep.subr.bf16.mxu0 %v8723_v25  ;;  %14097 = vst [vmem:[#allocation70_spill] sm:$0xff] %v11717_v22  ;;  %v11720_v20 = vsub.f32 %v11672_v3, %v3683_v16  ;;  %v11722_v62 = vpack.c.bf16 %v3669_v42, %v3665_v46  ;;  %v11734_v3 = vpack.c.bf16 %v3675_v54, %v3671_v30 }
 0x539   : > { %14095 = vst [vmem:[#allocation68_spill] sm:$0xff] %v11709_v52  ;;  %v8729_v0 = vpack.c.bf16 %v11709_v52, %v11706_v4  ;;  %v11727_v61 = vsub.f32 %v3527_v18, %v3681_v60  ;;  %v11729_v2 = vsub.f32 %v3529_v47, %v3685_v38  ;;  %v11739_v46 = vpack.c.bf16 %v3677_v7, %v3673_v28  ;;  %v3531_v7 = vld [vmem:[#allocation11 + $0x180] sm:$0xff] }
 0x53a   : > { %8590 = vmatpush1.bf16.msra.mxu1 %v11678_v15  ;;  %14098 = vst [vmem:[#allocation71_spill] sm:$0xff] %v11720_v20  ;;  %14099 = vst [vmem:[#allocation72_spill] sm:$0xff] %v11722_v62  ;;  %v8731_v10 = vpack.c.bf16 %v11720_v20, %v11717_v22  ;;  %v3542_v22 = vld [vmem:[#allocation11 + $0x1d8] sm:$0xff]  ;;  %v3717_v55 = vand.u32 4294901760, %v3545_v24 }
 0x53b   : > { %8592 = vmatprep.subr.bf16.mxu1 %v11691_v37  ;;  %8726 = vmatpush1.bf16.msra.mxu0 %v8725_v12  ;;  %14100 = vst [vmem:[#allocation73_spill] sm:$0xff] %v11727_v61  ;;  %14101 = vst [vmem:[#allocation74_spill] sm:$0xff] %v11729_v2  ;;  %v8733_v42 = vpack.c.bf16 %v11729_v2, %v11727_v61  ;;  %v3689_v61 = vand.u32 4294901760, %v3531_v7 }
 0x53c   : > { %8728 = vmatprep.subr.bf16.mxu0 %v8727_v36  ;;  %14102 = vst [vmem:[#allocation75_spill] sm:$0xff] %v11734_v3  ;;  %14103 = vst [vmem:[#allocation76_spill] sm:$0xff] %v11739_v46 }
 0x53e   : > { %8594 = vmatpush1.bf16.msra.mxu1 %v11704_v14 }
 0x53f   : > { %8596 = vmatprep.subr.bf16.mxu1 %v11711_v11  ;;  %8730 = vmatpush1.bf16.msra.mxu0 %v8729_v0  ;;  %v3532_v0 = vld [vmem:[#allocation11 + $0x188] sm:$0xff]  ;;  %v11749_v11 = vsub.f32 %v3531_v7, %v3689_v61 }
 0x540   : > { %8732 = vmatprep.subr.bf16.mxu0 %v8731_v10  ;;  %v3687_v2 = vand.u32 4294901760, %v3532_v0  ;;  %v3533_v10 = vld [vmem:[#allocation11 + $0x190] sm:$0xff] }
 0x542   : > { %8598 = vmatpush1.bf16.msra.mxu1 %v11722_v62  ;;  %v3534_v62 = vld [vmem:[#allocation11 + $0x198] sm:$0xff] }
 0x543   : > { %8600 = vmatprep.subr.bf16.mxu1 %v11734_v3  ;;  %8734 = vmatpush1.bf16.msra.mxu0 %v8733_v42  ;;  %v3691_v28 = vand.u32 4294901760, %v3534_v62  ;;  %v3693_v3 = vand.u32 4294901760, %v3533_v10  ;;  %v11745_v42 = vsub.f32 %v3532_v0, %v3687_v2  ;;  %v3537_v0 = vld [vmem:[#allocation11 + $0x1b0] sm:$0xff] }
 0x546   : > { %8602 = vmatpush1.bf16.msra.mxu1 %v11739_v46  ;;  %v11747_v46 = vsub.f32 %v3534_v62, %v3691_v28  ;;  %v3540_v62 = vld [vmem:[#allocation11 + $0x1c8] sm:$0xff] }
 0x547   : > { %v3703_v15 = vand.u32 4294901760, %v3540_v62 }
 0x550   : > { %v7496_v47 = vpop.f32.mrb[6].mxu1 }
 0x551   : > { %v7497_v36 = vpop.f32.mrb[7].mxu1 }
 0x552   : > { %v7498_v9 = vadd.f32 %v7497_v36, %v7496_v47  ;;  %v11753_v47 = vpack.c.bf16 %v3683_v16, %v3679_v53  ;;  %v11755_v36 = vpack.c.bf16 %v3685_v38, %v3681_v60  ;;  %v3701_v53 = vand.u32 4294901760, %v3537_v0  ;;  %v3539_v16 = vld [vmem:[#allocation11 + $0x1c0] sm:$0xff] }
 0x553   : > { %v11762_v38 = vpack.c.bf16 %v3691_v28, %v3687_v2  ;;  %v11764_v60 = vpack.c.bf16 %v3693_v3, %v3689_v61  ;;  %v3707_v61 = vand.u32 4294901760, %v3542_v22  ;;  %v3705_v2 = vand.u32 4294901760, %v3539_v16  ;;  %v3546_v28 = vld [vmem:[#allocation11 + $0x1f8] sm:$0xff] }
 0x554   : > { %v2658_v25 = vadd.f32 %v7498_v9, %v2550_v58  ;;  %v11751_v58 = vsub.f32 %v3533_v10, %v3693_v3  ;;  %14104 = vst [vmem:[#allocation77_spill] sm:$0xff] %v11753_v47  ;;  %14105 = vst [vmem:[#allocation78_spill] sm:$0xff] %v11755_v36  ;;  %v3536_v9 = vld [vmem:[#allocation11 + $0x1a8] sm:$0xff]  ;;  %8604 = vmatprep.subr.bf16.mxu1 %v11753_v47  ;;  %v3541_v10 = vld [vmem:[#allocation11 + $0x1d0] sm:$0xff]  ;;  %v11773_v47 = vsub.f32 %v3537_v0, %v3701_v53 }
 0x555   : > { %14106 = vst [vmem:[#allocation79_spill] sm:$0xff] %v11762_v38  ;;  %14107 = vst [vmem:[#allocation80_spill] sm:$0xff] %v11764_v60  ;;  %8606 = vmatpush1.bf16.msra.mxu1 %v11755_v36  ;;  %v3709_v3 = vand.u32 4294901760, %v3541_v10  ;;  %v3715_v34 = vand.u32 4294901760, %v3546_v28 }
 0x556   : > { %v8737_v7 = vpack.c.bf16 %v11751_v58, %v11749_v11  ;;  %8608 = vmatprep.subr.bf16.mxu1 %v11762_v38  ;;  %v11788_v38 = vsub.f32 %v3539_v16, %v3705_v2 }
 0x557   : > { %v11790_v17 = vsub.f32 %v3541_v10, %v3709_v3  ;;  %v11806_v10 = vsub.f32 %v3545_v24, %v3717_v55  ;;  %v11818_v24 = vpack.c.bf16 %v3715_v34, %v3711_v40 }
 0x559   : > { %8610 = vmatpush1.bf16.msra.mxu1 %v11764_v60  ;;  %v11812_v60 = vpack.c.bf16 %v3709_v3, %v3705_v2  ;;  %14111 = vst [vmem:[#allocation84_spill] sm:$0xff] %v11818_v24 }
 0x55b   : > { %14110 = vst [vmem:[#allocation83_spill] sm:$0xff] %v11812_v60 }
 0x570   : > { %v7531_v30 = vpop.f32.mrb[8].mxu1 }
 0x571   : > { %v7532_v54 = vpop.f32.mrb[9].mxu1 }
 0x572   : > { %v7533_v18 = vadd.f32 %v7532_v54, %v7531_v30  ;;  %v3535_v30 = vld [vmem:[#allocation11 + $0x1a0] sm:$0xff]  ;;  %v8735_v54 = vpack.c.bf16 %v11747_v46, %v11745_v42 }
 0x573   : > { %v3697_v20 = vand.u32 4294901760, %v3535_v30 }
 0x574   : > { %v11743_v12 = vadd.f32 %v7533_v18, %v2658_v25  ;;  %v3538_v25 = vld [vmem:[#allocation11 + $0x1b8] sm:$0xff]  ;;  %v3695_v18 = vand.u32 4294901760, %v3536_v9  ;;  %8736 = vmatprep.subr.bf16.mxu0 %v8735_v54  ;;  %v3543_v54 = vld [vmem:[#allocation11 + $0x1e0] sm:$0xff] }
 0x575   : > { %v3699_v14 = vand.u32 4294901760, %v3538_v25  ;;  %v11771_v37 = vsub.f32 %v3535_v30, %v3697_v20  ;;  %8738 = vmatpush1.bf16.msra.mxu0 %v8737_v7  ;;  %v11782_v36 = vpack.c.bf16 %v3701_v53, %v3697_v20  ;;  %v11786_v7 = vsub.f32 %v3542_v22, %v3707_v61 }
 0x576   : > { %v11767_v52 = vsub.f32 %v3536_v9, %v3695_v18  ;;  %v8745_v20 = vpack.c.bf16 %v11790_v17, %v11788_v38  ;;  %v11798_v22 = vpack.c.bf16 %v3707_v61, %v3703_v15  ;;  %v11802_v53 = vsub.f32 %v3546_v28, %v3715_v34 }
 0x577   : > { %v11769_v4 = vsub.f32 %v3538_v25, %v3699_v14  ;;  %v11778_v25 = vsub.f32 %v3540_v62, %v3703_v15  ;;  %v11780_v30 = vpack.c.bf16 %v3699_v14, %v3695_v18  ;;  %14108 = vst [vmem:[#allocation81_spill] sm:$0xff] %v11782_v36  ;;  %v8741_v0 = vpack.c.bf16 %v11773_v47, %v11771_v37 }
 0x578   : > { %v3713_v62 = vand.u32 4294901760, %v3543_v54  ;;  %14109 = vst [vmem:[#allocation82_spill] sm:$0xff] %v11798_v22  ;;  %v11800_v18 = vsub.f32 %v3544_v19, %v3711_v40  ;;  %v3750_v15 = vand.u32 4294901760, %v11406_v41 }
 0x579   : > { %v8739_v9 = vpack.c.bf16 %v11769_v4, %v11767_v52  ;;  %v8743_v14 = vpack.c.bf16 %v11786_v7, %v11778_v25  ;;  %8612 = vmatprep.subr.bf16.mxu1 %v11780_v30 }
 0x57a   : > { %v11804_v16 = vsub.f32 %v3543_v54, %v3713_v62  ;;  %8614 = vmatpush1.bf16.msra.mxu1 %v11782_v36  ;;  %v3751_v28 = vsub.f32 %v11406_v41, %v3750_v15  ;;  %v11823_v2 = vpack.c.bf16 %v3717_v55, %v3713_v62  ;;  %v4038_v55 = vand.u32 4294901760, %v11747_v46 }
 0x57b   : > { %8740 = vmatprep.subr.bf16.mxu0 %v8739_v9  ;;  %v3738_v9 = vand.u32 4294901760, %v11404_v56  ;;  %8616 = vmatprep.subr.bf16.mxu1 %v11798_v22  ;;  %v4032_v62 = vand.u32 4294901760, %v11749_v11 }
 0x57c   : > { %8742 = vmatpush1.bf16.msra.mxu0 %v8741_v0  ;;  %v8747_v0 = vpack.c.bf16 %v11802_v53, %v11800_v18  ;;  %v8749_v19 = vpack.c.bf16 %v11806_v10, %v11804_v16  ;;  %14112 = vst [vmem:[#allocation85_spill] sm:$0xff] %v11823_v2  ;;  %v3752_v3 = vand.u32 4294901760, %v3751_v28 }
 0x57d   : > { %8744 = vmatprep.subr.bf16.mxu0 %v8743_v14  ;;  %v3739_v61 = vsub.f32 %v11404_v56, %v3738_v9  ;;  %v4033_v28 = vsub.f32 %v11749_v11, %v4032_v62 }
 0x57e   : > { %8618 = vmatpush1.bf16.msra.mxu1 %v11812_v60 }
 0x57f   : > { %v3740_v54 = vand.u32 4294901760, %v3739_v61  ;;  %8620 = vmatprep.subr.bf16.mxu1 %v11818_v24  ;;  %v4039_v61 = vsub.f32 %v11747_v46, %v4038_v55 }
 0x580   : > { %8746 = vmatpush1.bf16.msra.mxu0 %v8745_v20  ;;  %v4026_v20 = vand.u32 4294901760, %v11745_v42 }
 0x581   : > { %8748 = vmatprep.subr.bf16.mxu0 %v8747_v0  ;;  %v8623_v14 = vpack.c.bf16 %v3752_v3, %v3740_v54 }
 0x582   : > { %8622 = vmatpush1.bf16.msra.mxu1 %v11823_v2  ;;  %v4027_v0 = vsub.f32 %v11745_v42, %v4026_v20  ;;  %v4068_v2 = vand.u32 4294901760, %v11773_v47 }
 0x583   : > { %8624 = vmatprep.subr.bf16.mxu1 %v8623_v14  ;;  %v4040_v14 = vand.u32 4294901760, %v4039_v61 }
 0x584   : > { %8750 = vmatpush1.bf16.msra.mxu0 %v8749_v19  ;;  %v4044_v19 = vand.u32 4294901760, %v11751_v58  ;;  %v4028_v54 = vand.u32 4294901760, %v4027_v0  ;;  %v4069_v61 = vsub.f32 %v11773_v47, %v4068_v2  ;;  %v11860_v47 = vpack.c.bf16 %v3750_v15, %v3738_v9 }
 0x585   : > { %8752 = vmatprep.subr.bf16.mxu0 %v11422_v32 }
 0x586   : > { %v4045_v3 = vsub.f32 %v11751_v58, %v4044_v19  ;;  %v11844_v24 = vpack.c.bf16 %v4040_v14, %v4028_v54  ;;  %v4070_v36 = vand.u32 4294901760, %v4069_v61  ;;  %14115 = vst [vmem:[#allocation88_spill] sm:$0xff] %v11860_v47  ;;  %v4098_v61 = vand.u32 4294901760, %v11800_v18 }
 0x588   : > { %v4046_v32 = vand.u32 4294901760, %v4045_v3  ;;  %14113 = vst [vmem:[#allocation86_spill] sm:$0xff] %v11844_v24  ;;  %v4086_v3 = vand.u32 4294901760, %v11786_v7 }
 0x590   : > { %v7566_v34 = vpop.f32.mrb[10].mxu1 }
 0x591   : > { %v7567_v56 = vpop.f32.mrb[11].mxu1 }
 0x592   : > { %v7568_v40 = vadd.f32 %v7567_v56, %v7566_v34  ;;  %v4034_v34 = vand.u32 4294901760, %v4033_v28  ;;  %v4062_v56 = vand.u32 4294901760, %v11769_v4  ;;  %v4074_v28 = vand.u32 4294901760, %v11778_v25 }
 0x594   : > { %v11829_v41 = vadd.f32 %v7568_v40, %v11743_v12  ;;  %v4050_v12 = vand.u32 4294901760, %v11767_v52  ;;  %v4056_v40 = vand.u32 4294901760, %v11771_v37  ;;  %v4063_v11 = vsub.f32 %v11769_v4, %v4062_v56 }
 0x595   : > { %v11848_v58 = vpack.c.bf16 %v4046_v32, %v4034_v34  ;;  %v4075_v54 = vsub.f32 %v11778_v25, %v4074_v28  ;;  %v4092_v4 = vand.u32 4294901760, %v11790_v17  ;;  %v4087_v32 = vsub.f32 %v11786_v7, %v4086_v3 }
 0x596   : > { %v4051_v42 = vsub.f32 %v11767_v52, %v4050_v12  ;;  %v4057_v46 = vsub.f32 %v11771_v37, %v4056_v40  ;;  %v4064_v60 = vand.u32 4294901760, %v4063_v11  ;;  %v4080_v52 = vand.u32 4294901760, %v11788_v38 }
 0x597   : > { %14114 = vst [vmem:[#allocation87_spill] sm:$0xff] %v11848_v58  ;;  %v4093_v11 = vsub.f32 %v11790_v17, %v4092_v4  ;;  %v4110_v25 = vand.u32 4294901760, %v11802_v53  ;;  %v4116_v7 = vand.u32 4294901760, %v11806_v10 }
 0x598   : > { %v4052_v0 = vand.u32 4294901760, %v4051_v42  ;;  %v4058_v22 = vand.u32 4294901760, %v4057_v46  ;;  %v4081_v37 = vsub.f32 %v11788_v38, %v4080_v52  ;;  %v4076_v42 = vand.u32 4294901760, %v4075_v54 }
 0x599   : > { %v4088_v46 = vand.u32 4294901760, %v4087_v32  ;;  %v4094_v24 = vand.u32 4294901760, %v4093_v11  ;;  %v4099_v38 = vsub.f32 %v11800_v18, %v4098_v61  ;;  %v4117_v9 = vsub.f32 %v11806_v10, %v4116_v7 }
 0x59a   : > { %v11856_v14 = vpack.c.bf16 %v4064_v60, %v4052_v0  ;;  %v11862_v34 = vpack.c.bf16 %v4070_v36, %v4058_v22  ;;  %v4082_v58 = vand.u32 4294901760, %v4081_v37  ;;  %v4104_v60 = vand.u32 4294901760, %v11804_v16 }
 0x59b   : > { %v11869_v0 = vpack.c.bf16 %v4088_v46, %v4076_v42  ;;  %v4111_v36 = vsub.f32 %v11802_v53, %v4110_v25  ;;  %v4100_v15 = vand.u32 4294901760, %v4099_v38  ;;  %v4118_v37 = vand.u32 4294901760, %v4117_v9 }
 0x59c   : > { %v11873_v22 = vpack.c.bf16 %v4094_v24, %v4082_v58  ;;  %v4105_v17 = vsub.f32 %v11804_v16, %v4104_v60  ;;  %v11881_v42 = vpack.c.bf16 %v4038_v55, %v4026_v20  ;;  %v11883_v18 = vpack.c.bf16 %v4044_v19, %v4032_v62 }
 0x59d   : > { %v4112_v54 = vand.u32 4294901760, %v4111_v36  ;;  %v3471_v24 = vstv %s7344_s20  ;;  %v11886_v46 = vpack.c.bf16 %v4062_v56, %v4050_v12  ;;  %v11888_v38 = vpack.c.bf16 %v4068_v2, %v4056_v40  ;;  %s14496_s20 = sld [smem:[#allocation26_spill]] }
 0x59e   : > { %v4106_v32 = vand.u32 4294901760, %v4105_v17  ;;  %14116 = vst [vmem:[#allocation89_spill] sm:$0xff] %v11881_v42  ;;  %14117 = vst [vmem:[#allocation90_spill] sm:$0xff] %v11883_v18  ;;  %v13726_v36 = vand.u32 4294901760, %v11408_v63  ;;  %v13723_v17 = vand.u32 4294901760, %v11411_v33  ;;  %v11892_v55 = vpack.c.bf16 %v4086_v3, %v4074_v28  ;;  %v14144_v18 = vld [vmem:[#allocation43_spill] sm:$0xff] }
 0x59f   : > { %v11877_v11 = vpack.c.bf16 %v4112_v54, %v4100_v15  ;;  %14118 = vst [vmem:[#allocation91_spill] sm:$0xff] %v11886_v46  ;;  %14119 = vst [vmem:[#allocation92_spill] sm:$0xff] %v11888_v38  ;;  %v13720_v62 = vand.u32 4294901760, %v11413_v51  ;;  %v13718_v19 = vand.u32 4294901760, %v11415_v45  ;;  %v13719_v40 = vand.u32 4294901760, %v11420_v48  ;;  %v14145_v46 = vld [vmem:[#allocation33_spill] sm:$0xff] }
 0x5a0   : > { %v11879_v47 = vpack.c.bf16 %v4118_v37, %v4106_v32  ;;  %14120 = vst [vmem:[#allocation93_spill] sm:$0xff] %v11892_v55  ;;  %v3745_v2 = vsub.f32 %v11408_v63, %v13726_v36  ;;  %v3757_v56 = vsub.f32 %v11411_v33, %v13723_v17  ;;  %v13722_v32 = vand.u32 4294901760, %v11441_v23  ;;  %v14151_v42 = vld [vmem:[#allocation52_spill] sm:$0xff] }
 0x5a1   : > { %v3763_v15 = vsub.f32 %v11413_v51, %v13720_v62  ;;  %v3775_v54 = vsub.f32 %v11415_v45, %v13718_v19  ;;  %v11921_v37 = vpack.c.bf16 %v4116_v7, %v4104_v60  ;;  %v13728_v60 = vand.u32 4294901760, %v11449_v21 }
 0x5a2   : > { %v13730_v7 = vand.u32 4294901760, %v11451_v50 }
 0x5a3   : > { %14124 = vst [vmem:[#allocation97_spill] sm:$0xff] %v11921_v37  ;;  %v3776_v19 = vand.u32 4294901760, %v3775_v54  ;;  %p14498_p10 = scmp.ne.s32.totalorder %s14496_s20, 0 }
 0x5f0   : > { %v3466_v53 = vpop.f32.mrb[12].mxu1 }
 0x5f1   : > { %v9403_v58 = vadd.f32 %v3466_v53, %v11829_v41  ;;  %v8000_v16 = vpop.f32.mrb[13].mxu1  ;;  %v11896_v41 = vpack.c.bf16 %v4092_v4, %v4080_v52  ;;  %v13721_v52 = vand.u32 4294901760, %v11430_v39  ;;  %v11912_v4 = vpack.c.bf16 %v4110_v25, %v4098_v61 }
 0x5f2   : > { %v3746_v61 = vand.u32 4294901760, %v3745_v2  ;;  %v3758_v25 = vand.u32 4294901760, %v3757_v56  ;;  %v13724_v16 = vand.u32 4294901760, %v11447_v35  ;;  %v3787_v56 = vsub.f32 %v11441_v23, %v13722_v32 }
 0x5f3   : > { %vm3470_vm12 = vcmp.gt.f32.partialorder %v9403_v58, 0.0  ;;  %v3472_v10 = vmul.f32 %v9403_v58, %v3471_v24  ;;  %14121 = vst [vmem:[#allocation94_spill] sm:$0xff] %v11896_v41  ;;  %14123 = vst [vmem:[#allocation96_spill] sm:$0xff] %v11912_v4  ;;  %v3781_v2 = vsub.f32 %v11430_v39, %v13721_v52  ;;  %v13732_v52 = vand.u32 4294901760, %v11477_v13  ;;  %v14136_v4 = vld [vmem:[#allocation51_spill] sm:$0xff] }
 0x5f4   : > { %v8625_v62 = vpack.c.bf16 %v3758_v25, %v3746_v61  ;;  %v3793_v61 = vsub.f32 %v11449_v21, %v13728_v60  ;;  %v3805_v25 = vsub.f32 %v11451_v50, %v13730_v7  ;;  %v3788_v36 = vand.u32 4294901760, %v3787_v56 }
 0x5f5   : > { %v3473_v9 = vsel %vm3470_vm12, %v9403_v58, %v3472_v10  ;;  %v3769_v58 = vsub.f32 %v11420_v48, %v13719_v40  ;;  %v13738_v56 = vand.u32 4294901760, %v11509_v5  ;;  %v13740_v41 = vand.u32 4294901760, %v14136_v4 }
 0x5f6   : > { %v3475_v20 = vrot.slane %v3473_v9, 1 }
 0x5f7   : > { %v3770_v17 = vand.u32 4294901760, %v3769_v58  ;;  %v14129_v58 = vld [vmem:[#allocation37_spill] sm:$0xff] }
 0x5f8   : > { %v11898_v12 = vmax.f32 %v3473_v9, %v3475_v20  ;;  %v3764_v20 = vand.u32 4294901760, %v3763_v15  ;;  %v3799_v15 = vsub.f32 %v11447_v35, %v13724_v16 }
 0x5fa   : > { %14122 = vst [vmem:[#allocation95_spill] sm:$0xff] %v11898_v12  ;;  %v11908_v28 = vand.u32 4294901760, %v11898_v12  ;;  %v3479_v3 = vrot.slane %v11898_v12, 2  ;;  %v8627_v16 = vpack.c.bf16 %v3776_v19, %v3764_v20  ;;  %v3800_v60 = vand.u32 4294901760, %v3799_v15 }
 0x5fb   : > { %v3806_v20 = vand.u32 4294901760, %v3805_v25 }
 0x5fc   : > { %v11923_v53 = vand.u32 4294901760, %v3479_v3  ;;  %v11927_v24 = vsub.f32 %v11898_v12, %v11908_v28  ;;  %v13733_v12 = vand.u32 4294901760, %v11480_v49  ;;  %v8631_v25 = vpack.c.bf16 %v3800_v60, %v3788_v36 }
 0x5fe   : > { %v3720_v10 = vsub.f32 %v3479_v3, %v11923_v53  ;;  %v13725_v9 = vand.u32 4294901760, %v11927_v24 }
 0x600   : > { %4323 = vmatprep.mubr.f32.mxu0 %v3720_v10  ;;  %v3721_v40 = vand.u32 4294901760, %v3720_v10  ;;  %v3728_v3 = vsub.f32 %v11927_v24, %v13725_v9  ;;  %v3782_v9 = vand.u32 4294901760, %v3781_v2  ;;  %v13736_v2 = vand.u32 4294901760, %v11506_v44 }
 0x601   : > { %4326 = vmatmul.mubr.f32.vlgmr.msra.gmra.mrb[8].mxu0 %v11927_v24 }
 0x602   : > { %8754 = vmatpush1.bf16.msra.mxu0 %v11432_v57  ;;  %4463 = vmatprep.mubr.f32.mxu0 %v3721_v40  ;;  %v3722_v32 = vsub.f32 %v3720_v10, %v3721_v40  ;;  %v13734_v40 = vand.u32 4294901760, %v11498_v27  ;;  %v3729_v10 = vand.u32 4294901760, %v3728_v3  ;;  %v14125_v57 = vand.u32 4294901760, %v11458_v8 }
 0x603   : > { %8756 = vmatprep.subr.bf16.mxu0 %v11443_v26  ;;  %v14126_v26 = vand.u32 4294901760, %v11473_v43  ;;  %v8629_v3 = vpack.c.bf16 %v3782_v9, %v3770_v17  ;;  %v14128_v17 = vand.u32 4294901760, %v11501_v29  ;;  %v3841_v15 = vsub.f32 %v11506_v44, %v13736_v2 }
 0x604   : > { %v3723_v54 = vand.u32 4294901760, %v3722_v32  ;;  %v3811_v7 = vsub.f32 %v11458_v8, %v14125_v57  ;;  %v3794_v32 = vand.u32 4294901760, %v3793_v61  ;;  %v3817_v57 = vsub.f32 %v11477_v13, %v13732_v52 }
 0x605   : > { %v3823_v19 = vsub.f32 %v11473_v43, %v14126_v26  ;;  %v14127_v26 = vld [vmem:[#allocation39_spill] sm:$0xff]  ;;  %v3835_v61 = vsub.f32 %v11498_v27, %v13734_v40  ;;  %v3847_v9 = vsub.f32 %v11501_v29, %v14128_v17  ;;  %v14130_v40 = vld [vmem:[#allocation38_spill] sm:$0xff]  ;;  %v3842_v55 = vand.u32 4294901760, %v3841_v15 }
 0x606   : > { %8758 = vmatpush1.bf16.msra.mxu0 %v11471_v6  ;;  %3724 = vmatprep.mubr.f32.mxu1 %v3723_v54  ;;  %v3829_v54 = vsub.f32 %v11480_v49, %v13733_v12  ;;  %v3853_v12 = vsub.f32 %v11509_v5, %v13738_v56  ;;  %v14132_v36 = vand.u32 4294901760, %v14127_v26  ;;  %v3818_v17 = vand.u32 4294901760, %v3817_v57 }
 0x607   : > { %3730 = vmatmul.mubr.f32.vlgmr.msra.gmra.mrb[14].mxu1 %v3729_v10  ;;  %8760 = vmatprep.subr.bf16.mxu0 %v11487_v59  ;;  %v3812_v10 = vand.u32 4294901760, %v3811_v7  ;;  %v3824_v52 = vand.u32 4294901760, %v3823_v19  ;;  %v14131_v59 = vand.u32 4294901760, %v11523_v1  ;;  %v14133_v7 = vld [vmem:[#allocation42_spill] sm:$0xff]  ;;  %v3848_v6 = vand.u32 4294901760, %v3847_v9  ;;  %v14139_v19 = vld [vmem:[#allocation36_spill] sm:$0xff] }
 0x608   : > { %8626 = vmatpush1.bf16.msra.mxu1 %v8625_v62  ;;  %4121 = vmatprep.mubr.f32.mxu1 %v11923_v53  ;;  %v8633_v62 = vpack.c.bf16 %v3806_v20, %v3794_v32  ;;  %v3871_v60 = vsub.f32 %v14127_v26, %v14132_v36  ;;  %v14134_v32 = vld [vmem:[#allocation45_spill] sm:$0xff]  ;;  %v3830_v2 = vand.u32 4294901760, %v3829_v54  ;;  %v3854_v38 = vand.u32 4294901760, %v3853_v12  ;;  %v14138_v36 = vld [vmem:[#allocation35_spill] sm:$0xff]  ;;  %v14140_v20 = vld [vmem:[#allocation54_spill] sm:$0xff] }
 0x609   : > { %8628 = vmatprep.subr.bf16.mxu1 %v8627_v16  ;;  %v3859_v16 = vsub.f32 %v11523_v1, %v14131_v59  ;;  %v8635_v56 = vpack.c.bf16 %v3824_v52, %v3812_v10  ;;  %v14137_v59 = vld [vmem:[#allocation40_spill] sm:$0xff]  ;;  %v14141_v54 = vand.u32 4294901760, %v14133_v7  ;;  %v3895_v10 = vsub.f32 %v14136_v4, %v13740_v41 }
 0x60a   : > { %8762 = vmatpush1.bf16.msra.mxu0 %v14129_v58  ;;  %v3836_v58 = vand.u32 4294901760, %v3835_v61  ;;  %v3872_v57 = vand.u32 4294901760, %v3871_v60  ;;  %v14142_v61 = vand.u32 4294901760, %v14134_v32  ;;  %v14149_v60 = vld [vmem:[#allocation44_spill] sm:$0xff] }
 0x60b   : > { %8764 = vmatprep.subr.bf16.mxu0 %v14130_v40  ;;  %v14135_v40 = vld [vmem:[#allocation49_spill] sm:$0xff]  ;;  %v3865_v52 = vsub.f32 %v14133_v7, %v14141_v54  ;;  %v14150_v54 = vld [vmem:[#allocation46_spill] sm:$0xff]  ;;  %v14157_v4 = vld [vmem:[#allocation48_spill] sm:$0xff] }
 0x60c   : > { %8630 = vmatpush1.bf16.msra.mxu1 %v8629_v3  ;;  %v13739_v37 = vand.u32 4294901760, %v14135_v40  ;;  %v3860_v3 = vand.u32 4294901760, %v3859_v16  ;;  %v3877_v9 = vsub.f32 %v14134_v32, %v14142_v61  ;;  %v8639_v15 = vpack.c.bf16 %v3848_v6, %v3836_v58  ;;  %v14143_v16 = vld [vmem:[#allocation41_spill] sm:$0xff] }
 0x60d   : > { %8632 = vmatprep.subr.bf16.mxu1 %v8631_v25  ;;  %v8637_v25 = vpack.c.bf16 %v3830_v2, %v3818_v17  ;;  %v14146_v61 = vand.u32 4294901760, %v14138_v36  ;;  %v14147_v6 = vand.u32 4294901760, %v14139_v19 }
 0x60e   : > { %8766 = vmatpush1.bf16.msra.mxu0 %v14137_v59  ;;  %v3883_v12 = vsub.f32 %v14135_v40, %v13739_v37  ;;  %v8643_v17 = vpack.c.bf16 %v3872_v57, %v3860_v3  ;;  %v3866_v37 = vand.u32 4294901760, %v3865_v52  ;;  %v3878_v41 = vand.u32 4294901760, %v3877_v9  ;;  %v14154_v3 = vld [vmem:[#allocation47_spill] sm:$0xff] }
 0x60f   : > { %8768 = vmatprep.subr.bf16.mxu0 %v14140_v20  ;;  %v3889_v2 = vsub.f32 %v14138_v36, %v14146_v61  ;;  %v3901_v58 = vsub.f32 %v14139_v19, %v14147_v6  ;;  %v3896_v36 = vand.u32 4294901760, %v3895_v10  ;;  %v14152_v6 = vand.u32 4294901760, %v14143_v16  ;;  %v14155_v9 = vld [vmem:[#allocation55_spill] sm:$0xff]  ;;  %v14159_v20 = vld [vmem:[#allocation58_spill] sm:$0xff]  ;;  %v14164_v10 = vld [vmem:[#allocation53_spill] sm:$0xff] }
 0x610   : > { %8634 = vmatpush1.bf16.msra.mxu1 %v8633_v62  ;;  %v8641_v62 = vpack.c.bf16 %v3854_v38, %v3842_v55  ;;  %v3884_v61 = vand.u32 4294901760, %v3883_v12  ;;  %v14153_v38 = vand.u32 4294901760, %v14144_v18  ;;  %v14158_v12 = vld [vmem:[#allocation57_spill] sm:$0xff] }
 0x611   : > { %8636 = vmatprep.subr.bf16.mxu1 %v8635_v56  ;;  %v14148_v56 = vld [vmem:[#allocation34_spill] sm:$0xff]  ;;  %v3890_v57 = vand.u32 4294901760, %v3889_v2  ;;  %v3902_v52 = vand.u32 4294901760, %v3901_v58  ;;  %v14162_v58 = vand.u32 4294901760, %v11634_v31 }
 0x612   : > { %8770 = vmatpush1.bf16.msra.mxu0 %v14145_v46  ;;  %v3919_v55 = vsub.f32 %v14144_v18, %v14153_v38  ;;  %v14156_v46 = vld [vmem:[#allocation56_spill] sm:$0xff] }
 0x613   : > { %8772 = vmatprep.subr.bf16.mxu0 %v14148_v56  ;;  %v3907_v56 = vsub.f32 %v14143_v16, %v14152_v6  ;;  %v14160_v6 = vand.u32 4294901760, %v14149_v60  ;;  %v3931_v59 = vsub.f32 %v11634_v31, %v14162_v58  ;;  %v14167_v58 = vld [vmem:[#allocation59_spill] sm:$0xff]  ;;  %v14168_v31 = vand.u32 4294901760, %v14158_v12 }
 0x614   : > { %8638 = vmatpush1.bf16.msra.mxu1 %v8637_v25  ;;  %v14163_v25 = vand.u32 4294901760, %v14151_v42 }
 0x615   : > { %8640 = vmatprep.subr.bf16.mxu1 %v8639_v15  ;;  %v8645_v15 = vpack.c.bf16 %v3878_v41, %v3866_v37  ;;  %v3913_v38 = vsub.f32 %v14149_v60, %v14160_v6  ;;  %v8647_v37 = vpack.c.bf16 %v3896_v36, %v3884_v61  ;;  %v3908_v19 = vand.u32 4294901760, %v3907_v56  ;;  %v14170_v61 = vld [vmem:[#allocation61_spill] sm:$0xff] }
 0x616   : > { %8774 = vmatpush1.bf16.msra.mxu0 %v14154_v3  ;;  %v14161_v3 = vand.u32 4294901760, %v14150_v54  ;;  %v3943_v41 = vsub.f32 %v14151_v42, %v14163_v25  ;;  %v14165_v6 = vand.u32 4294901760, %v14155_v9  ;;  %v14169_v36 = vand.u32 4294901760, %v14159_v20  ;;  %v14173_v42 = vld [vmem:[#allocation65_spill] sm:$0xff] }
 0x617   : > { %8776 = vmatprep.subr.bf16.mxu0 %v14157_v4  ;;  %v8649_v4 = vpack.c.bf16 %v3902_v52, %v3890_v57  ;;  %v14171_v57 = vld [vmem:[#allocation62_spill] sm:$0xff]  ;;  %v3914_v25 = vand.u32 4294901760, %v3913_v38  ;;  %v13756_v18 = vand.u32 4294901760, %v14173_v42 }
 0x618   : > { %8642 = vmatpush1.bf16.msra.mxu1 %v8641_v62  ;;  %v3925_v2 = vsub.f32 %v14150_v54, %v14161_v3  ;;  %v3920_v62 = vand.u32 4294901760, %v3919_v55  ;;  %v3937_v60 = vsub.f32 %v14155_v9, %v14165_v6  ;;  %v14166_v3 = vand.u32 4294901760, %v14156_v46 }
 0x619   : > { %8644 = vmatprep.subr.bf16.mxu1 %v8643_v17  ;;  %v3955_v17 = vsub.f32 %v14158_v12, %v14168_v31  ;;  %v3967_v56 = vsub.f32 %v14159_v20, %v14169_v36  ;;  %v13754_v52 = vand.u32 4294901760, %v14171_v57  ;;  %v3944_v9 = vand.u32 4294901760, %v3943_v41  ;;  %v14174_v31 = vld [vmem:[#allocation60_spill] sm:$0xff]  ;;  %v14175_v36 = vld [vmem:[#allocation63_spill] sm:$0xff] }
 0x61a   : > { %8778 = vmatpush1.bf16.msra.mxu0 %v14164_v10  ;;  %v3949_v54 = vsub.f32 %v14156_v46, %v14166_v3  ;;  %v3926_v6 = vand.u32 4294901760, %v3925_v2  ;;  %v3932_v10 = vand.u32 4294901760, %v3931_v59  ;;  %v8651_v3 = vpack.c.bf16 %v3920_v62, %v3908_v19  ;;  %v14177_v41 = vld [vmem:[#allocation67_spill] sm:$0xff]  ;;  %v14178_v62 = vld [vmem:[#allocation68_spill] sm:$0xff] }
 0x61b   : > { %8780 = vmatprep.subr.bf16.mxu0 %v14167_v58  ;;  %v14172_v58 = vld [vmem:[#allocation64_spill] sm:$0xff]  ;;  %v3938_v12 = vand.u32 4294901760, %v3937_v60  ;;  %v3956_v55 = vand.u32 4294901760, %v3955_v17  ;;  %v3968_v20 = vand.u32 4294901760, %v3967_v56  ;;  %v3973_v19 = vsub.f32 %v14171_v57, %v13754_v52  ;;  %v14179_v56 = vld [vmem:[#allocation70_spill] sm:$0xff] }
 0x61c   : > { %8646 = vmatpush1.bf16.msra.mxu1 %v8645_v15  ;;  %v13755_v46 = vand.u32 4294901760, %v14172_v58  ;;  %v3950_v16 = vand.u32 4294901760, %v3949_v54  ;;  %v14176_v15 = vand.u32 4294901760, %v14170_v61  ;;  %v8653_v59 = vpack.c.bf16 %v3926_v6, %v3914_v25  ;;  %v14184_v52 = vld [vmem:[#allocation74_spill] sm:$0xff] }
 0x61d   : > { %8648 = vmatprep.subr.bf16.mxu1 %v8647_v37  ;;  %v8655_v2 = vpack.c.bf16 %v3944_v9, %v3932_v10  ;;  %v13759_v37 = vand.u32 4294901760, %v14177_v41  ;;  %v13758_v60 = vand.u32 4294901760, %v14178_v62  ;;  %v3991_v17 = vsub.f32 %v14173_v42, %v13756_v18  ;;  %v14182_v9 = vld [vmem:[#allocation69_spill] sm:$0xff] }
 0x61e   : > { %8782 = vmatpush1.bf16.msra.mxu0 %v14174_v31  ;;  %v3961_v38 = vsub.f32 %v14170_v61, %v14176_v15  ;;  %v3979_v54 = vsub.f32 %v14172_v58, %v13755_v46  ;;  %v8657_v10 = vpack.c.bf16 %v3950_v16, %v3938_v12  ;;  %v8659_v25 = vpack.c.bf16 %v3968_v20, %v3956_v55  ;;  %v14183_v15 = vld [vmem:[#allocation73_spill] sm:$0xff] }
 0x61f   : > { %8784 = vmatprep.subr.bf16.mxu0 %v14175_v36  ;;  %v14180_v36 = vld [vmem:[#allocation71_spill] sm:$0xff]  ;;  %v3985_v46 = vsub.f32 %v14177_v41, %v13759_v37  ;;  %v3997_v18 = vsub.f32 %v14178_v62, %v13758_v60  ;;  %v13761_v31 = vand.u32 4294901760, %v14183_v15  ;;  %v13762_v42 = vand.u32 4294901760, %v14184_v52 }
 0x620   : > { %8650 = vmatpush1.bf16.msra.mxu1 %v8649_v4  ;;  %v14181_v4 = vld [vmem:[#allocation66_spill] sm:$0xff]  ;;  %v3962_v6 = vand.u32 4294901760, %v3961_v38  ;;  %v14185_v20 = vand.u32 4294901760, %v14179_v56  ;;  %v14186_v12 = vand.u32 4294901760, %v14180_v36  ;;  %v14187_v38 = vld [vmem:[#allocation72_spill] sm:$0xff] }
 0x621   : > { %8652 = vmatprep.subr.bf16.mxu1 %v8651_v3  ;;  %v3974_v3 = vand.u32 4294901760, %v3973_v19  ;;  %v14188_v19 = vld [vmem:[#allocation75_spill] sm:$0xff]  ;;  %v3986_v60 = vand.u32 4294901760, %v3985_v46  ;;  %v3998_v37 = vand.u32 4294901760, %v3997_v18 }
 0x622   : > { %8786 = vmatpush1.bf16.msra.mxu0 %v14181_v4  ;;  %v3980_v4 = vand.u32 4294901760, %v3979_v54  ;;  %v4003_v16 = vsub.f32 %v14179_v56, %v14185_v20  ;;  %v4015_v55 = vsub.f32 %v14180_v36, %v14186_v12  ;;  %v4021_v54 = vsub.f32 %v14184_v52, %v13762_v42  ;;  %v14189_v36 = vld [vmem:[#allocation76_spill] sm:$0xff] }
 0x623   : > { %8788 = vmatprep.subr.bf16.mxu0 %v14182_v9  ;;  %v3992_v9 = vand.u32 4294901760, %v3991_v17 }
 0x624   : > { %8654 = vmatpush1.bf16.msra.mxu1 %v8653_v59  ;;  %v8661_v59 = vpack.c.bf16 %v3974_v3, %v3962_v6  ;;  %v4004_v20 = vand.u32 4294901760, %v4003_v16  ;;  %v4016_v12 = vand.u32 4294901760, %v4015_v55  ;;  %v4022_v18 = vand.u32 4294901760, %v4021_v54  ;;  %v14191_v3 = vld [vmem:[#allocation78_spill] sm:$0xff]  ;;  %v14198_v16 = vld [vmem:[#allocation83_spill] sm:$0xff]  ;;  %v14199_v55 = vld [vmem:[#allocation84_spill] sm:$0xff] }
 0x625   : > { %8656 = vmatprep.subr.bf16.mxu1 %v8655_v2  ;;  %v4009_v2 = vsub.f32 %v14183_v15, %v13761_v31  ;;  %v8663_v17 = vpack.c.bf16 %v3992_v9, %v3980_v4  ;;  %v14192_v31 = vld [vmem:[#allocation79_spill] sm:$0xff]  ;;  %v14193_v4 = vld [vmem:[#allocation80_spill] sm:$0xff]  ;;  %v14194_v9 = vld [vmem:[#allocation86_spill] sm:$0xff] }
 0x626   : > { %8790 = vmatpush1.bf16.msra.mxu0 %v14187_v38  ;;  %v14190_v38 = vld [vmem:[#allocation77_spill] sm:$0xff]  ;;  %v8667_v6 = vpack.c.bf16 %v4016_v12, %v4004_v20  ;;  %v14204_v20 = vand.u32 4294901760, %v11413_v51  ;;  %v14209_v51 = vand.u32 4294901760, %v11441_v23  ;;  %v14215_v23 = vand.u32 4294901760, %v11477_v13 }
 0x627   : > { %8792 = vmatprep.subr.bf16.mxu0 %v14188_v19  ;;  %v4010_v46 = vand.u32 4294901760, %v4009_v2  ;;  %v14202_v2 = vand.u32 4294901760, %v11411_v33  ;;  %v14208_v33 = vand.u32 4294901760, %v11430_v39  ;;  %v14214_v39 = vand.u32 4294901760, %v11473_v43 }
 0x628   : > { %8658 = vmatpush1.bf16.msra.mxu1 %v8657_v10  ;;  %v8665_v10 = vpack.c.bf16 %v3998_v37, %v3986_v60  ;;  %v14196_v37 = vld [vmem:[#allocation82_spill] sm:$0xff]  ;;  %v14197_v60 = vld [vmem:[#allocation87_spill] sm:$0xff]  ;;  %v14221_v43 = vand.u32 4294901760, %v11523_v1  ;;  %v14222_v13 = vand.u32 4294901760, %v14127_v26  ;;  %v14232_v26 = vld [vmem:[#allocation41_spill] sm:$0xff] }
 0x629   : > { %8660 = vmatprep.subr.bf16.mxu1 %v8659_v25  ;;  %v8669_v42 = vpack.c.bf16 %v4022_v18, %v4010_v46  ;;  %v14195_v25 = vld [vmem:[#allocation81_spill] sm:$0xff] }
 0x62a   : > { %8794 = vmatpush1.bf16.msra.mxu0 %v14189_v36 }
 0x62b   : > { %8796 = vmatprep.subr.bf16.mxu0 %v14190_v38 }
 0x62c   : > { %8662 = vmatpush1.bf16.msra.mxu1 %v8661_v59  ;;  %v14200_v59 = vld [vmem:[#allocation85_spill] sm:$0xff] }
 0x62d   : > { %8664 = vmatprep.subr.bf16.mxu1 %v8663_v17  ;;  %v14203_v17 = vld [vmem:[#allocation88_spill] sm:$0xff] }
 0x62e   : > { %8798 = vmatpush1.bf16.msra.mxu0 %v14191_v3 }
 0x62f   : > { %8800 = vmatprep.subr.bf16.mxu0 %v14192_v31 }
 0x630   : > { %8666 = vmatpush1.bf16.msra.mxu1 %v8665_v10 }
 0x631   : > { %8668 = vmatprep.subr.bf16.mxu1 %v8667_v6  ;;  %v14219_v6 = vand.u32 4294901760, %v11506_v44 }
 0x632   : > { %8802 = vmatpush1.bf16.msra.mxu0 %v14193_v4 }
 0x633   : > { %8804 = vmatprep.subr.bf16.mxu0 %v11780_v30 }
 0x634   : > { %8670 = vmatpush1.bf16.msra.mxu1 %v8669_v42  ;;  %v14201_v42 = vand.u32 4294901760, %v11408_v63  ;;  %v14207_v63 = vand.u32 4294901760, %v11420_v48  ;;  %v14213_v48 = vand.u32 4294901760, %v11458_v8  ;;  %v14220_v8 = vand.u32 4294901760, %v11509_v5  ;;  %v14228_v5 = vld [vmem:[#allocation35_spill] sm:$0xff] }
 0x635   : > { %8672 = vmatprep.subr.bf16.mxu1 %v14194_v9 }
 0x636   : > { %8806 = vmatpush1.bf16.msra.mxu0 %v14195_v25  ;;  %v8817_v54 = vpack.c.bf16 %v14202_v2, %v14201_v42  ;;  %v8827_v46 = vpack.c.bf16 %v14214_v39, %v14213_v48  ;;  %v8833_v9 = vpack.c.bf16 %v14220_v8, %v14219_v6  ;;  %v14226_v2 = vld [vmem:[#allocation51_spill] sm:$0xff]  ;;  %v14252_v8 = vand.u32 4294901760, %v14170_v61 }
 0x637   : > { %8808 = vmatprep.subr.bf16.mxu0 %v14196_v37  ;;  %v14227_v44 = vand.u32 4294901760, %v14226_v2  ;;  %v14244_v48 = vld [vmem:[#allocation55_spill] sm:$0xff] }
 0x638   : > { %8674 = vmatpush1.bf16.msra.mxu1 %v14197_v60  ;;  %v8835_v60 = vpack.c.bf16 %v14222_v13, %v14221_v43  ;;  %v14245_v39 = vand.u32 4294901760, %v14244_v48  ;;  %v14254_v13 = vand.u32 4294901760, %v14172_v58  ;;  %v14263_v58 = vand.u32 4294901760, %v14184_v52  ;;  %v14272_v52 = vld [vmem:[#allocation28_spill] sm:$0xff]  ;;  %v14288_v48 = vld [vmem:[#allocation63_spill] sm:$0xff] }
 0x639   : > { %8676 = vmatprep.subr.bf16.mxu1 %v11856_v14  ;;  %v14205_v14 = vand.u32 4294901760, %v11415_v45  ;;  %v14210_v45 = vand.u32 4294901760, %v11447_v35  ;;  %v14216_v35 = vand.u32 4294901760, %v11480_v49  ;;  %v14223_v49 = vand.u32 4294901760, %v14133_v7 }
 0x63a   : > { %8810 = vmatpush1.bf16.msra.mxu0 %v14198_v16 }
 0x63b   : > { %8812 = vmatprep.subr.bf16.mxu0 %v14199_v55  ;;  %v8819_v12 = vpack.c.bf16 %v14205_v14, %v14204_v20  ;;  %v8823_v10 = vpack.c.bf16 %v14210_v45, %v14209_v51  ;;  %v14230_v20 = vld [vmem:[#allocation36_spill] sm:$0xff]  ;;  %v14240_v45 = vld [vmem:[#allocation50_spill] sm:$0xff] }
 0x63c   : > { %8678 = vmatpush1.bf16.msra.mxu1 %v11862_v34  ;;  %v14206_v34 = vand.u32 4294901760, %v11927_v24  ;;  %v14231_v1 = vand.u32 4294901760, %v14230_v20  ;;  %v14264_v20 = vld [vmem:[#allocation89_spill] sm:$0xff] }
 0x63d   : > { %8680 = vmatprep.subr.bf16.mxu1 %v11869_v0  ;;  %v8821_v0 = vpack.c.bf16 %v14208_v33, %v14207_v63 }
 0x63e   : > { %8814 = vmatpush1.bf16.msra.mxu0 %v14200_v59 }
 0x63f   : > { %8816 = vmatprep.subr.bf16.mxu0 %v14203_v17  ;;  %v14229_v17 = vand.u32 4294901760, %v14228_v5 }
 0x640   : > { %8682 = vmatpush1.bf16.msra.mxu1 %v11873_v22  ;;  %v14211_v22 = vand.u32 4294901760, %v11449_v21  ;;  %v14217_v21 = vand.u32 4294901760, %v11498_v27  ;;  %v14224_v27 = vand.u32 4294901760, %v14134_v32  ;;  %v14236_v32 = vld [vmem:[#allocation44_spill] sm:$0xff] }
 0x641   : > { %4467 = vmatmul.mubr.f32.vlgmr.msra.gmra.mrb[8].mxu0 %v14206_v34  ;;  %8684 = vmatprep.subr.bf16.mxu1 %v11877_v11  ;;  %v14212_v11 = vand.u32 4294901760, %v11451_v50  ;;  %v14218_v50 = vand.u32 4294901760, %v11501_v29  ;;  %v14225_v29 = vand.u32 4294901760, %v14135_v40  ;;  %v8841_v14 = vpack.c.bf16 %v14231_v1, %v14229_v17  ;;  %v14234_v34 = vld [vmem:[#allocation43_spill] sm:$0xff]  ;;  %v14267_v1 = vld [vmem:[#allocation92_spill] sm:$0xff] }
 0x642   : > { %8818 = vmatpush1.bf16.msra.mxu0 %v8817_v54  ;;  %4730 = vmatprep.mubr.f32.mxu0 %v11923_v53  ;;  %v8837_v42 = vpack.c.bf16 %v14224_v27, %v14223_v49  ;;  %v14235_v7 = vand.u32 4294901760, %v14234_v34  ;;  %v14237_v33 = vand.u32 4294901760, %v14236_v32  ;;  %v14274_v34 = vld [vmem:[#allocation30_spill] sm:$0xff]  ;;  %v14277_v32 = vld [vmem:[#allocation37_spill] sm:$0xff] }
 0x643   : > { %8820 = vmatprep.subr.bf16.mxu0 %v8819_v12  ;;  %v8825_v24 = vpack.c.bf16 %v14212_v11, %v14211_v22  ;;  %v8831_v18 = vpack.c.bf16 %v14218_v50, %v14217_v21  ;;  %v8839_v54 = vpack.c.bf16 %v14227_v44, %v14225_v29  ;;  %v14233_v12 = vand.u32 4294901760, %v14232_v26  ;;  %v14242_v22 = vld [vmem:[#allocation52_spill] sm:$0xff]  ;;  %v14250_v50 = vld [vmem:[#allocation58_spill] sm:$0xff] }
 0x644   : > { %8686 = vmatpush1.bf16.msra.mxu1 %v11879_v47  ;;  %v8829_v47 = vpack.c.bf16 %v14216_v35, %v14215_v23  ;;  %v14243_v11 = vand.u32 4294901760, %v14242_v22  ;;  %v14258_v29 = vand.u32 4294901760, %v14178_v62  ;;  %v14259_v44 = vand.u32 4294901760, %v14179_v56  ;;  %v14266_v62 = vld [vmem:[#allocation91_spill] sm:$0xff]  ;;  %v14268_v56 = vld [vmem:[#allocation93_spill] sm:$0xff]  ;;  %v14270_v26 = vld [vmem:[#allocation96_spill] sm:$0xff] }
 0x645   : > { %v8843_v63 = vpack.c.bf16 %v14235_v7, %v14233_v12  ;;  %v14273_v12 = vld [vmem:[#allocation29_spill] sm:$0xff]  ;;  %v14275_v7 = vld [vmem:[#allocation31_spill] sm:$0xff] }
 0x646   : > { %8822 = vmatpush1.bf16.msra.mxu0 %v8821_v0  ;;  %v14238_v0 = vld [vmem:[#allocation46_spill] sm:$0xff]  ;;  %v14285_v22 = vld [vmem:[#allocation53_spill] sm:$0xff] }
 0x647   : > { %4123 = vmatmul.mubr.f32.vlgmr.msra.gmra.mrb[14].mxu1 %v11908_v28  ;;  %8824 = vmatprep.subr.bf16.mxu0 %v8823_v10  ;;  %v14239_v40 = vand.u32 4294901760, %v14238_v0  ;;  %v14241_v10 = vand.u32 4294901760, %v14240_v45  ;;  %v14279_v0 = vld [vmem:[#allocation40_spill] sm:$0xff]  ;;  %v14282_v45 = vld [vmem:[#allocation34_spill] sm:$0xff] }
 0x649   : > { %v8845_v51 = vpack.c.bf16 %v14239_v40, %v14237_v33  ;;  %v14278_v33 = vld [vmem:[#allocation38_spill] sm:$0xff] }
 0x64a   : > { %8826 = vmatpush1.bf16.msra.mxu0 %v8825_v24  ;;  %v8847_v24 = vpack.c.bf16 %v14243_v11, %v14241_v10  ;;  %v14280_v40 = vld [vmem:[#allocation54_spill] sm:$0xff]  ;;  %v14283_v10 = vld [vmem:[#allocation47_spill] sm:$0xff] }
 0x64b   : > { %8828 = vmatprep.subr.bf16.mxu0 %v8827_v46  ;;  %v14246_v46 = vld [vmem:[#allocation56_spill] sm:$0xff]  ;;  %v14286_v11 = vld [vmem:[#allocation59_spill] sm:$0xff] }
 0x64c   : > { %v14247_v23 = vand.u32 4294901760, %v14246_v46  ;;  %v14290_v46 = vld [vmem:[#allocation69_spill] sm:$0xff] }
 0x64e   : > { %8830 = vmatpush1.bf16.msra.mxu0 %v8829_v47  ;;  %v8849_v35 = vpack.c.bf16 %v14247_v23, %v14245_v39  ;;  %v14248_v47 = vld [vmem:[#allocation57_spill] sm:$0xff]  ;;  %v14289_v39 = vld [vmem:[#allocation66_spill] sm:$0xff]  ;;  %v14291_v23 = vld [vmem:[#allocation72_spill] sm:$0xff] }
 0x64f   : > { %8832 = vmatprep.subr.bf16.mxu0 %v8831_v18  ;;  %v14249_v21 = vand.u32 4294901760, %v14248_v47  ;;  %v14251_v18 = vand.u32 4294901760, %v14250_v50  ;;  %v3550_v50 = vld [vmem:[#allocation11 + $0x218] sm:$0xff] }
 0x651   : > { %v8851_v6 = vpack.c.bf16 %v14251_v18, %v14249_v21  ;;  %v3548_v21 = vld [vmem:[#allocation11 + $0x208] sm:$0xff]  ;;  %v3547_v18 = vld [vmem:[#allocation11 + $0x200] sm:$0xff] }
 0x652   : > { %8834 = vmatpush1.bf16.msra.mxu0 %v8833_v9  ;;  %v14253_v9 = vand.u32 4294901760, %v14171_v57  ;;  %v14262_v57 = vand.u32 4294901760, %v14183_v15  ;;  %v14271_v15 = vld [vmem:[#allocation97_spill] sm:$0xff] }
 0x653   : > { %8836 = vmatprep.subr.bf16.mxu0 %v8835_v60  ;;  %v14255_v60 = vld [vmem:[#allocation65_spill] sm:$0xff] }
 0x654   : > { %v8853_v43 = vpack.c.bf16 %v14253_v9, %v14252_v8  ;;  %v14256_v49 = vand.u32 4294901760, %v14255_v60  ;;  %v8861_v17 = vpack.c.bf16 %v14263_v58, %v14262_v57  ;;  %v3558_v60 = vld [vmem:[#allocation11 + $0x258] sm:$0xff] }
 0x656   : > { %8838 = vmatpush1.bf16.msra.mxu0 %v8837_v42  ;;  %v8855_v27 = vpack.c.bf16 %v14256_v49, %v14254_v13  ;;  %v14257_v42 = vand.u32 4294901760, %v14177_v41  ;;  %v14265_v41 = vld [vmem:[#allocation90_spill] sm:$0xff]  ;;  %v3556_v13 = vld [vmem:[#allocation11 + $0x248] sm:$0xff] }
 0x657   : > { %8840 = vmatprep.subr.bf16.mxu0 %v8839_v54  ;;  %v14260_v54 = vld [vmem:[#allocation71_spill] sm:$0xff] }
 0x658   : > { %v8857_v2 = vpack.c.bf16 %v14258_v29, %v14257_v42  ;;  %v14261_v61 = vand.u32 4294901760, %v14260_v54  ;;  %v4891_v29 = vand.u32 4294901760, %v3556_v13  ;;  %v3557_v54 = vld [vmem:[#allocation11 + $0x250] sm:$0xff] }
 0x65a   : > { %8842 = vmatpush1.bf16.msra.mxu0 %v8841_v14  ;;  %v8859_v5 = vpack.c.bf16 %v14261_v61, %v14259_v44  ;;  %v14269_v14 = vld [vmem:[#allocation94_spill] sm:$0xff]  ;;  %v3555_v44 = vld [vmem:[#allocation11 + $0x240] sm:$0xff]  ;;  %v3560_v61 = vld [vmem:[#allocation11 + $0x268] sm:$0xff] }
 0x65b   : > { %8844 = vmatprep.subr.bf16.mxu0 %v8843_v63  ;;  %v14276_v63 = vld [vmem:[#allocation32_spill] sm:$0xff]  ;;  %v4893_v58 = vand.u32 4294901760, %v3555_v44 }
 0x65e   : > { %8846 = vmatpush1.bf16.msra.mxu0 %v8845_v51  ;;  %v14281_v51 = vld [vmem:[#allocation33_spill] sm:$0xff] }
 0x65f   : > { %8848 = vmatprep.subr.bf16.mxu0 %v8847_v24  ;;  %v14287_v24 = vld [vmem:[#allocation60_spill] sm:$0xff] }
 0x662   : > { %8850 = vmatpush1.bf16.msra.mxu0 %v8849_v35  ;;  %v14292_v35 = vld [vmem:[#allocation95_spill] sm:$0xff] }
 0x663   : > { %8852 = vmatprep.subr.bf16.mxu0 %v8851_v6  ;;  %v3481_v47 = vrot.slane %v14292_v35, 4 }
 0x665   : > { %v12277_v6 = vand.u32 4294901760, %v3481_v47 }
 0x666   : > { %8854 = vmatpush1.bf16.msra.mxu0 %v8853_v43  ;;  %v3551_v43 = vld [vmem:[#allocation11 + $0x220] sm:$0xff] }
 0x667   : > { %8856 = vmatprep.subr.bf16.mxu0 %v8855_v27  ;;  %14293 = vst [vmem:[#allocation39_spill] sm:$0xff] %v12277_v6  ;;  %v12284_v49 = vsub.f32 %v3481_v47, %v12277_v6 }
 0x669   : > { %v13763_v57 = vand.u32 4294901760, %v12284_v49 }
 0x66a   : > { %8858 = vmatpush1.bf16.msra.mxu0 %v8857_v2  ;;  %v4895_v2 = vand.u32 4294901760, %v3558_v60 }
 0x66b   : > { %8860 = vmatprep.subr.bf16.mxu0 %v8859_v5  ;;  %v3562_v5 = vld [vmem:[#allocation11 + $0x278] sm:$0xff] }
 0x66e   : > { %8862 = vmatpush1.bf16.msra.mxu0 %v8861_v17  ;;  %v4897_v17 = vand.u32 4294901760, %v3557_v54 }
 0x66f   : > { %8864 = vmatprep.subr.bf16.mxu0 %v14264_v20  ;;  %v14294_v20 = vmov 0.0  }
 0x672   : > { %8866 = vmatpush1.bf16.msra.mxu0 %v14265_v41  ;;  %v12299_v41 = vpack.c.bf16 %v4895_v2, %v4891_v29 }
 0x673   : > { %8868 = vmatprep.subr.bf16.mxu0 %v14266_v62  ;;  %v4899_v62 = vand.u32 4294901760, %v3560_v61 }
 0x674   : > { %14295 = vst [vmem:[#allocation42_spill] sm:$0xff] %v12299_v41 }
 0x676   : > { %8870 = vmatpush1.bf16.msra.mxu0 %v14267_v1  ;;  %v4903_v1 = vand.u32 4294901760, %v3562_v5 }
 0x677   : > { %8872 = vmatprep.subr.bf16.mxu0 %v14268_v56  ;;  %v3559_v56 = vld [vmem:[#allocation11 + $0x260] sm:$0xff] }
 0x67a   : > { %8874 = vmatpush1.bf16.msra.mxu0 %v14269_v14  ;;  %v3561_v14 = vld [vmem:[#allocation11 + $0x270] sm:$0xff] }
 0x67b   : > { %8876 = vmatprep.subr.bf16.mxu0 %v14270_v26  ;;  %v3564_v26 = vld [vmem:[#allocation11 + $0x288] sm:$0xff] }
 0x67e   : > { %8878 = vmatpush1.bf16.msra.mxu0 %v14271_v15  ;;  %v3566_v15 = vld [vmem:[#allocation11 + $0x298] sm:$0xff] }
 0x67f   : > { %8880 = vmatprep.subr.bf16.mxu0 %v14272_v52  ;;  %v12307_v52 = vpack.c.bf16 %v4897_v17, %v4893_v58 }
 0x681   : > { %4732 = vmatmul.mubr.f32.vlgmr.msra.gmra.mrb[8].mxu0 %v11908_v28  ;;  %14296 = vst [vmem:[#allocation45_spill] sm:$0xff] %v12307_v52 }
 0x682   : > { %8882 = vmatpush1.bf16.msra.mxu0 %v14273_v12  ;;  %4867 = vmatprep.mubr.f32.mxu0 %v11923_v53  ;;  %v14284_v53 = vld [vmem:[#allocation48_spill] sm:$0xff]  ;;  %v4901_v12 = vand.u32 4294901760, %v3559_v56 }
 0x683   : > { %8884 = vmatprep.subr.bf16.mxu0 %v14274_v34  ;;  %v4905_v34 = vand.u32 4294901760, %v3561_v14 }
 0x686   : > { %8886 = vmatpush1.bf16.msra.mxu0 %v14275_v7  ;;  %v12310_v7 = vpack.c.bf16 %v4903_v1, %v4899_v62 }
 0x687   : > { %8888 = vmatprep.subr.bf16.mxu0 %v14276_v63  ;;  %v4907_v63 = vand.u32 4294901760, %v3564_v26 }
 0x688   : > { %14297 = vst [vmem:[#allocation49_spill] sm:$0xff] %v12310_v7 }
 0x68a   : > { %8890 = vmatpush1.bf16.msra.mxu0 %v14277_v32  ;;  %v4911_v32 = vand.u32 4294901760, %v3566_v15 }
 0x68b   : > { %8892 = vmatprep.subr.bf16.mxu0 %v14278_v33  ;;  %v3563_v33 = vld [vmem:[#allocation11 + $0x280] sm:$0xff] }
 0x68c   : > { %v4909_v35 = vand.u32 4294901760, %v3563_v33 }
 0x68e   : > { %8894 = vmatpush1.bf16.msra.mxu0 %v14279_v0  ;;  %v3565_v0 = vld [vmem:[#allocation11 + $0x290] sm:$0xff] }
 0x68f   : > { %8896 = vmatprep.subr.bf16.mxu0 %v14280_v40  ;;  %v4913_v47 = vand.u32 4294901760, %v3565_v0 }
 0x692   : > { %8898 = vmatpush1.bf16.msra.mxu0 %v14281_v51 }
 0x693   : > { %8900 = vmatprep.subr.bf16.mxu0 %v14282_v45 }
 0x696   : > { %8902 = vmatpush1.bf16.msra.mxu0 %v14283_v10  ;;  %v3568_v10 = vld [vmem:[#allocation11 + $0x2a8] sm:$0xff] }
 0x697   : > { %8904 = vmatprep.subr.bf16.mxu0 %v14284_v53  ;;  %v3570_v53 = vld [vmem:[#allocation11 + $0x2b8] sm:$0xff] }
 0x69a   : > { %8906 = vmatpush1.bf16.msra.mxu0 %v14285_v22  ;;  %v12390_v22 = vld [vmem:[#allocation11 + $0x2f0] sm:$0xff] }
 0x69b   : > { %8908 = vmatprep.subr.bf16.mxu0 %v14286_v11 }
 0x69e   : > { %8910 = vmatpush1.bf16.msra.mxu0 %v14287_v24 }
 0x69f   : > { %8912 = vmatprep.subr.bf16.mxu0 %v14288_v48 }
 0x6a2   : > { %8914 = vmatpush1.bf16.msra.mxu0 %v14289_v39 }
 0x6a3   : > { %8916 = vmatprep.subr.bf16.mxu0 %v14290_v46 }
 0x6a6   : > { %8918 = vmatpush1.bf16.msra.mxu0 %v14291_v23  ;;  %v12330_v23 = vpack.c.bf16 %v4905_v34, %v4901_v12 }
 0x6a7   : > { %8920 = vmatprep.subr.bf16.mxu0 %v14188_v19  ;;  %v4875_v19 = vand.u32 4294901760, %v3548_v21 }
 0x6a8   : > { %14298 = vst [vmem:[#allocation61_spill] sm:$0xff] %v12330_v23 }
 0x6a9   : > { %v12312_v40 = vsub.f32 %v3548_v21, %v4875_v19  ;;  %v12332_v21 = vld [vmem:[#allocation11 + $0x2a0] sm:$0xff] }
 0x6aa   : > { %8922 = vmatpush1.bf16.msra.mxu0 %v14189_v36  ;;  %v4879_v36 = vand.u32 4294901760, %v3550_v50 }
 0x6ab   : > { %8924 = vmatprep.subr.bf16.mxu0 %v14190_v38  ;;  %v3549_v38 = vld [vmem:[#allocation11 + $0x210] sm:$0xff] }
 0x6ac   : > { %v12281_v8 = vpack.c.bf16 %v4879_v36, %v4875_v19  ;;  %v12314_v51 = vsub.f32 %v3550_v50, %v4879_v36  ;;  %v12334_v50 = vld [vmem:[#allocation11 + $0x2b0] sm:$0xff]  ;;  %v12336_v19 = vsub.f32 %v3556_v13, %v4891_v29  ;;  %v12339_v36 = vpack.c.bf16 %v4911_v32, %v4907_v63 }
 0x6ad   : > { %v4917_v13 = vand.u32 4294901760, %v12332_v21  ;;  %v12362_v29 = vsub.f32 %v3561_v14, %v4905_v34  ;;  %v12382_v34 = vld [vmem:[#allocation11 + $0x2f8] sm:$0xff] }
 0x6ae   : > { %8926 = vmatpush1.bf16.msra.mxu0 %v14191_v3  ;;  %v3552_v3 = vld [vmem:[#allocation11 + $0x228] sm:$0xff]  ;;  %14299 = vst [vmem:[#allocation62_spill] sm:$0xff] %v12339_v36 }
 0x6af   : > { %8928 = vmatprep.subr.bf16.mxu0 %v14192_v31  ;;  %v3554_v31 = vld [vmem:[#allocation11 + $0x238] sm:$0xff]  ;;  %v4883_v9 = vand.u32 4294901760, %v3552_v3 }
 0x6b1   : > { %v12321_v24 = vsub.f32 %v3552_v3, %v4883_v9  ;;  %v12341_v3 = vsub.f32 %v3558_v60, %v4895_v2  ;;  %v12359_v60 = vld [vmem:[#allocation11 + $0x2d0] sm:$0xff]  ;;  %v12364_v2 = vpack.c.bf16 %v4913_v47, %v4909_v35 }
 0x6b2   : > { %8930 = vmatpush1.bf16.msra.mxu0 %v14193_v4  ;;  %v4877_v4 = vand.u32 4294901760, %v3547_v18 }
 0x6b3   : > { %8932 = vmatprep.subr.bf16.mxu0 %v11780_v30  ;;  %v4881_v30 = vand.u32 4294901760, %v3549_v38  ;;  %14302 = vst [vmem:[#allocation68_spill] sm:$0xff] %v12364_v2 }
 0x6b4   : > { %v12316_v45 = vsub.f32 %v3547_v18, %v4877_v4  ;;  %v4915_v18 = vand.u32 4294901760, %v3568_v10 }
 0x6b5   : > { %v12287_v27 = vpack.c.bf16 %v4881_v30, %v4877_v4  ;;  %v12319_v11 = vsub.f32 %v3549_v38, %v4881_v30  ;;  %v4919_v38 = vand.u32 4294901760, %v3570_v53  ;;  %v12345_v4 = vsub.f32 %v3557_v54, %v4897_v17 }
 0x6b6   : > { %8934 = vmatpush1.bf16.msra.mxu0 %v14195_v25  ;;  %v4887_v25 = vand.u32 4294901760, %v3554_v31  ;;  %v12347_v30 = vsub.f32 %v3560_v61, %v4899_v62  ;;  %v13771_v54 = vand.u32 4294901760, %v12314_v51  ;;  %v12369_v61 = vsub.f32 %v3564_v26, %v4907_v63  ;;  %v12388_v63 = vld [vmem:[#allocation11 + $0x2e0] sm:$0xff] }
 0x6b7   : > { %8936 = vmatprep.subr.bf16.mxu0 %v14196_v37  ;;  %v3553_v37 = vld [vmem:[#allocation11 + $0x230] sm:$0xff]  ;;  %v12374_v62 = vsub.f32 %v3566_v15, %v4911_v32  ;;  %v12404_v14 = vsub.f32 %v3568_v10, %v4915_v18 }
 0x6b8   : > { %v4889_v42 = vand.u32 4294901760, %v3553_v37  ;;  %v12323_v48 = vsub.f32 %v3554_v31, %v4887_v25  ;;  %v12343_v31 = vsub.f32 %v3555_v44, %v4893_v58  ;;  %14300 = vst [vmem:[#allocation64_spill] sm:$0xff] %v12347_v30  ;;  %v13768_v44 = vand.u32 4294901760, %v12312_v40 }
 0x6ba   : > { %8938 = vmatpush1.bf16.msra.mxu0 %v14198_v16  ;;  %v4885_v16 = vand.u32 4294901760, %v3551_v43  ;;  %v12327_v46 = vsub.f32 %v3553_v37, %v4889_v42  ;;  %v12353_v37 = vsub.f32 %v3559_v56, %v4901_v12  ;;  %v12380_v12 = vld [vmem:[#allocation11 + $0x2e8] sm:$0xff] }
 0x6bb   : > { %8940 = vmatprep.subr.bf16.mxu0 %v14199_v55  ;;  %v12290_v55 = vpack.c.bf16 %v4887_v25, %v4883_v9  ;;  %v3572_v9 = vld [vmem:[#allocation11 + $0x2c8] sm:$0xff]  ;;  %v12349_v25 = vld [vmem:[#allocation11 + $0x2d8] sm:$0xff] }
 0x6bc   : > { %v12325_v39 = vsub.f32 %v3551_v43, %v4885_v16  ;;  %v12351_v43 = vsub.f32 %v3562_v5, %v4903_v1  ;;  %v12371_v5 = vpack.c.bf16 %v4919_v38, %v4915_v18  ;;  %v4923_v58 = vand.u32 4294901760, %v3572_v9 }
 0x6bd   : > { %v4927_v17 = vand.u32 4294901760, %v12349_v25  ;;  %v12376_v1 = vsub.f32 %v3563_v33, %v4909_v35  ;;  %v4986_v33 = vsub.f32 %v12312_v40, %v13768_v44  ;;  %v14306_v44 = vand.u32 4294901760, %v12359_v60 }
 0x6be   : > { %8942 = vmatpush1.bf16.msra.mxu0 %v14200_v59  ;;  %v12295_v59 = vpack.c.bf16 %v4889_v42, %v4885_v16  ;;  %14301 = vst [vmem:[#allocation67_spill] sm:$0xff] %v12351_v43  ;;  %v4921_v16 = vand.u32 4294901760, %v12334_v50  ;;  %v12357_v42 = vld [vmem:[#allocation11 + $0x2c0] sm:$0xff]  ;;  %14303 = vst [vmem:[#allocation70_spill] sm:$0xff] %v12371_v5  ;;  %v14308_v35 = vand.u32 4294901760, %v12316_v45  ;;  %v14309_v18 = vand.u32 4294901760, %v12319_v11 }
 0x6bf   : > { %8944 = vmatprep.subr.bf16.mxu0 %v12281_v8  ;;  %v4925_v56 = vand.u32 4294901760, %v12357_v42  ;;  %v12406_v15 = vpack.c.bf16 %v4927_v17, %v4923_v58 }
 0x6c0   : > { %v12386_v26 = vpack.c.bf16 %v4921_v16, %v4917_v13  ;;  %v4992_v10 = vsub.f32 %v12316_v45, %v14308_v35  ;;  %v5004_v32 = vsub.f32 %v12319_v11, %v14309_v18  ;;  %v14312_v18 = vand.u32 4294901760, %v12380_v12 }
 0x6c1   : > { %4869 = vmatmul.mubr.f32.vlgmr.msra.gmra.mrb[8].mxu0 %v11908_v28  ;;  %v12304_v28 = vsub.f32 %v12284_v49, %v13763_v57  ;;  %v12384_v57 = vsub.f32 %v3565_v0, %v4913_v47  ;;  %v4998_v0 = vsub.f32 %v12314_v51, %v13771_v54  ;;  %14305 = vst [vmem:[#allocation74_spill] sm:$0xff] %v12406_v15  ;;  %v14310_v54 = vand.u32 4294901760, %v12321_v24 }
 0x6c2   : > { %8946 = vmatpush1.bf16.msra.mxu0 %v12287_v27  ;;  %4971 = vmatprep.mubr.f32.mxu0 %v14294_v20  ;;  %14304 = vst [vmem:[#allocation73_spill] sm:$0xff] %v12386_v26 }
 0x6c3   : > { %8948 = vmatprep.subr.bf16.mxu0 %v12290_v55  ;;  %v5010_v47 = vsub.f32 %v12321_v24, %v14310_v54  ;;  %v12446_v54 = vsub.f32 %v12334_v50, %v4921_v16  ;;  %v14317_v50 = vand.u32 4294901760, %v12388_v63 }
 0x6c6   : > { %8950 = vmatpush1.bf16.msra.mxu0 %v12295_v59 }
 0x6c7   : > { %8952 = vmatprep.subr.bf16.mxu0 %v12299_v41  ;;  %v14322_v41 = vand.u32 4294901760, %v12347_v30 }
 0x6ca   : > { %8954 = vmatpush1.bf16.msra.mxu0 %v12307_v52  ;;  %v14315_v52 = vand.u32 4294901760, %v12325_v39 }
 0x6cb   : > { %8956 = vmatprep.subr.bf16.mxu0 %v12310_v7  ;;  %v12434_v7 = vsub.f32 %v12332_v21, %v4917_v13  ;;  %v5011_v13 = vand.u32 4294901760, %v5010_v47  ;;  %v12478_v47 = vsub.f32 %v12357_v42, %v4925_v56  ;;  %v13789_v21 = vand.u32 4294901760, %v12353_v37 }
 0x6cc   : > { %v14324_v42 = vand.u32 4294901760, %v12304_v28 }
 0x6ce   : > { %8958 = vmatpush1.bf16.msra.mxu0 %v12330_v23  ;;  %v12414_v23 = vpack.c.bf16 %v14306_v44, %v4925_v56  ;;  %v4999_v44 = vand.u32 4294901760, %v4998_v0  ;;  %v13784_v0 = vand.u32 4294901760, %v12341_v3  ;;  %v13791_v56 = vand.u32 4294901760, %v12374_v62 }
 0x6cf   : > { %8960 = vmatprep.subr.bf16.mxu0 %v12339_v36  ;;  %v12410_v36 = vsub.f32 %v3570_v53, %v4919_v38  ;;  %v4987_v38 = vand.u32 4294901760, %v4986_v33  ;;  %v14313_v53 = vand.u32 4294901760, %v12382_v34 }
 0x6d0   : > { %14307 = vst [vmem:[#allocation75_spill] sm:$0xff] %v12414_v23  ;;  %v5094_v28 = vsub.f32 %v12374_v62, %v13791_v56 }
 0x6d2   : > { %8962 = vmatpush1.bf16.msra.mxu0 %v12364_v2  ;;  %v12441_v2 = vpack.c.bf16 %v14313_v53, %v14312_v18  ;;  %v5016_v53 = vsub.f32 %v12325_v39, %v14315_v52  ;;  %v14316_v18 = vand.u32 4294901760, %v12327_v46 }
 0x6d3   : > { %8964 = vmatprep.subr.bf16.mxu0 %v12371_v5  ;;  %v14311_v5 = vand.u32 4294901760, %v12323_v48 }
 0x6d4   : > { %14314 = vst [vmem:[#allocation76_spill] sm:$0xff] %v12441_v2  ;;  %v5028_v33 = vsub.f32 %v12327_v46, %v14316_v18  ;;  %v5046_v18 = vsub.f32 %v12341_v3, %v13784_v0  ;;  %v5017_v0 = vand.u32 4294901760, %v5016_v53 }
 0x6d5   : > { %v5022_v35 = vsub.f32 %v12323_v48, %v14311_v5  ;;  %v4993_v5 = vand.u32 4294901760, %v4992_v10 }
 0x6d6   : > { %8966 = vmatpush1.bf16.msra.mxu0 %v12386_v26  ;;  %v12448_v26 = vsub.f32 %v3572_v9, %v4923_v58  ;;  %v14318_v9 = vand.u32 4294901760, %v12390_v22  ;;  %v8975_v58 = vpack.c.bf16 %v4999_v44, %v4987_v38  ;;  %v14320_v38 = vand.u32 4294901760, %v12343_v31 }
 0x6d7   : > { %8968 = vmatprep.subr.bf16.mxu0 %v12406_v15  ;;  %v5005_v15 = vand.u32 4294901760, %v5004_v32  ;;  %v5023_v10 = vand.u32 4294901760, %v5022_v35  ;;  %v14319_v32 = vand.u32 4294901760, %v12336_v19  ;;  %v14321_v35 = vand.u32 4294901760, %v12345_v4 }
 0x6d8   : > { %v12463_v16 = vpack.c.bf16 %v14318_v9, %v14317_v50  ;;  %v12475_v50 = vsub.f32 %v12349_v25, %v4927_v17  ;;  %v5040_v44 = vsub.f32 %v12343_v31, %v14320_v38  ;;  %v13790_v17 = vand.u32 4294901760, %v12362_v29 }
 0x6d9   : > { %v5034_v52 = vsub.f32 %v12336_v19, %v14319_v32  ;;  %v5052_v9 = vsub.f32 %v12345_v4, %v14321_v35  ;;  %v8977_v32 = vpack.c.bf16 %v5005_v15, %v4993_v5  ;;  %v8979_v25 = vpack.c.bf16 %v5023_v10, %v5011_v13 }
 0x6da   : > { %8970 = vmatpush1.bf16.msra.mxu0 %v12414_v23  ;;  %v5047_v23 = vand.u32 4294901760, %v5046_v18  ;;  %v5058_v15 = vsub.f32 %v12347_v30, %v14322_v41  ;;  %v5041_v53 = vand.u32 4294901760, %v5040_v44  ;;  %v13793_v13 = vand.u32 4294901760, %v12376_v1 }
 0x6db   : > { %8972 = vmatprep.subr.bf16.mxu0 %v12441_v2  ;;  %v5029_v2 = vand.u32 4294901760, %v5028_v33  ;;  %v5035_v38 = vand.u32 4294901760, %v5034_v52  ;;  %v14323_v33 = vand.u32 4294901760, %v12351_v43  ;;  %v5053_v35 = vand.u32 4294901760, %v5052_v9 }
 0x6dc   : > { %v13792_v10 = vand.u32 4294901760, %v12384_v57  ;;  %v5064_v52 = vsub.f32 %v12353_v37, %v13789_v21  ;;  %v5076_v44 = vsub.f32 %v12362_v29, %v13790_v17  ;;  %v14325_v9 = vand.u32 4294901760, %v12369_v61 }
 0x6dd   : > { %v5070_v5 = vsub.f32 %v12351_v43, %v14323_v33  ;;  %v14327_v17 = vand.u32 4294901760, %v12380_v12  ;;  %v5088_v56 = vsub.f32 %v12376_v1, %v13793_v13  ;;  %v13794_v13 = vand.u32 4294901760, %v12448_v26 }
 0x6de   : > { %8974 = vmatpush1.bf16.msra.mxu0 %v12463_v16  ;;  %v5082_v33 = vsub.f32 %v12369_v61, %v14325_v9  ;;  %v8985_v9 = vpack.c.bf16 %v5053_v35, %v5041_v53  ;;  %v5100_v41 = vsub.f32 %v12384_v57, %v13792_v10  ;;  %v5095_v35 = vand.u32 4294901760, %v5094_v28 }
 0x6df   : > { %8976 = vmatprep.subr.bf16.mxu0 %v8975_v58  ;;  %v8981_v58 = vpack.c.bf16 %v5029_v2, %v5017_v0  ;;  %v14326_v2 = vand.u32 4294901760, %v12359_v60  ;;  %v5071_v21 = vand.u32 4294901760, %v5070_v5  ;;  %v12524_v18 = vsub.f32 %v12380_v12, %v14327_v17 }
 0x6e0   : > { %v5077_v5 = vand.u32 4294901760, %v5076_v44  ;;  %v5083_v53 = vand.u32 4294901760, %v5082_v33  ;;  %v14331_v12 = vand.u32 4294901760, %v12388_v63  ;;  %v5089_v44 = vand.u32 4294901760, %v5088_v56 }
 0x6e1   : > { %4977 = vmatmul.mubr.f32.vlgmr.msra.gmra.mrb[8].mxu0 %v14324_v42  ;;  %v12519_v0 = vsub.f32 %v12359_v60, %v14326_v2  ;;  %v5059_v42 = vand.u32 4294901760, %v5058_v15  ;;  %v14328_v60 = vand.u32 4294901760, %v12404_v14  ;;  %v5065_v15 = vand.u32 4294901760, %v5064_v52 }
 0x6e2   : > { %8978 = vmatpush1.bf16.msra.mxu0 %v8977_v32  ;;  %5207 = vmatprep.mubr.f32.mxu0 %v14294_v20  ;;  %v8983_v32 = vpack.c.bf16 %v5047_v23, %v5035_v38  ;;  %v14330_v2 = vand.u32 4294901760, %v12382_v34  ;;  %v12550_v17 = vsub.f32 %v12388_v63, %v14331_v12  ;;  %v5101_v33 = vand.u32 4294901760, %v5100_v41 }
 0x6e3   : > { %8980 = vmatprep.subr.bf16.mxu0 %v8979_v25  ;;  %v5106_v23 = vsub.f32 %v12404_v14, %v14328_v60  ;;  %v14329_v25 = vand.u32 4294901760, %v12410_v36  ;;  %v8987_v60 = vpack.c.bf16 %v5071_v21, %v5059_v42  ;;  %v14333_v21 = vand.u32 4294901760, %v12434_v7 }
 0x6e4   : > { %v12543_v10 = vsub.f32 %v12382_v34, %v14330_v2  ;;  %v14334_v42 = vand.u32 4294901760, %v12446_v54  ;;  %v8989_v63 = vpack.c.bf16 %v5077_v5, %v5065_v15  ;;  %v8991_v12 = vpack.c.bf16 %v5095_v35, %v5083_v53 }
 0x6e5   : > { %v5118_v38 = vsub.f32 %v12410_v36, %v14329_v25  ;;  %v5107_v34 = vand.u32 4294901760, %v5106_v23  ;;  %v13800_v25 = vand.u32 4294901760, %v12478_v47  ;;  %v5130_v56 = vsub.f32 %v12448_v26, %v13794_v13 }
 0x6e6   : > { %8982 = vmatpush1.bf16.msra.mxu0 %v8981_v58  ;;  %v14332_v58 = vand.u32 4294901760, %v12390_v22  ;;  %v5124_v2 = vsub.f32 %v12446_v54, %v14334_v42  ;;  %v14335_v41 = vand.u32 4294901760, %v12475_v50 }
 0x6e7   : > { %8984 = vmatprep.subr.bf16.mxu0 %v8983_v32  ;;  %v5119_v28 = vand.u32 4294901760, %v5118_v38  ;;  %v5112_v32 = vsub.f32 %v12434_v7, %v14333_v21  ;;  %v13795_v38 = vand.u32 4294901760, %v12524_v18  ;;  %v5136_v35 = vsub.f32 %v12478_v47, %v13800_v25  ;;  %v5758_v25 = vld [vmem:[%s13481_s10 + $0xa8] sm:$0xff] }
 0x6e8   : > { %v12555_v52 = vsub.f32 %v12390_v22, %v14332_v58  ;;  %v13796_v22 = vand.u32 4294901760, %v12519_v0  ;;  %v5142_v23 = vsub.f32 %v12475_v50, %v14335_v41  ;;  %v13797_v58 = vand.u32 4294901760, %v12543_v10 }
 0x6e9   : > { %v8995_v15 = vpack.c.bf16 %v5119_v28, %v5107_v34  ;;  %v5113_v5 = vand.u32 4294901760, %v5112_v32  ;;  %v5125_v53 = vand.u32 4294901760, %v5124_v2  ;;  %v13799_v21 = vand.u32 4294901760, %v12550_v17 }
 0x6ea   : > { %8986 = vmatpush1.bf16.msra.mxu0 %v8985_v9  ;;  %v8993_v9 = vpack.c.bf16 %v5101_v33, %v5089_v44  ;;  %v13798_v42 = vand.u32 4294901760, %v12555_v52  ;;  %v5131_v41 = vand.u32 4294901760, %v5130_v56  ;;  %v5143_v13 = vand.u32 4294901760, %v5142_v23 }
 0x6eb   : > { %8988 = vmatprep.subr.bf16.mxu0 %v8987_v60  ;;  %v5148_v60 = vsub.f32 %v12519_v0, %v13796_v22  ;;  %v5154_v44 = vsub.f32 %v12524_v18, %v13795_v38  ;;  %v5166_v33 = vsub.f32 %v12543_v10, %v13797_v58  ;;  %v8997_v34 = vpack.c.bf16 %v5125_v53, %v5113_v5 }
 0x6ec   : > { %v5137_v28 = vand.u32 4294901760, %v5136_v35  ;;  %v5160_v2 = vsub.f32 %v12550_v17, %v13799_v21  ;;  %v9007_v53 = vpack.c.bf16 %v12314_v51, %v12312_v40  ;;  %v9009_v35 = vpack.c.bf16 %v12319_v11, %v12316_v45 }
 0x6ed   : > { %v5149_v32 = vand.u32 4294901760, %v5148_v60  ;;  %v5155_v56 = vand.u32 4294901760, %v5154_v44  ;;  %v5167_v23 = vand.u32 4294901760, %v5166_v33  ;;  %v5737_v60 = vld [vmem:[%s13481_s10] sm:$0xff] }
 0x6ee   : > { %8990 = vmatpush1.bf16.msra.mxu0 %v8989_v63  ;;  %v5172_v63 = vsub.f32 %v12555_v52, %v13798_v42  ;;  %v5161_v22 = vand.u32 4294901760, %v5160_v2  ;;  %v5756_v2 = vld [vmem:[%s13481_s10 + $0x98] sm:$0xff] }
 0x6ef   : > { %8992 = vmatprep.subr.bf16.mxu0 %v8991_v12  ;;  %v8999_v12 = vpack.c.bf16 %v5143_v13, %v5131_v41  ;;  %v9001_v38 = vpack.c.bf16 %v5149_v32, %v5137_v28  ;;  %v9011_v13 = vpack.c.bf16 %v12323_v48, %v12321_v24  ;;  %v9017_v41 = vpack.c.bf16 %v12345_v4, %v12343_v31  ;;  %v5755_v32 = vld [vmem:[%s13481_s10 + $0x90] sm:$0xff] }
 0x6f0   : > { %v5173_v58 = vand.u32 4294901760, %v5172_v63  ;;  %v5771_v28 = vand.u32 4294901760, %v5737_v60  ;;  %v9019_v63 = vpack.c.bf16 %v12351_v43, %v12347_v30  ;;  %v5742_v43 = vld [vmem:[%s13481_s10 + $0x28] sm:$0xff] }
 0x6f2   : > { %8994 = vmatpush1.bf16.msra.mxu0 %v8993_v9  ;;  %v9003_v9 = vpack.c.bf16 %v5167_v23, %v5155_v56  ;;  %v9005_v5 = vpack.c.bf16 %v5173_v58, %v5161_v22  ;;  %v9015_v22 = vpack.c.bf16 %v12341_v3, %v12336_v19  ;;  %v5754_v58 = vld [vmem:[%s13481_s10 + $0x88] sm:$0xff]  ;;  %v5825_v56 = vand.u32 4294901760, %v5755_v32 }
 0x6f3   : > { %8996 = vmatprep.subr.bf16.mxu0 %v8995_v15  ;;  %v9013_v15 = vpack.c.bf16 %v12327_v46, %v12325_v39  ;;  %v5822_v33 = vand.u32 4294901760, %v5754_v58  ;;  %v5828_v23 = vand.u32 4294901760, %v5756_v2  ;;  %v12642_v21 = vsub.f32 %v5737_v60, %v5771_v28 }
 0x6f4   : > { %v12659_v60 = vsub.f32 %v5755_v32, %v5825_v56  ;;  %v5760_v32 = vld [vmem:[%s13481_s10 + $0xb8] sm:$0xff] }
 0x6f5   : > { %v12640_v42 = vsub.f32 %v5754_v58, %v5822_v33  ;;  %14339 = vst [vmem:[#allocation80_spill] sm:$0xff] %v12642_v21  ;;  %v12657_v58 = vpack.c.bf16 %v5828_v23, %v5825_v56 }
 0x6f6   : > { %8998 = vmatpush1.bf16.msra.mxu0 %v8997_v34  ;;  %v5738_v34 = vld [vmem:[%s13481_s10 + $0x8] sm:$0xff]  ;;  %14343 = vst [vmem:[#allocation87_spill] sm:$0xff] %v12659_v60 }
 0x6f7   : > { %9000 = vmatprep.subr.bf16.mxu0 %v8999_v12  ;;  %v5774_v12 = vand.u32 4294901760, %v5738_v34  ;;  %14338 = vst [vmem:[#allocation79_spill] sm:$0xff] %v12640_v42  ;;  %14342 = vst [vmem:[#allocation82_spill] sm:$0xff] %v12657_v58 }
 0x6f9   : > { %v12653_v30 = vpack.c.bf16 %v5774_v12, %v5771_v28 }
 0x6fa   : > { %9002 = vmatpush1.bf16.msra.mxu0 %v9001_v38  ;;  %v5753_v38 = vld [vmem:[%s13481_s10 + $0x80] sm:$0xff] }
 0x6fb   : > { %9004 = vmatprep.subr.bf16.mxu0 %v9003_v9  ;;  %v5819_v44 = vand.u32 4294901760, %v5753_v38  ;;  %v5739_v9 = vld [vmem:[%s13481_s10 + $0x10] sm:$0xff]  ;;  %14340 = vst [vmem:[#allocation86_spill] sm:$0xff] %v12653_v30 }
 0x6fc   : > { %v5777_v21 = vand.u32 4294901760, %v5739_v9 }
 0x6fe   : > { %9006 = vmatpush1.bf16.msra.mxu0 %v9005_v5  ;;  %v5740_v5 = vld [vmem:[%s13481_s10 + $0x18] sm:$0xff] }
 0x6ff   : > { %9008 = vmatprep.subr.bf16.mxu0 %v9007_v53  ;;  %v5757_v53 = vld [vmem:[%s13481_s10 + $0xa0] sm:$0xff]  ;;  %v5780_v42 = vand.u32 4294901760, %v5740_v5 }
 0x701   : > { %5209 = vmatmul.mubr.f32.vlgmr.msra.gmra.mrb[8].mxu0 %v12277_v6  ;;  %v5741_v6 = vld [vmem:[%s13481_s10 + $0x20] sm:$0xff] }
 0x702   : > { %9010 = vmatpush1.bf16.msra.mxu0 %v9009_v35  ;;  %5343 = vmatprep.mubr.f32.mxu0 %v14294_v20  ;;  %v12636_v35 = vpack.c.bf16 %v5822_v33, %v5819_v44  ;;  %v12665_v33 = vsub.f32 %v5756_v2, %v5828_v23  ;;  %v5783_v28 = vand.u32 4294901760, %v5741_v6  ;;  %v12675_v2 = vpack.c.bf16 %v5780_v42, %v5777_v21 }
 0x703   : > { %9012 = vmatprep.subr.bf16.mxu0 %v9011_v13  ;;  %v12638_v13 = vsub.f32 %v5753_v38, %v5819_v44  ;;  %v12655_v38 = vsub.f32 %v5738_v34, %v5774_v12  ;;  %v5759_v44 = vld [vmem:[%s13481_s10 + $0xb0] sm:$0xff]  ;;  %v5834_v34 = vand.u32 4294901760, %v5758_v25  ;;  %v5786_v12 = vand.u32 4294901760, %v5742_v43 }
 0x704   : > { %14336 = vst [vmem:[#allocation77_spill] sm:$0xff] %v12636_v35  ;;  %9136 = vmatprep.subr.bf16.mxu1 %v12636_v35  ;;  %14344 = vst [vmem:[#allocation83_spill] sm:$0xff] %v12665_v33  ;;  %v5837_v56 = vand.u32 4294901760, %v5759_v44  ;;  %v12677_v23 = vsub.f32 %v5739_v9, %v5777_v21  ;;  %v5744_v35 = vld [vmem:[%s13481_s10 + $0x38] sm:$0xff]  ;;  %v9021_v33 = vpack.c.bf16 %v12362_v29, %v12353_v37 }
 0x705   : > { %14337 = vst [vmem:[#allocation78_spill] sm:$0xff] %v12638_v13  ;;  %14341 = vst [vmem:[#allocation81_spill] sm:$0xff] %v12655_v38  ;;  %v5831_v13 = vand.u32 4294901760, %v5757_v53  ;;  %9138 = vmatpush3.bf16.msra.mxu1 %v12653_v30  ;;  %v12690_v38 = vsub.f32 %v5758_v25, %v5834_v34  ;;  %v12694_v21 = vsub.f32 %v5742_v43, %v5786_v12 }
 0x706   : > { %9014 = vmatpush1.bf16.msra.mxu0 %v9013_v15  ;;  %v5743_v15 = vld [vmem:[%s13481_s10 + $0x30] sm:$0xff]  ;;  %9140 = vmatprep.subr.bf16.mxu1 %v12657_v58  ;;  %14345 = vst [vmem:[#allocation84_spill] sm:$0xff] %v12675_v2  ;;  %v12692_v58 = vsub.f32 %v5741_v6, %v5783_v28  ;;  %v12696_v9 = vsub.f32 %v5759_v44, %v5837_v56 }
 0x707   : > { %9016 = vmatprep.subr.bf16.mxu0 %v9015_v22  ;;  %v12679_v22 = vsub.f32 %v5740_v5, %v5780_v42  ;;  %v12681_v30 = vsub.f32 %v5757_v53, %v5831_v13  ;;  %v12688_v60 = vpack.c.bf16 %v5834_v34, %v5831_v13  ;;  %v5840_v42 = vand.u32 4294901760, %v5760_v32 }
 0x708   : > { %v5789_v5 = vand.u32 4294901760, %v5743_v15  ;;  %v9023_v53 = vpack.c.bf16 %v12374_v62, %v12369_v61  ;;  %v5792_v13 = vand.u32 4294901760, %v5744_v35  ;;  %v9027_v44 = vpack.c.bf16 %v12410_v36, %v12404_v14 }
 0x709   : > { %14346 = vst [vmem:[#allocation85_spill] sm:$0xff] %v12681_v30  ;;  %14347 = vst [vmem:[#allocation88_spill] sm:$0xff] %v12688_v60  ;;  %9142 = vmatpush3.bf16.msra.mxu1 %v12675_v2  ;;  %v12701_v30 = vpack.c.bf16 %v5786_v12, %v5783_v28  ;;  %v12704_v6 = vpack.c.bf16 %v5840_v42, %v5837_v56  ;;  %v12706_v25 = vsub.f32 %v5760_v32, %v5840_v42  ;;  %v14356_v42 = vld [vmem:[#allocation42_spill] sm:$0xff] }
 0x70a   : > { %9018 = vmatpush1.bf16.msra.mxu0 %v9017_v41  ;;  %9144 = vmatprep.subr.bf16.mxu1 %v12688_v60  ;;  %v12708_v43 = vsub.f32 %v5743_v15, %v5789_v5  ;;  %v12710_v41 = vsub.f32 %v5744_v35, %v5792_v13  ;;  %v12717_v34 = vpack.c.bf16 %v5792_v13, %v5789_v5  ;;  %v14357_v5 = vld [vmem:[#allocation45_spill] sm:$0xff]  ;;  %v14369_v60 = vand.u32 4294901760, %v12316_v45 }
 0x70b   : > { %9020 = vmatprep.subr.bf16.mxu0 %v9019_v63  ;;  %14348 = vst [vmem:[#allocation51_spill] sm:$0xff] %v12701_v30  ;;  %14349 = vst [vmem:[#allocation35_spill] sm:$0xff] %v12704_v6  ;;  %v9025_v63 = vpack.c.bf16 %v12384_v57, %v12376_v1  ;;  %v9029_v28 = vpack.c.bf16 %v12446_v54, %v12434_v7  ;;  %v9031_v35 = vpack.c.bf16 %v12475_v50, %v12448_v26  ;;  %v14359_v13 = vld [vmem:[#allocation61_spill] sm:$0xff] }
 0x70c   : > { %14350 = vst [vmem:[#allocation36_spill] sm:$0xff] %v12706_v25  ;;  %14351 = vst [vmem:[#allocation41_spill] sm:$0xff] %v12708_v43  ;;  %v9035_v12 = vpack.c.bf16 %v12543_v10, %v12524_v18  ;;  %v9037_v56 = vpack.c.bf16 %v12555_v52, %v12550_v17  ;;  %v14370_v2 = vand.u32 4294901760, %v12319_v11  ;;  %v14373_v25 = vand.u32 4294901760, %v12284_v49 }
 0x70d   : > { %14352 = vst [vmem:[#allocation43_spill] sm:$0xff] %v12710_v41  ;;  %9146 = vmatpush3.bf16.msra.mxu1 %v12701_v30  ;;  %14353 = vst [vmem:[#allocation44_spill] sm:$0xff] %v12717_v34  ;;  %v14372_v41 = vand.u32 4294901760, %v12323_v48  ;;  %v14376_v45 = vand.u32 4294901760, %v12336_v19  ;;  %v14377_v11 = vand.u32 4294901760, %v12341_v3  ;;  %v14378_v48 = vand.u32 4294901760, %v12343_v31 }
 0x70e   : > { %9022 = vmatpush1.bf16.msra.mxu0 %v9021_v33  ;;  %9148 = vmatprep.subr.bf16.mxu1 %v12704_v6  ;;  %v9033_v33 = vpack.c.bf16 %v12519_v0, %v12478_v47  ;;  %v14368_v6 = vand.u32 4294901760, %v12314_v51  ;;  %v14375_v51 = vand.u32 4294901760, %v12327_v46  ;;  %v14385_v19 = vand.u32 4294901760, %v12362_v29 }
 0x70f   : > { %9024 = vmatprep.subr.bf16.mxu0 %v9023_v53  ;;  %v14358_v53 = vld [vmem:[#allocation49_spill] sm:$0xff]  ;;  %v14386_v3 = vand.u32 4294901760, %v12369_v61  ;;  %v14387_v31 = vand.u32 4294901760, %v12374_v62  ;;  %v14392_v29 = vand.u32 4294901760, %v12434_v7  ;;  %v14393_v61 = vand.u32 4294901760, %v12446_v54 }
 0x710   : > { %v14394_v62 = vand.u32 4294901760, %v12448_v26  ;;  %v14399_v7 = vand.u32 4294901760, %v12543_v10  ;;  %v14400_v54 = vand.u32 4294901760, %v12550_v17  ;;  %v14401_v26 = vand.u32 4294901760, %v12555_v52 }
 0x711   : > { %9150 = vmatpush3.bf16.msra.mxu1 %v12717_v34  ;;  %v14367_v34 = vand.u32 4294901760, %v12312_v40  ;;  %v14374_v40 = vand.u32 4294901760, %v12325_v39 }
 0x712   : > { %9026 = vmatpush1.bf16.msra.mxu0 %v9025_v63  ;;  %v14360_v63 = vld [vmem:[#allocation62_spill] sm:$0xff] }
 0x713   : > { %9028 = vmatprep.subr.bf16.mxu0 %v9027_v44  ;;  %v14361_v44 = vld [vmem:[#allocation68_spill] sm:$0xff]  ;;  %v9071_v30 = vpack.c.bf16 %v14368_v6, %v14367_v34  ;;  %v9077_v6 = vpack.c.bf16 %v14375_v51, %v14374_v40  ;;  %v9087_v34 = vpack.c.bf16 %v14387_v31, %v14386_v3  ;;  %v14390_v40 = vand.u32 4294901760, %v12404_v14 }
 0x714   : > { %v14397_v14 = vand.u32 4294901760, %v12519_v0  ;;  %v5764_v0 = vld [vmem:[%s13481_s10 + $0xd8] sm:$0xff] }
 0x716   : > { %9030 = vmatpush1.bf16.msra.mxu0 %v9029_v28  ;;  %v14362_v28 = vld [vmem:[#allocation70_spill] sm:$0xff] }
 0x717   : > { %9032 = vmatprep.subr.bf16.mxu0 %v9031_v35  ;;  %v14363_v35 = vld [vmem:[#allocation73_spill] sm:$0xff] }
 0x71a   : > { %v12729_v32 = vpop.f32.mrb[14].mxu1  ;;  %9034 = vmatpush1.bf16.msra.mxu0 %v9033_v33  ;;  %v14364_v33 = vld [vmem:[#allocation74_spill] sm:$0xff] }
 0x71b   : > { %14354 = vst [vmem:[#allocation46_spill] sm:$0xff] %v12729_v32  ;;  %v12733_v15 = vpop.f32.mrb[15].mxu1  ;;  %9036 = vmatprep.subr.bf16.mxu0 %v9035_v12  ;;  %v14365_v12 = vld [vmem:[#allocation75_spill] sm:$0xff]  ;;  %v14371_v32 = vand.u32 4294901760, %v12321_v24  ;;  %v9079_v24 = vpack.c.bf16 %v14377_v11, %v14376_v45 }
 0x71c   : > { %14355 = vst [vmem:[#allocation50_spill] sm:$0xff] %v12733_v15  ;;  %v9073_v15 = vpack.c.bf16 %v14370_v2, %v14369_v60  ;;  %v14380_v60 = vld [vmem:[#allocation64_spill] sm:$0xff]  ;;  %v14382_v2 = vld [vmem:[#allocation67_spill] sm:$0xff] }
 0x71d   : > { %v9075_v43 = vpack.c.bf16 %v14372_v41, %v14371_v32  ;;  %v14381_v39 = vand.u32 4294901760, %v14380_v60  ;;  %v14383_v46 = vand.u32 4294901760, %v14382_v2  ;;  %v14389_v32 = vand.u32 4294901760, %v12384_v57  ;;  %v5767_v2 = vld [vmem:[%s13481_s10 + $0xf0] sm:$0xff] }
 0x71e   : > { %9038 = vmatpush1.bf16.msra.mxu0 %v9037_v56  ;;  %v14366_v56 = vld [vmem:[#allocation76_spill] sm:$0xff]  ;;  %v14396_v57 = vand.u32 4294901760, %v12478_v47 }
 0x71f   : > { %9040 = vmatprep.subr.bf16.mxu0 %v12281_v8 }
 0x720   : > { %v9097_v11 = vpack.c.bf16 %v14397_v14, %v14396_v57 }
 0x721   : > { %5346 = vmatmul.mubr.f32.vlgmr.msra.gmra.mrb[8].mxu0 %v12284_v49  ;;  %v14379_v49 = vand.u32 4294901760, %v12345_v4  ;;  %v14388_v4 = vand.u32 4294901760, %v12376_v1  ;;  %v14395_v1 = vand.u32 4294901760, %v12475_v50  ;;  %v14402_v50 = vld [vmem:[#allocation39_spill] sm:$0xff] }
 0x722   : > { %9042 = vmatpush1.bf16.msra.mxu0 %v12287_v27  ;;  %5448 = vmatprep.mubr.f32.mxu0 %v14294_v20 }
 0x723   : > { %9044 = vmatprep.subr.bf16.mxu0 %v12290_v55  ;;  %v9095_v45 = vpack.c.bf16 %v14395_v1, %v14394_v62 }
 0x726   : > { %9046 = vmatpush1.bf16.msra.mxu0 %v12295_v59 }
 0x727   : > { %9048 = vmatprep.subr.bf16.mxu0 %v14356_v42 }
 0x72a   : > { %9050 = vmatpush1.bf16.msra.mxu0 %v14357_v5 }
 0x72b   : > { %9052 = vmatprep.subr.bf16.mxu0 %v14358_v53 }
 0x72e   : > { %9054 = vmatpush1.bf16.msra.mxu0 %v14359_v13 }
 0x72f   : > { %9056 = vmatprep.subr.bf16.mxu0 %v14360_v63 }
 0x732   : > { %9058 = vmatpush1.bf16.msra.mxu0 %v14361_v44 }
 0x733   : > { %9060 = vmatprep.subr.bf16.mxu0 %v14362_v28 }
 0x736   : > { %9062 = vmatpush1.bf16.msra.mxu0 %v14363_v35 }
 0x737   : > { %9064 = vmatprep.subr.bf16.mxu0 %v14364_v33 }
 0x73a   : > { %9066 = vmatpush1.bf16.msra.mxu0 %v14365_v12 }
 0x73b   : > { %9068 = vmatprep.subr.bf16.mxu0 %v14366_v56 }
 0x73e   : > { %9070 = vmatpush1.bf16.msra.mxu0 %v12463_v16 }
 0x73f   : > { %9072 = vmatprep.subr.bf16.mxu0 %v9071_v30  ;;  %v9081_v30 = vpack.c.bf16 %v14379_v49, %v14378_v48  ;;  %v9101_v48 = vpack.c.bf16 %v14401_v26, %v14400_v54  ;;  %v14411_v54 = vld [vmem:[#allocation79_spill] sm:$0xff] }
 0x740   : > { %v13847_v26 = vand.u32 4294901760, %v14411_v54 }
 0x741   : > { %5452 = vmatmul.mubr.f32.vlgmr.msra.gmra.mrb[8].mxu0 %v14373_v25  ;;  %v9083_v25 = vpack.c.bf16 %v14383_v46, %v14381_v39 }
 0x742   : > { %9074 = vmatpush1.bf16.msra.mxu0 %v9073_v15  ;;  %5618 = vmatprep.mubr.f32.mxu0 %v14294_v20  ;;  %v9089_v15 = vpack.c.bf16 %v14389_v32, %v14388_v4  ;;  %v5861_v4 = vand.u32 4294901760, %v5767_v2  ;;  %v5751_v32 = vld [vmem:[%s13481_s10 + $0x70] sm:$0xff] }
 0x743   : > { %9076 = vmatprep.subr.bf16.mxu0 %v9075_v43  ;;  %v14384_v43 = vand.u32 4294901760, %v12353_v37  ;;  %v14391_v37 = vand.u32 4294901760, %v12410_v36  ;;  %v14398_v36 = vand.u32 4294901760, %v12524_v18  ;;  %v5763_v18 = vld [vmem:[%s13481_s10 + $0xd0] sm:$0xff] }
 0x744   : > { %v5849_v52 = vand.u32 4294901760, %v5763_v18  ;;  %v12926_v14 = vsub.f32 %v5767_v2, %v5861_v4  ;;  %v13833_v2 = vand.u32 4294901760, %v12679_v22 }
 0x745   : > { %v9085_v41 = vpack.c.bf16 %v14385_v19, %v14384_v43  ;;  %v9091_v51 = vpack.c.bf16 %v14391_v37, %v14390_v40 }
 0x746   : > { %9078 = vmatpush1.bf16.msra.mxu0 %v9077_v6  ;;  %v9093_v6 = vpack.c.bf16 %v14393_v61, %v14392_v29  ;;  %v12889_v39 = vsub.f32 %v5763_v18, %v5849_v52  ;;  %v5752_v29 = vld [vmem:[%s13481_s10 + $0x78] sm:$0xff]  ;;  %14409 = vst [vmem:[#allocation71_spill] sm:$0xff] %v12926_v14 }
 0x747   : > { %9080 = vmatprep.subr.bf16.mxu0 %v9079_v24  ;;  %v9099_v24 = vpack.c.bf16 %v14399_v7, %v14398_v36  ;;  %v5816_v36 = vand.u32 4294901760, %v5752_v29  ;;  %v14410_v7 = vld [vmem:[#allocation78_spill] sm:$0xff] }
 0x74a   : > { %9082 = vmatpush1.bf16.msra.mxu0 %v9081_v30 }
 0x74b   : > { %9084 = vmatprep.subr.bf16.mxu0 %v9083_v25 }
 0x74e   : > { %9086 = vmatpush1.bf16.msra.mxu0 %v9085_v41 }
 0x74f   : > { %9088 = vmatprep.subr.bf16.mxu0 %v9087_v34  ;;  %v5768_v34 = vld [vmem:[%s13481_s10 + $0xf8] sm:$0xff] }
 0x750   : > { %v5864_v57 = vand.u32 4294901760, %v5768_v34 }
 0x752   : > { %9090 = vmatpush1.bf16.msra.mxu0 %v9089_v15 }
 0x753   : > { %9092 = vmatprep.subr.bf16.mxu0 %v9091_v51 }
 0x756   : > { %9094 = vmatpush1.bf16.msra.mxu0 %v9093_v6 }
 0x757   : > { %9096 = vmatprep.subr.bf16.mxu0 %v9095_v45 }
 0x75a   : > { %9098 = vmatpush1.bf16.msra.mxu0 %v9097_v11  ;;  %v5813_v11 = vand.u32 4294901760, %v5751_v32 }
 0x75b   : > { %9100 = vmatprep.subr.bf16.mxu0 %v9099_v24  ;;  %v13850_v24 = vand.u32 4294901760, %v14410_v7 }
 0x75d   : > { %v5998_v18 = vsub.f32 %v14410_v7, %v13850_v24 }
 0x75e   : > { %9102 = vmatpush1.bf16.msra.mxu0 %v9101_v48  ;;  %v14412_v48 = vld [vmem:[#allocation80_spill] sm:$0xff] }
 0x75f   : > { %9104 = vmatprep.subr.bf16.mxu0 %v12281_v8  ;;  %v5761_v8 = vld [vmem:[%s13481_s10 + $0xc0] sm:$0xff] }
 0x761   : > { %5620 = vmatmul.mubr.f32.vlgmr.msra.gmra.mrb[8].mxu0 %v14402_v50 }
 0x762   : > { %9106 = vmatpush1.bf16.msra.mxu0 %v12287_v27  ;;  %5722 = vmatprep.mubr.f32.mxu0 %v14294_v20  ;;  %v5762_v27 = vld [vmem:[%s13481_s10 + $0xc8] sm:$0xff] }
 0x763   : > { %9108 = vmatprep.subr.bf16.mxu0 %v12290_v55  ;;  %v5745_v55 = vld [vmem:[%s13481_s10 + $0x40] sm:$0xff]  ;;  %v5846_v47 = vand.u32 4294901760, %v5762_v27 }
 0x764   : > { %v5795_v10 = vand.u32 4294901760, %v5745_v55 }
 0x766   : > { %9110 = vmatpush1.bf16.msra.mxu0 %v12295_v59  ;;  %v5843_v59 = vand.u32 4294901760, %v5761_v8 }
 0x767   : > { %9112 = vmatprep.subr.bf16.mxu0 %v14356_v42  ;;  %v5852_v42 = vand.u32 4294901760, %v5764_v0 }
 0x769   : > { %v12887_v60 = vpack.c.bf16 %v5852_v42, %v5849_v52  ;;  %v12895_v46 = vsub.f32 %v5764_v0, %v5852_v42  ;;  %v6005_v0 = vsub.f32 %v14411_v54, %v13847_v26  ;;  %v14418_v42 = vld [vmem:[#allocation87_spill] sm:$0xff] }
 0x76a   : > { %9114 = vmatpush1.bf16.msra.mxu0 %v14357_v5  ;;  %v5747_v5 = vld [vmem:[%s13481_s10 + $0x50] sm:$0xff] }
 0x76b   : > { %9116 = vmatprep.subr.bf16.mxu0 %v14358_v53  ;;  %v5748_v53 = vld [vmem:[%s13481_s10 + $0x58] sm:$0xff]  ;;  %14405 = vst [vmem:[#allocation56_spill] sm:$0xff] %v12887_v60  ;;  %v5801_v25 = vand.u32 4294901760, %v5747_v5 }
 0x76c   : > { %v5804_v43 = vand.u32 4294901760, %v5748_v53 }
 0x76d   : > { %v12907_v40 = vsub.f32 %v5747_v5, %v5801_v25  ;;  %v13837_v5 = vand.u32 4294901760, %v14418_v42 }
 0x76e   : > { %9118 = vmatpush1.bf16.msra.mxu0 %v14359_v13  ;;  %v5765_v13 = vld [vmem:[%s13481_s10 + $0xe0] sm:$0xff]  ;;  %v12905_v15 = vpack.c.bf16 %v5804_v43, %v5801_v25  ;;  %v12909_v37 = vsub.f32 %v5748_v53, %v5804_v43 }
 0x76f   : > { %9120 = vmatprep.subr.bf16.mxu0 %v14360_v63  ;;  %v12866_v63 = vpack.c.bf16 %v5846_v47, %v5843_v59  ;;  %v5855_v19 = vand.u32 4294901760, %v5765_v13  ;;  %v14419_v53 = vld [vmem:[#allocation83_spill] sm:$0xff] }
 0x770   : > { %14406 = vst [vmem:[#allocation57_spill] sm:$0xff] %v12905_v15 }
 0x771   : > { %14403 = vst [vmem:[#allocation52_spill] sm:$0xff] %v12866_v63  ;;  %9152 = vmatprep.subr.bf16.mxu1 %v12866_v63  ;;  %v12911_v51 = vsub.f32 %v5765_v13, %v5855_v19  ;;  %v13836_v13 = vand.u32 4294901760, %v14419_v53 }
 0x772   : > { %9122 = vmatpush1.bf16.msra.mxu0 %v14361_v44  ;;  %v12868_v44 = vsub.f32 %v5761_v8, %v5843_v59  ;;  %v12933_v8 = vpack.c.bf16 %v5864_v57, %v5861_v4  ;;  %v14415_v59 = vld [vmem:[#allocation81_spill] sm:$0xff] }
 0x773   : > { %9124 = vmatprep.subr.bf16.mxu0 %v14362_v28  ;;  %v12870_v28 = vsub.f32 %v5762_v27, %v5846_v47  ;;  %v12935_v27 = vsub.f32 %v5768_v34, %v5864_v57  ;;  %v13841_v47 = vand.u32 4294901760, %v14415_v59  ;;  %v5907_v34 = vsub.f32 %v12679_v22, %v13833_v2  ;;  %v14420_v4 = vld [vmem:[#allocation85_spill] sm:$0xff] }
 0x774   : > { %14413 = vst [vmem:[#allocation89_spill] sm:$0xff] %v12933_v8 }
 0x775   : > { %v5893_v52 = vsub.f32 %v14415_v59, %v13841_v47  ;;  %v13846_v47 = vand.u32 4294901760, %v12870_v28 }
 0x776   : > { %9126 = vmatpush1.bf16.msra.mxu0 %v14363_v35  ;;  %v12872_v35 = vsub.f32 %v5745_v55, %v5795_v10  ;;  %v12937_v55 = vsub.f32 %v5751_v32, %v5813_v11  ;;  %v13831_v32 = vand.u32 4294901760, %v14420_v4 }
 0x777   : > { %9128 = vmatprep.subr.bf16.mxu0 %v14364_v33  ;;  %v5766_v33 = vld [vmem:[%s13481_s10 + $0xe8] sm:$0xff]  ;;  %v5894_v43 = vand.u32 4294901760, %v5893_v52  ;;  %v13834_v52 = vand.u32 4294901760, %v12692_v58 }
 0x778   : > { %v5858_v41 = vand.u32 4294901760, %v5766_v33  ;;  %14414 = vst [vmem:[#allocation90_spill] sm:$0xff] %v12937_v55 }
 0x77a   : > { %9130 = vmatpush1.bf16.msra.mxu0 %v14365_v12  ;;  %v5749_v12 = vld [vmem:[%s13481_s10 + $0x60] sm:$0xff]  ;;  %v12916_v61 = vpack.c.bf16 %v5858_v41, %v5855_v19  ;;  %v12918_v6 = vsub.f32 %v5766_v33, %v5858_v41  ;;  %v5999_v33 = vand.u32 4294901760, %v5998_v18  ;;  %v6012_v19 = vsub.f32 %v14418_v42, %v13837_v5 }
 0x77b   : > { %9132 = vmatprep.subr.bf16.mxu0 %v14366_v56  ;;  %v5750_v56 = vld [vmem:[%s13481_s10 + $0x68] sm:$0xff]  ;;  %v5807_v3 = vand.u32 4294901760, %v5749_v12  ;;  %v6019_v41 = vsub.f32 %v14419_v53, %v13836_v13 }
 0x77c   : > { %v5810_v31 = vand.u32 4294901760, %v5750_v56  ;;  %14407 = vst [vmem:[#allocation58_spill] sm:$0xff] %v12916_v61  ;;  %v6013_v57 = vand.u32 4294901760, %v6012_v19  ;;  %v13858_v20 = vand.u32 4294901760, %v12918_v6 }
 0x77d   : > { %v12922_v1 = vsub.f32 %v5749_v12, %v5807_v3  ;;  %v6006_v12 = vand.u32 4294901760, %v6005_v0  ;;  %v5908_v0 = vand.u32 4294901760, %v5907_v34  ;;  %v14421_v34 = vld [vmem:[#allocation36_spill] sm:$0xff] }
 0x77e   : > { %9134 = vmatpush1.bf16.msra.mxu0 %v12463_v16  ;;  %v5746_v16 = vld [vmem:[%s13481_s10 + $0x48] sm:$0xff]  ;;  %v12920_v62 = vpack.c.bf16 %v5810_v31, %v5807_v3  ;;  %v12924_v45 = vsub.f32 %v5750_v56, %v5810_v31  ;;  %v13835_v56 = vand.u32 4294901760, %v12677_v23 }
 0x77f   : > { %v5798_v17 = vand.u32 4294901760, %v5746_v16  ;;  %v9167_v3 = vpack.c.bf16 %v6006_v12, %v5999_v33 }
 0x780   : > { %14408 = vst [vmem:[#allocation65_spill] sm:$0xff] %v12920_v62  ;;  %v5900_v31 = vsub.f32 %v12677_v23, %v13835_v56  ;;  %v13845_v56 = vand.u32 4294901760, %v12868_v44 }
 0x781   : > { %5724 = vmatmul.mubr.f32.vlgmr.msra.gmra.mrb[8].mxu0 %v14402_v50  ;;  %v12883_v49 = vpack.c.bf16 %v5798_v17, %v5795_v10  ;;  %v12885_v30 = vsub.f32 %v5746_v16, %v5798_v17  ;;  %v13842_v50 = vand.u32 4294901760, %v14412_v48  ;;  %v12940_v16 = vpack.c.bf16 %v5816_v36, %v5813_v11 }
 0x782   : > { %v12942_v10 = vsub.f32 %v5752_v29, %v5816_v36  ;;  %v6020_v11 = vand.u32 4294901760, %v6019_v41  ;;  %v13832_v36 = vand.u32 4294901760, %v12690_v38  ;;  %v5901_v18 = vand.u32 4294901760, %v5900_v31 }
 0x783   : > { %14404 = vst [vmem:[#allocation55_spill] sm:$0xff] %v12883_v49  ;;  %9154 = vmatpush3.bf16.msra.mxu1 %v12883_v49  ;;  %14416 = vst [vmem:[#allocation91_spill] sm:$0xff] %v12940_v16  ;;  %v5886_v17 = vsub.f32 %v14412_v48, %v13842_v50  ;;  %v5914_v31 = vsub.f32 %v12692_v58, %v13834_v52 }
 0x784   : > { %9156 = vmatprep.subr.bf16.mxu1 %v12887_v60  ;;  %14417 = vst [vmem:[#allocation92_spill] sm:$0xff] %v12942_v10  ;;  %v12983_v33 = vpack.c.bf16 %v6020_v11, %v6013_v57  ;;  %v6033_v12 = vsub.f32 %v12690_v38, %v13832_v36  ;;  %v12990_v19 = vpack.c.bf16 %v5908_v0, %v5901_v18  ;;  %v14422_v36 = vld [vmem:[#allocation41_spill] sm:$0xff] }
 0x785   : > { %v5887_v25 = vand.u32 4294901760, %v5886_v17  ;;  %v6026_v17 = vsub.f32 %v14420_v4, %v13831_v32  ;;  %v13840_v32 = vand.u32 4294901760, %v14421_v34  ;;  %v13843_v2 = vand.u32 4294901760, %v14422_v36 }
 0x786   : > { %v5915_v18 = vand.u32 4294901760, %v5914_v31 }
 0x787   : > { %9158 = vmatpush3.bf16.msra.mxu1 %v12905_v15  ;;  %v12975_v29 = vpack.c.bf16 %v5894_v43, %v5887_v25  ;;  %v13838_v25 = vand.u32 4294901760, %v12694_v21  ;;  %v13839_v43 = vand.u32 4294901760, %v12696_v9  ;;  %v6027_v41 = vand.u32 4294901760, %v6026_v17  ;;  %v14423_v17 = vld [vmem:[#allocation43_spill] sm:$0xff] }
 0x788   : > { %9160 = vmatprep.subr.bf16.mxu1 %v12916_v61  ;;  %v6047_v0 = vsub.f32 %v14421_v34, %v13840_v32  ;;  %v13844_v52 = vand.u32 4294901760, %v14423_v17  ;;  %v6054_v32 = vsub.f32 %v12868_v44, %v13845_v56 }
 0x789   : > { %v5921_v57 = vsub.f32 %v12694_v21, %v13838_v25  ;;  %v6040_v11 = vsub.f32 %v12696_v9, %v13839_v43  ;;  %v5928_v25 = vsub.f32 %v14422_v36, %v13843_v2 }
 0x78a   : > { %v6048_v43 = vand.u32 4294901760, %v6047_v0  ;;  %v5935_v31 = vsub.f32 %v14423_v17, %v13844_v52  ;;  %v6055_v2 = vand.u32 4294901760, %v6054_v32  ;;  %v6061_v52 = vsub.f32 %v12870_v28, %v13846_v47 }
 0x78b   : > { %9162 = vmatpush3.bf16.msra.mxu1 %v12920_v62  ;;  %v5922_v13 = vand.u32 4294901760, %v5921_v57  ;;  %v6041_v5 = vand.u32 4294901760, %v6040_v11  ;;  %v13849_v57 = vand.u32 4294901760, %v12885_v30  ;;  %v13856_v32 = vand.u32 4294901760, %v12907_v40 }
 0x78c   : > { %9164 = vmatprep.subr.bf16.mxu1 %v12933_v8  ;;  %v5936_v0 = vand.u32 4294901760, %v5935_v31  ;;  %v13857_v31 = vand.u32 4294901760, %v12909_v37 }
 0x78d   : > { %v13020_v50 = vpack.c.bf16 %v5922_v13, %v5915_v18  ;;  %v13024_v11 = vpack.c.bf16 %v6048_v43, %v6041_v5  ;;  %v5949_v13 = vsub.f32 %v12885_v30, %v13849_v57  ;;  %v13855_v18 = vand.u32 4294901760, %v12895_v46 }
 0x78e   : > { %v6062_v43 = vand.u32 4294901760, %v6061_v52  ;;  %v5956_v52 = vsub.f32 %v12907_v40, %v13856_v32 }
 0x78f   : > { %9166 = vmatpush3.bf16.msra.mxu1 %v12940_v16  ;;  %v5950_v26 = vand.u32 4294901760, %v5949_v13  ;;  %v6075_v57 = vsub.f32 %v12895_v46, %v13855_v18 }
 0x790   : > { %9168 = vmatprep.subr.bf16.mxu1 %v9167_v3  ;;  %v6034_v3 = vand.u32 4294901760, %v6033_v12  ;;  %v13047_v24 = vpack.c.bf16 %v6062_v43, %v6055_v2  ;;  %v5957_v16 = vand.u32 4294901760, %v5956_v52  ;;  %v13860_v43 = vand.u32 4294901760, %v12922_v1 }
 0x791   : > { %v13866_v52 = vand.u32 4294901760, %v12926_v14 }
 0x792   : > { %v13008_v12 = vpack.c.bf16 %v6034_v3, %v6027_v41  ;;  %v5929_v41 = vand.u32 4294901760, %v5928_v25  ;;  %v13848_v3 = vand.u32 4294901760, %v12872_v35  ;;  %v13851_v25 = vand.u32 4294901760, %v12889_v39 }
 0x794   : > { %v5942_v56 = vsub.f32 %v12872_v35, %v13848_v3  ;;  %v13037_v5 = vpack.c.bf16 %v5936_v0, %v5929_v41  ;;  %v6068_v3 = vsub.f32 %v12889_v39, %v13851_v25  ;;  %v5963_v41 = vsub.f32 %v12909_v37, %v13857_v31 }
 0x795   : > { %v6076_v25 = vand.u32 4294901760, %v6075_v57  ;;  %v6089_v31 = vsub.f32 %v12918_v6, %v13858_v20  ;;  %v5970_v57 = vsub.f32 %v12922_v1, %v13860_v43  ;;  %v13873_v20 = vand.u32 4294901760, %v12937_v55 }
 0x796   : > { %v5943_v47 = vand.u32 4294901760, %v5942_v56  ;;  %v13859_v56 = vand.u32 4294901760, %v12911_v51  ;;  %v6069_v13 = vand.u32 4294901760, %v6068_v3  ;;  %v5964_v18 = vand.u32 4294901760, %v5963_v41 }
 0x797   : > { %v6090_v41 = vand.u32 4294901760, %v6089_v31 }
 0x798   : > { %v13056_v0 = vpack.c.bf16 %v5950_v26, %v5943_v47  ;;  %v6082_v2 = vsub.f32 %v12911_v51, %v13859_v56  ;;  %v13063_v32 = vpack.c.bf16 %v6076_v25, %v6069_v13  ;;  %v13861_v26 = vand.u32 4294901760, %v12924_v45 }
 0x799   : > { %v13069_v47 = vpack.c.bf16 %v5964_v18, %v5957_v16  ;;  %v13869_v13 = vand.u32 4294901760, %v12935_v27  ;;  %v5971_v56 = vand.u32 4294901760, %v5970_v57  ;;  %v6096_v16 = vsub.f32 %v12926_v14, %v13866_v52 }
 0x79a   : > { %v6083_v3 = vand.u32 4294901760, %v6082_v2  ;;  %v5977_v25 = vsub.f32 %v12924_v45, %v13861_v26  ;;  %v13872_v18 = vand.u32 4294901760, %v12942_v10  ;;  %v5984_v26 = vsub.f32 %v12937_v55, %v13873_v20  ;;  %v14425_v20 = vld [vmem:[#allocation50_spill] sm:$0xff] }
 0x79b   : > { %v6103_v31 = vsub.f32 %v12935_v27, %v13869_v13  ;;  %v6097_v8 = vand.u32 4294901760, %v6096_v16 }
 0x79c   : > { %v13084_v2 = vpack.c.bf16 %v6090_v41, %v6083_v3  ;;  %v5978_v43 = vand.u32 4294901760, %v5977_v25  ;;  %v5991_v57 = vsub.f32 %v12942_v10, %v13872_v18  ;;  %v5985_v61 = vand.u32 4294901760, %v5984_v26  ;;  %v14424_v18 = vld [vmem:[#allocation46_spill] sm:$0xff] }
 0x79d   : > { %v6104_v52 = vand.u32 4294901760, %v6103_v31  ;;  %v3579_v31 = vld [vmem:[%s13480_s9] sm:$0x3]  ;;  %v5732_v26 = vstv %s7345_s1  ;;  %s9723_s1 = scalar_lea.vmem %s13430_s14, 16 }
 0x79e   : > { %v13095_v62 = vpack.c.bf16 %v5978_v43, %v5971_v56  ;;  %v5992_v3 = vand.u32 4294901760, %v5991_v57  ;;  %v3581_v43 = vlaneseq  ;;  %p9724_p9 = scmp.ne.s32.totalorder %s13430_s14, %s9723_s1  ;;  %p9731_p0 = scmp.lt.s32.totalorder %s9729_s15, %s9723_s1 }
 0x79f   : > { %v13097_v41 = vpack.c.bf16 %v6104_v52, %v6097_v8 }
 0x7a0   : > { %v9197_v15 = vpack.c.bf16 %v5992_v3, %v5985_v61  ;;  %v3582_v52 = vshrl.u32 %v3581_v43, 7  ;;  %p9725_p1 = pnand %p9724_p9, %p14498_p10  ;;  %p9732_p4 = por %p9731_p0, %p9730_p3 }
 0x7a2   : > { %v3583_v8 = vsub.s32 0, %v3582_v52  ;;  %v3587_v57 = vsub.s32 1, %v3582_v52  ;;  %p9726_p2 = pneg %p9725_p1 }
 0x7a4   : > { %v3584_v56 = vrot.slane %v3579_v31, %v3583_v8  ;;  %v3588_v3 = vrot.slane %v3579_v31, %v3587_v57  ;;  %v14446_v31 = vld [vmem:[#allocation86_spill] sm:$0xff]  ;;  %p9733_p7 = pnand %p9732_p4, %p9726_p2 }
 0x7a5   : > { %v14447_v57 = vld [vmem:[#allocation82_spill] sm:$0xff] }
 0x7a6   : > { %v9404_v16 = vadd.f32 %v14424_v18, %v3584_v56  ;;  %v9406_v13 = vadd.f32 %v14425_v20, %v3588_v3  ;;  %v14443_v56 = vld [vmem:[#allocation90_spill] sm:$0xff]  ;;  %v14448_v3 = vld [vmem:[#allocation84_spill] sm:$0xff] }
 0x854   : > { %v5725_v25 = vpop.f32.mrb[8].mxu0 }
 0x855   : > { %v9405_v60 = vadd.f32 %v9404_v16, %v5725_v25  ;;  %v5727_v49 = vpop.f32.mrb[9].mxu0 }
 0x856   : > { %v9407_v61 = vadd.f32 %v9406_v13, %v5727_v49 }
 0x857   : > { %vm5730_vm13 = vcmp.gt.f32.partialorder %v9405_v60, 0.0  ;;  %v5733_v43 = vmul.f32 %v9405_v60, %v5732_v26 }
 0x858   : > { %vm5731_vm14 = vcmp.gt.f32.partialorder %v9407_v61, 0.0  ;;  %v5734_v63 = vmul.f32 %v9407_v61, %v5732_v26 }
 0x859   : > { %v5735_v55 = vsel %vm5730_vm13, %v9405_v60, %v5733_v43  ;;  %v14449_v43 = vld [vmem:[#allocation88_spill] sm:$0xff] }
 0x85a   : > { %v13136_v10 = vand.u32 4294901760, %v5735_v55  ;;  %v5736_v52 = vsel %vm5731_vm14, %v9407_v61, %v5734_v63  ;;  %v14426_v63 = vpack.c.bf16 %v14411_v54, %v14410_v7  ;;  %v14445_v61 = vld [vmem:[#allocation77_spill] sm:$0xff] }
 0x85b   : > { %v13138_v14 = vand.u32 4294901760, %v5736_v52 }
 0x85c   : > { %v13141_v8 = vsub.f32 %v5735_v55, %v13136_v10  ;;  %v14431_v55 = vpack.c.bf16 %v12694_v21, %v12692_v58 }
 0x85d   : > { %v5867_v20 = vsub.f32 %v5736_v52, %v13138_v14  ;;  %v14450_v52 = vld [vmem:[#allocation51_spill] sm:$0xff] }
 0x85e   : > { %v5874_v18 = vand.u32 4294901760, %v13141_v8 }
 0x85f   : > { %v5868_v25 = vand.u32 4294901760, %v5867_v20 }
 0x860   : > { %v5875_v49 = vsub.f32 %v13141_v8, %v5874_v18 }
 0x861   : > { %v5869_v13 = vsub.f32 %v5867_v20, %v5868_v25 }
 0x862   : > { %v5876_v60 = vand.u32 4294901760, %v5875_v49  ;;  %v14452_v49 = vld [vmem:[#allocation44_spill] sm:$0xff] }
 0x863   : > { %v5870_v16 = vand.u32 4294901760, %v5869_v13  ;;  %v14453_v13 = vld [vmem:[#allocation52_spill] sm:$0xff] }
 0x865   : > { %5871 = vmatprep.mubr.f32.mxu1 %v5870_v16  ;;  %v14454_v16 = vld [vmem:[#allocation55_spill] sm:$0xff] }
 0x866   : > { %5877 = vmatmul.mubr.f32.vlgmr.msra.gmra.mrb[16].mxu1 %v5876_v60  ;;  %v14455_v60 = vld [vmem:[#allocation56_spill] sm:$0xff] }
 0x867   : > { %9170 = vmatpush3.bf16.msra.mxu1 %v12975_v29  ;;  %6107 = vmatprep.mubr.f32.mxu1 %v13138_v14  ;;  %v14432_v29 = vpack.c.bf16 %v14421_v34, %v12696_v9 }
 0x868   : > { %9172 = vmatprep.subr.bf16.mxu1 %v12983_v33  ;;  %v14433_v33 = vpack.c.bf16 %v14423_v17, %v14422_v36 }
 0x86b   : > { %9174 = vmatpush3.bf16.msra.mxu1 %v12990_v19  ;;  %v14434_v19 = vpack.c.bf16 %v12870_v28, %v12868_v44 }
 0x86c   : > { %9176 = vmatprep.subr.bf16.mxu1 %v13008_v12  ;;  %v14435_v12 = vpack.c.bf16 %v12885_v30, %v12872_v35 }
 0x86f   : > { %9178 = vmatpush3.bf16.msra.mxu1 %v13020_v50  ;;  %v14428_v50 = vpack.c.bf16 %v14419_v53, %v14418_v42 }
 0x870   : > { %9180 = vmatprep.subr.bf16.mxu1 %v13024_v11  ;;  %v14436_v11 = vpack.c.bf16 %v12895_v46, %v12889_v39 }
 0x873   : > { %9182 = vmatpush3.bf16.msra.mxu1 %v13037_v5  ;;  %v14437_v5 = vpack.c.bf16 %v12909_v37, %v12907_v40 }
 0x874   : > { %9184 = vmatprep.subr.bf16.mxu1 %v13047_v24  ;;  %v14427_v24 = vpack.c.bf16 %v14415_v59, %v14412_v48 }
 0x877   : > { %9186 = vmatpush3.bf16.msra.mxu1 %v13056_v0  ;;  %v14439_v0 = vpack.c.bf16 %v12924_v45, %v12922_v1 }
 0x878   : > { %9188 = vmatprep.subr.bf16.mxu1 %v13063_v32  ;;  %v14438_v32 = vpack.c.bf16 %v12918_v6, %v12911_v51 }
 0x87b   : > { %9190 = vmatpush3.bf16.msra.mxu1 %v13069_v47  ;;  %v14440_v47 = vld [vmem:[#allocation71_spill] sm:$0xff] }
 0x87c   : > { %9192 = vmatprep.subr.bf16.mxu1 %v13084_v2  ;;  %v14441_v2 = vpack.c.bf16 %v12935_v27, %v14440_v47 }
 0x87f   : > { %9194 = vmatpush3.bf16.msra.mxu1 %v13095_v62  ;;  %v14429_v62 = vpack.c.bf16 %v12679_v22, %v12677_v23 }
 0x880   : > { %9196 = vmatprep.subr.bf16.mxu1 %v13097_v41  ;;  %v14442_v41 = vld [vmem:[#allocation92_spill] sm:$0xff] }
 0x881   : > { %v14444_v26 = vpack.c.bf16 %v14442_v41, %v14443_v56 }
 0x883   : > { %9198 = vmatpush3.bf16.msra.mxu1 %v9197_v15  ;;  %v14430_v15 = vpack.c.bf16 %v12690_v38, %v14420_v4 }
 0x884   : > { %9200 = vmatprep.subr.bf16.mxu1 %v14426_v63  ;;  %v14456_v63 = vld [vmem:[#allocation57_spill] sm:$0xff] }
 0x886   : > { %6109 = vmatmul.mubr.f32.vlgmr.msra.gmra.mrb[18].mxu1 %v13136_v10 }
 0x887   : > { %9202 = vmatpush3.bf16.msra.mxu1 %v14427_v24  ;;  %6244 = vmatprep.mubr.f32.mxu1 %v5867_v20  ;;  %v14451_v20 = vld [vmem:[#allocation35_spill] sm:$0xff]  ;;  %v14458_v24 = vld [vmem:[#allocation65_spill] sm:$0xff] }
 0x888   : > { %9204 = vmatprep.subr.bf16.mxu1 %v14428_v50  ;;  %v14459_v50 = vld [vmem:[#allocation89_spill] sm:$0xff] }
 0x88b   : > { %9206 = vmatpush3.bf16.msra.mxu1 %v14429_v62  ;;  %v14460_v62 = vand.u32 4294901760, %v14410_v7  ;;  %v14467_v7 = vand.u32 4294901760, %v12677_v23  ;;  %v14474_v23 = vand.u32 4294901760, %v14421_v34  ;;  %v14481_v34 = vand.u32 4294901760, %v12889_v39 }
 0x88c   : > { %9208 = vmatprep.subr.bf16.mxu1 %v14430_v15  ;;  %v14461_v15 = vand.u32 4294901760, %v14411_v54  ;;  %v14468_v54 = vand.u32 4294901760, %v12679_v22  ;;  %v14475_v22 = vand.u32 4294901760, %v14422_v36  ;;  %v14482_v36 = vand.u32 4294901760, %v12895_v46 }
 0x88d   : > { %v14488_v39 = vand.u32 4294901760, %v12924_v45  ;;  %v14489_v46 = vand.u32 4294901760, %v14440_v47  ;;  %v5769_v47 = vld [vmem:[%s13482_s11] sm:$0x1] }
 0x88f   : > { %9210 = vmatpush3.bf16.msra.mxu1 %v14431_v55  ;;  %v9263_v55 = vpack.c.bf16 %v14461_v15, %v14460_v62 }
 0x890   : > { %9212 = vmatprep.subr.bf16.mxu1 %v14432_v29  ;;  %v14462_v29 = vld [vmem:[#allocation91_spill] sm:$0xff] }
 0x893   : > { %9214 = vmatpush3.bf16.msra.mxu1 %v14433_v33  ;;  %v14463_v33 = vand.u32 4294901760, %v14412_v48  ;;  %v9269_v48 = vpack.c.bf16 %v14468_v54, %v14467_v7 }
 0x894   : > { %9216 = vmatprep.subr.bf16.mxu1 %v14434_v19  ;;  %v14464_v19 = vand.u32 4294901760, %v14415_v59  ;;  %v14469_v59 = vand.u32 4294901760, %v14420_v4  ;;  %v14476_v4 = vand.u32 4294901760, %v14423_v17  ;;  %v14483_v17 = vand.u32 4294901760, %v12907_v40 }
 0x895   : > { %v14490_v40 = vand.u32 4294901760, %v12935_v27 }
 0x896   : > { %v9277_v62 = vpack.c.bf16 %v14476_v4, %v14475_v22 }
 0x897   : > { %9218 = vmatpush3.bf16.msra.mxu1 %v14435_v12  ;;  %v9265_v12 = vpack.c.bf16 %v14464_v19, %v14463_v33  ;;  %v9283_v33 = vpack.c.bf16 %v14482_v36, %v14481_v34 }
 0x898   : > { %9220 = vmatprep.subr.bf16.mxu1 %v14436_v11  ;;  %v14465_v11 = vand.u32 4294901760, %v14418_v42 }
 0x89b   : > { %9222 = vmatpush3.bf16.msra.mxu1 %v14437_v5  ;;  %v14466_v5 = vand.u32 4294901760, %v14419_v53  ;;  %v14471_v53 = vand.u32 4294901760, %v12692_v58  ;;  %v14478_v58 = vand.u32 4294901760, %v12870_v28  ;;  %v14485_v28 = vand.u32 4294901760, %v12911_v51 }
 0x89c   : > { %9224 = vmatprep.subr.bf16.mxu1 %v14438_v32  ;;  %v14492_v51 = vand.u32 4294901760, %v14442_v41 }
 0x89d   : > { %v9267_v32 = vpack.c.bf16 %v14466_v5, %v14465_v11  ;;  %v9291_v5 = vpack.c.bf16 %v14490_v40, %v14489_v46 }
 0x89f   : > { %9226 = vmatpush3.bf16.msra.mxu1 %v14439_v0  ;;  %v14470_v0 = vand.u32 4294901760, %v12690_v38  ;;  %v14477_v38 = vand.u32 4294901760, %v12868_v44  ;;  %v14484_v44 = vand.u32 4294901760, %v12909_v37  ;;  %v14491_v37 = vand.u32 4294901760, %v14443_v56 }
 0x8a0   : > { %9228 = vmatprep.subr.bf16.mxu1 %v14441_v2  ;;  %v14473_v2 = vand.u32 4294901760, %v12696_v9  ;;  %v14480_v9 = vand.u32 4294901760, %v12885_v30  ;;  %v14487_v30 = vand.u32 4294901760, %v12922_v1  ;;  %v14494_v1 = vmov 0.0  }
 0x8a1   : > { %v9271_v42 = vpack.c.bf16 %v14470_v0, %v14469_v59  ;;  %v9279_v15 = vpack.c.bf16 %v14478_v58, %v14477_v38  ;;  %v9285_v19 = vpack.c.bf16 %v14484_v44, %v14483_v17 }
 0x8a2   : > { %v9289_v11 = vpack.c.bf16 %v14488_v39, %v14487_v30 }
 0x8a3   : > { %9230 = vmatpush3.bf16.msra.mxu1 %v14444_v26  ;;  %v9275_v26 = vpack.c.bf16 %v14474_v23, %v14473_v2 }
 0x8a4   : > { %9232 = vmatprep.subr.bf16.mxu1 %v14445_v61 }
 0x8a6   : > { %6247 = vmatmul.mubr.f32.vlgmr.msra.gmra.mrb[20].mxu1 %v13141_v8  ;;  %v14472_v8 = vand.u32 4294901760, %v12694_v21  ;;  %v14479_v21 = vand.u32 4294901760, %v12872_v35  ;;  %v14486_v35 = vand.u32 4294901760, %v12918_v6  ;;  %v14493_v6 = vmov 0.0|0.0  }
 0x8a7   : > { %9234 = vmatpush3.bf16.msra.mxu1 %v14446_v31  ;;  %6351 = vmatprep.mubr.f32.mxu1 %v5868_v25  ;;  %v14457_v25 = vld [vmem:[#allocation58_spill] sm:$0xff] }
 0x8a8   : > { %9236 = vmatprep.subr.bf16.mxu1 %v14447_v57 }
 0x8ab   : > { %9238 = vmatpush3.bf16.msra.mxu1 %v14448_v3 }
 0x8ac   : > { %9240 = vmatprep.subr.bf16.mxu1 %v14449_v43 }
 0x8af   : > { %9242 = vmatpush3.bf16.msra.mxu1 %v14450_v52 }
 0x8b0   : > { %9244 = vmatprep.subr.bf16.mxu1 %v14451_v20 }
 0x8b3   : > { %9246 = vmatpush3.bf16.msra.mxu1 %v14452_v49 }
 0x8b4   : > { %9248 = vmatprep.subr.bf16.mxu1 %v14453_v13 }
 0x8b7   : > { %9250 = vmatpush3.bf16.msra.mxu1 %v14454_v16 }
 0x8b8   : > { %9252 = vmatprep.subr.bf16.mxu1 %v14455_v60 }
 0x8bb   : > { %9254 = vmatpush3.bf16.msra.mxu1 %v14456_v63 }
 0x8bc   : > { %9256 = vmatprep.subr.bf16.mxu1 %v14457_v25 }
 0x8bf   : > { %9258 = vmatpush3.bf16.msra.mxu1 %v14458_v24 }
 0x8c0   : > { %9260 = vmatprep.subr.bf16.mxu1 %v14459_v50 }
 0x8c3   : > { %9262 = vmatpush3.bf16.msra.mxu1 %v14462_v29 }
 0x8c4   : > { %9264 = vmatprep.subr.bf16.mxu1 %v9263_v55  ;;  %v9281_v55 = vpack.c.bf16 %v14480_v9, %v14479_v21 }
 0x8c6   : > { %6355 = vmatmul.mubr.f32.vlgmr.msra.gmra.mrb[22].mxu1 %v5874_v18  ;;  %v9273_v18 = vpack.c.bf16 %v14472_v8, %v14471_v53 }
 0x8c7   : > { %9266 = vmatpush3.bf16.msra.mxu1 %v9265_v12  ;;  %6521 = vmatprep.mubr.f32.mxu1 %v13138_v14  ;;  %v9287_v12 = vpack.c.bf16 %v14486_v35, %v14485_v28 }
 0x8c8   : > { %9268 = vmatprep.subr.bf16.mxu1 %v9267_v32  ;;  %v9293_v32 = vpack.c.bf16 %v14492_v51, %v14491_v37 }
 0x8cb   : > { %9270 = vmatpush3.bf16.msra.mxu1 %v9269_v48 }
 0x8cc   : > { %9272 = vmatprep.subr.bf16.mxu1 %v9271_v42 }
 0x8cf   : > { %9274 = vmatpush3.bf16.msra.mxu1 %v9273_v18 }
 0x8d0   : > { %9276 = vmatprep.subr.bf16.mxu1 %v9275_v26 }
 0x8d3   : > { %9278 = vmatpush3.bf16.msra.mxu1 %v9277_v62 }
 0x8d4   : > { %9280 = vmatprep.subr.bf16.mxu1 %v9279_v15 }
 0x8d7   : > { %9282 = vmatpush3.bf16.msra.mxu1 %v9281_v55 }
 0x8d8   : > { %9284 = vmatprep.subr.bf16.mxu1 %v9283_v33 }
 0x8db   : > { %9286 = vmatpush3.bf16.msra.mxu1 %v9285_v19 }
 0x8dc   : > { %9288 = vmatprep.subr.bf16.mxu1 %v9287_v12 }
 0x8df   : > { %9290 = vmatpush3.bf16.msra.mxu1 %v9289_v11 }
 0x8e0   : > { %9292 = vmatprep.subr.bf16.mxu1 %v9291_v5 }
 0x8e3   : > { %9294 = vmatpush3.bf16.msra.mxu1 %v9293_v32 }
 0x8e4   : > { %9296 = vmatprep.subr.bf16.mxu1 %v14445_v61 }
 0x8e6   : > { %6523 = vmatmul.mubr.f32.vlgmr.msra.gmra.mrb[24].mxu1 %v13136_v10 }
 0x8e7   : > { %9298 = vmatpush3.bf16.msra.mxu1 %v14446_v31  ;;  %6625 = vmatprep.mubr.f32.mxu1 %v13138_v14 }
 0x8e8   : > { %9300 = vmatprep.subr.bf16.mxu1 %v14447_v57 }
 0x8eb   : > { %9302 = vmatpush3.bf16.msra.mxu1 %v14448_v3  ;;  %v6636_v3 = vld [vmem:[#allocation12] sm:$0xff] }
 0x8ec   : > { %9304 = vmatprep.subr.bf16.mxu1 %v14449_v43  ;;  %v6637_v43 = vld [vmem:[#allocation12 + $0x8] sm:$0xff] }
 0x8ef   : > { %9306 = vmatpush3.bf16.msra.mxu1 %v14450_v52  ;;  %v6638_v52 = vld [vmem:[#allocation12 + $0x10] sm:$0xff] }
 0x8f0   : > { %9308 = vmatprep.subr.bf16.mxu1 %v14451_v20  ;;  %v6652_v20 = vand.u32 4294901760, %v6637_v43 }
 0x8f2   : > { %v13327_v48 = vsub.f32 %v6637_v43, %v6652_v20 }
 0x8f3   : > { %9310 = vmatpush3.bf16.msra.mxu1 %v14452_v49  ;;  %v6639_v49 = vld [vmem:[#allocation12 + $0x18] sm:$0xff] }
 0x8f4   : > { %9312 = vmatprep.subr.bf16.mxu1 %v14453_v13  ;;  %v6655_v13 = vand.u32 4294901760, %v6638_v52  ;;  %v6741_v4 = vand.u32 4294901760, %v13327_v48 }
 0x8f6   : > { %v13329_v59 = vsub.f32 %v6638_v52, %v6655_v13  ;;  %v6742_v58 = vsub.f32 %v13327_v48, %v6741_v4 }
 0x8f7   : > { %9314 = vmatpush3.bf16.msra.mxu1 %v14454_v16  ;;  %v6640_v16 = vld [vmem:[#allocation12 + $0x20] sm:$0xff] }
 0x8f8   : > { %9316 = vmatprep.subr.bf16.mxu1 %v14455_v60  ;;  %v6641_v60 = vld [vmem:[#allocation12 + $0x28] sm:$0xff]  ;;  %v6748_v15 = vand.u32 4294901760, %v13329_v59  ;;  %v6743_v55 = vand.u32 4294901760, %v6742_v58  ;;  %v7186_v58 = vstv %s7347_s4 }
 0x8fa   : > { %v6749_v34 = vsub.f32 %v13329_v59, %v6748_v15 }
 0x8fb   : > { %9318 = vmatpush3.bf16.msra.mxu1 %v14456_v63  ;;  %v6658_v63 = vand.u32 4294901760, %v6639_v49 }
 0x8fc   : > { %9320 = vmatprep.subr.bf16.mxu1 %v14457_v25  ;;  %v6661_v25 = vand.u32 4294901760, %v6640_v16  ;;  %v6750_v44 = vand.u32 4294901760, %v6749_v34 }
 0x8fd   : > { %v13331_v0 = vsub.f32 %v6639_v49, %v6658_v63  ;;  %v13336_v53 = vpack.c.bf16 %v6658_v63, %v6655_v13 }
 0x8fe   : > { %v13333_v42 = vsub.f32 %v6640_v16, %v6661_v25 }
 0x8ff   : > { %9322 = vmatpush3.bf16.msra.mxu1 %v14458_v24  ;;  %v6664_v24 = vand.u32 4294901760, %v6641_v60  ;;  %v6755_v21 = vand.u32 4294901760, %v13331_v0 }
 0x900   : > { %9324 = vmatprep.subr.bf16.mxu1 %v14459_v50  ;;  %v6642_v50 = vld [vmem:[#allocation12 + $0x30] sm:$0xff]  ;;  %v6762_v28 = vand.u32 4294901760, %v13333_v42 }
 0x901   : > { %v13338_v8 = vsub.f32 %v6641_v60, %v6664_v24  ;;  %v6667_v18 = vand.u32 4294901760, %v6642_v50  ;;  %v13348_v62 = vpack.c.bf16 %v6664_v24, %v6661_v25  ;;  %v6756_v36 = vsub.f32 %v13331_v0, %v6755_v21 }
 0x902   : > { %v6763_v30 = vsub.f32 %v13333_v42, %v6762_v28  ;;  %v9379_v60 = vpack.c.bf16 %v6755_v21, %v6748_v15 }
 0x903   : > { %9326 = vmatpush3.bf16.msra.mxu1 %v14462_v29  ;;  %v6643_v29 = vld [vmem:[#allocation12 + $0x38] sm:$0xff]  ;;  %v13341_v23 = vsub.f32 %v6642_v50, %v6667_v18  ;;  %v6757_v19 = vand.u32 4294901760, %v6756_v36  ;;  %v6769_v35 = vand.u32 4294901760, %v13338_v8  ;;  %v9358_v43 = vpack.c.bf16 %v13338_v8, %v13333_v42 }
 0x904   : > { %9327 = vmatprep.subr.bf16.mxu1 %v14493_v6  ;;  %v6670_v2 = vand.u32 4294901760, %v6643_v29  ;;  %v6764_v11 = vand.u32 4294901760, %v6763_v30 }
 0x905   : > { %v9343_v12 = vpack.c.bf16 %v6757_v19, %v6750_v44  ;;  %v6770_v39 = vsub.f32 %v13338_v8, %v6769_v35  ;;  %v6776_v46 = vand.u32 4294901760, %v13341_v23 }
 0x906   : > { %6627 = vmatmul.mubr.f32.vlgmr.msra.gmra.mrb[26].mxu1 %v13136_v10  ;;  %v6649_v10 = vand.u32 4294901760, %v6636_v3  ;;  %v13343_v26 = vsub.f32 %v6643_v29, %v6670_v2  ;;  %v13358_v33 = vpack.c.bf16 %v6670_v2, %v6667_v18 }
 0x907   : > { %8017 = vmatprep.mubr.msk.f32.mxu1 %vm9817_vm11, %v14494_v1  ;;  %v6771_v5 = vand.u32 4294901760, %v6770_v39  ;;  %v6777_v51 = vsub.f32 %v13341_v23, %v6776_v46 }
 0x908   : > { %v13323_v7 = vpack.c.bf16 %v6652_v20, %v6649_v10  ;;  %v13325_v54 = vsub.f32 %v6636_v3, %v6649_v10  ;;  %v6783_v40 = vand.u32 4294901760, %v13343_v26  ;;  %v9355_v3 = vpack.c.bf16 %v13331_v0, %v13329_v59 }
 0x909   : > { %v9361_v52 = vpack.c.bf16 %v13343_v26, %v13341_v23  ;;  %v6633_v0 = vstv %s7346_s19 }
 0x90a   : > { %9329 = vmatpush3.bf16.msra.mxu1 %v13323_v7  ;;  %v6734_v22 = vand.u32 4294901760, %v13325_v54  ;;  %v6784_v32 = vsub.f32 %v13343_v26, %v6783_v40  ;;  %v9385_v63 = vpack.c.bf16 %v6783_v40, %v6776_v46 }
 0x90b   : > { %9330 = vmatprep.subr.bf16.mxu1 %v14493_v6 }
 0x90c   : > { %v6735_v38 = vsub.f32 %v13325_v54, %v6734_v22  ;;  %v9376_v16 = vpack.c.bf16 %v6741_v4, %v6734_v22 }
 0x90e   : > { %9332 = vmatpush3.bf16.msra.mxu1 %v13336_v53  ;;  %v6736_v9 = vand.u32 4294901760, %v6735_v38 }
 0x90f   : > { %9333 = vmatprep.subr.bf16.mxu1 %v14493_v6 }
 0x910   : > { %v9340_v17 = vpack.c.bf16 %v6743_v55, %v6736_v9  ;;  %v7190_v9 = vstv %s7348_s30 }
 0x912   : > { %9335 = vmatpush3.bf16.msra.mxu1 %v13348_v62 }
 0x913   : > { %9336 = vmatprep.subr.bf16.mxu1 %v14493_v6 }
 0x916   : > { %9338 = vmatpush3.bf16.msra.mxu1 %v13358_v33 }
 0x917   : > { %9339 = vmatprep.subr.bf16.mxu1 %v14493_v6 }
 0x939   : > { %v7655_v45 = vpop.f32.mrb[16].mxu1 }
 0x93a   : > { %v7656_v14 = vpop.f32.mrb[17].mxu1 }
 0x93b   : > { %v7657_v27 = vadd.f32 %v7656_v14, %v7655_v45  ;;  %v9346_v14 = vpack.c.bf16 %v6771_v5, %v6764_v11 }
 0x93d   : > { %v5879_v61 = vadd.f32 %v7657_v27, %v5769_v47  ;;  %v6778_v47 = vand.u32 4294901760, %v6777_v51 }
 0x959   : > { %v7690_v41 = vpop.f32.mrb[18].mxu1 }
 0x95a   : > { %v7691_v56 = vpop.f32.mrb[19].mxu1 }
 0x95b   : > { %v7692_v31 = vadd.f32 %v7691_v56, %v7690_v41  ;;  %v6785_v41 = vand.u32 4294901760, %v6784_v32 }
 0x95d   : > { %v13321_v57 = vadd.f32 %v7692_v31, %v5879_v61  ;;  %v9349_v61 = vpack.c.bf16 %v6785_v41, %v6778_v47  ;;  %v9352_v31 = vpack.c.bf16 %v13327_v48, %v13325_v54 }
 0x979   : > { %v7725_v37 = vpop.f32.mrb[20].mxu1 }
 0x97a   : > { %v7726_v45 = vpop.f32.mrb[21].mxu1 }
 0x97b   : > { %v7727_v27 = vadd.f32 %v7726_v45, %v7725_v37 }
 0x97d   : > { %v6249_v56 = vadd.f32 %v7727_v27, %v13321_v57  ;;  %v9382_v57 = vpack.c.bf16 %v6769_v35, %v6762_v28 }
 0x999   : > { %v7760_v10 = vpop.f32.mrb[22].mxu1 }
 0x99a   : > { %v7761_v20 = vpop.f32.mrb[23].mxu1 }
 0x99b   : > { %v7762_v49 = vadd.f32 %v7761_v20, %v7760_v10 }
 0x99d   : > { %v6357_v13 = vadd.f32 %v7762_v49, %v6249_v56 }
 0x9b9   : > { %v7795_v25 = vpop.f32.mrb[24].mxu1 }
 0x9ba   : > { %v7796_v24 = vpop.f32.mrb[25].mxu1 }
 0x9bb   : > { %v7797_v50 = vadd.f32 %v7796_v24, %v7795_v25 }
 0x9bd   : > { %v6525_v29 = vadd.f32 %v7797_v50, %v6357_v13 }
 0x9d9   : > { %v7830_v54 = vpop.f32.mrb[26].mxu1 }
 0x9da   : > { %v7831_v48 = vpop.f32.mrb[27].mxu1 }
 0x9db   : > { %v7832_v59 = vadd.f32 %v7831_v48, %v7830_v54 }
 0x9dd   : > { %v6629_v42 = vadd.f32 %v7832_v59, %v6525_v29 }
 0x9df   : > { %vm6632_vm15 = vcmp.gt.f32.partialorder %v6629_v42, 0.0  ;;  %v6634_v8 = vmul.f32 %v6633_v0, %v6629_v42 }
 0x9e1   : > { %v6635_v18 = vsel %vm6632_vm15, %v6629_v42, %v6634_v8 }
 0x9e2   : > { %v6646_v2 = vsel %vm1062_vm0, %v6635_v18, 0 }
 0x9e3   : > { %v6721_v23 = vand.u32 4294901760, %v6646_v2 }
 0x9e5   : > { %v6722_v26 = vsub.f32 %v6646_v2, %v6721_v23 }
 0x9e7   : > { %v6723_v22 = vand.u32 4294901760, %v6722_v26 }
 0x9e9   : > { %v6724_v4 = vsub.f32 %v6722_v26, %v6723_v22 }
 0x9eb   : > { %v6725_v38 = vand.u32 4294901760, %v6724_v4 }
 0x9ed   : > { %8018 = vmatmul.mubr.f32.vlgmr.msra.gmra.mrb[28].mxu1 %v6725_v38 }
 0x9ee   : > { %9341 = vmatpush3.bf16.msra.mxu1 %v9340_v17  ;;  %8036 = vmatprep.mubr.msk.f32.mxu1 %vm9817_vm11, %v14494_v1 }
 0x9ef   : > { %9342 = vmatprep.subr.bf16.mxu1 %v14493_v6 }
 0x9f2   : > { %9344 = vmatpush3.bf16.msra.mxu1 %v9343_v12 }
 0x9f3   : > { %9345 = vmatprep.subr.bf16.mxu1 %v14493_v6 }
 0x9f6   : > { %9347 = vmatpush3.bf16.msra.mxu1 %v9346_v14 }
 0x9f7   : > { %9348 = vmatprep.subr.bf16.mxu1 %v14493_v6 }
 0x9fa   : > { %9350 = vmatpush3.bf16.msra.mxu1 %v9349_v61 }
 0x9fb   : > { %9351 = vmatprep.subr.bf16.mxu1 %v14493_v6 }
 0x9fd   : > { %8037 = vmatmul.mubr.f32.vlgmr.msra.gmra.mrb[28].mxu1 %v6721_v23 }
 0x9fe   : > { %9353 = vmatpush3.bf16.msra.mxu1 %v9352_v31  ;;  %8055 = vmatprep.mubr.msk.f32.mxu1 %vm9817_vm11, %v14494_v1 }
 0x9ff   : > { %9354 = vmatprep.subr.bf16.mxu1 %v14493_v6 }
 0xa02   : > { %9356 = vmatpush3.bf16.msra.mxu1 %v9355_v3 }
 0xa03   : > { %9357 = vmatprep.subr.bf16.mxu1 %v14493_v6 }
 0xa06   : > { %9359 = vmatpush3.bf16.msra.mxu1 %v9358_v43 }
 0xa07   : > { %9360 = vmatprep.subr.bf16.mxu1 %v14493_v6 }
 0xa0a   : > { %9362 = vmatpush3.bf16.msra.mxu1 %v9361_v52 }
 0xa0b   : > { %9363 = vmatprep.subr.bf16.mxu1 %v14493_v6 }
 0xa0d   : > { %8056 = vmatmul.mubr.f32.vlgmr.msra.gmra.mrb[28].mxu1 %v6722_v26 }
 0xa0e   : > { %9365 = vmatpush3.bf16.msra.mxu1 %v13323_v7  ;;  %8074 = vmatprep.mubr.msk.f32.mxu1 %vm9817_vm11, %v14494_v1 }
 0xa0f   : > { %9366 = vmatprep.subr.bf16.mxu1 %v14493_v6 }
 0xa12   : > { %9368 = vmatpush3.bf16.msra.mxu1 %v13336_v53 }
 0xa13   : > { %9369 = vmatprep.subr.bf16.mxu1 %v14493_v6 }
 0xa16   : > { %9371 = vmatpush3.bf16.msra.mxu1 %v13348_v62 }
 0xa17   : > { %9372 = vmatprep.subr.bf16.mxu1 %v14493_v6 }
 0xa1a   : > { %9374 = vmatpush3.bf16.msra.mxu1 %v13358_v33 }
 0xa1b   : > { %9375 = vmatprep.subr.bf16.mxu1 %v14493_v6 }
 0xa1d   : > { %8075 = vmatmul.mubr.f32.vlgmr.msra.gmra.mrb[28].mxu1 %v6723_v22 }
 0xa1e   : > { %9377 = vmatpush3.bf16.msra.mxu1 %v9376_v16  ;;  %8093 = vmatprep.mubr.msk.f32.mxu1 %vm9817_vm11, %v14494_v1 }
 0xa1f   : > { %9378 = vmatprep.subr.bf16.mxu1 %v14493_v6 }
 0xa22   : > { %9380 = vmatpush3.bf16.msra.mxu1 %v9379_v60 }
 0xa23   : > { %9381 = vmatprep.subr.bf16.mxu1 %v14493_v6 }
 0xa26   : > { %9383 = vmatpush3.bf16.msra.mxu1 %v9382_v57 }
 0xa27   : > { %9384 = vmatprep.subr.bf16.mxu1 %v14493_v6 }
 0xa2a   : > { %9386 = vmatpush3.bf16.msra.mxu1 %v9385_v63 }
 0xa2b   : > { %9387 = vmatprep.subr.bf16.mxu1 %v14493_v6 }
 0xa2d   : > { %8094 = vmatmul.mubr.f32.vlgmr.msra.gmra.mrb[28].mxu1 %v6721_v23 }
 0xa2e   : > { %9389 = vmatpush3.bf16.msra.mxu1 %v13323_v7  ;;  %8112 = vmatprep.mubr.msk.f32.mxu1 %vm9817_vm11, %v14494_v1  ;;  %v6644_v7 = vld [vmem:[%s13484_s13] sm:$0x1] }
 0xa2f   : > { %9390 = vmatprep.subr.bf16.mxu1 %v14493_v6 }
 0xa32   : > { %9392 = vmatpush3.bf16.msra.mxu1 %v13336_v53 }
 0xa33   : > { %9393 = vmatprep.subr.bf16.mxu1 %v14493_v6 }
 0xa36   : > { %9395 = vmatpush3.bf16.msra.mxu1 %v13348_v62 }
 0xa37   : > { %9396 = vmatprep.subr.bf16.mxu1 %v14493_v6 }
 0xa3a   : > { %9398 = vmatpush3.bf16.msra.mxu1 %v13358_v33 }
 0xa3d   : > { %8113 = vmatmul.mubr.f32.vlgmr.msra.gmra.mrb[28].mxu1 %v6721_v23 }
 0xb10   : > { %v7181_v1 = vpop.f32.mrb[28].mxu1 }
 0xb11   : > { %v9408_v15 = vadd.f32 %v7181_v1, %v6644_v7  ;;  %v8114_v21 = vpop.f32.mrb[29].mxu1 }
 0xb13   : > { %vm7185_vm3 = vcmp.gt.f32.partialorder %v9408_v15, 0.0  ;;  %v7187_v53 = vmul.f32 %v9408_v15, %v7186_v58 }
 0xb15   : > { %v7188_v55 = vsel %vm7185_vm3, %v9408_v15, %v7187_v53 }
 0xb16   : > { %vm7189_vm4 = vcmp.gt.f32.partialorder %v7188_v55, 0.0  ;;  %v7191_v6 = vmul.f32 %v7190_v9, %v7188_v55 }
 0xb18   : > { %v7192_v62 = vsel %vm7189_vm4, %v7188_v55, %v7191_v6 }
 0xb19   : > { %v7194_v34 = vsel %vm7193_vm5, %v7192_v62, -inf }
 0xb1a   : > { %7195 = vmax.xlane.f32.xlu0 %v7194_v34 }
 0xba7   : > { %v7196_v36 = vpop.xlane.xlu0 %7195 }
 0xba8   : > { %v7197_v33 = vsub.f32 %v7192_v62, %v7196_v36 }
 0xbaa   : > { %v7198_v17 = vmul.f32 1.442695, %v7197_v33 }
 0xbac   : > { %9592 = vpow2.f32 %v7198_v17 }
 0xbb6   : > { %v9593_v44 = vpop.eup %9592 }
 0xbb7   : > { %v7200_v19 = vsel %vm7193_vm5, %v9593_v44, 0.0 }
 0xbb8   : > { %7201 = vadd.xlane.f32.xlu1 %v7200_v19 }
 0xc45   : > { %v7202_v28 = vpop.xlane.xlu1 %7201 }
 0xc46   : > { %9594 = vrcp.f32 %v7202_v28 }
 0xc50   : > { %v9595_v35 = vpop.eup %9594 }
 0xc51   : > { %v7204_v12 = vmul.f32 %v9595_v35, %v9593_v44 }
 0xc53   : > { %7205 = vst.msk [vmem:[%s532_s16] sm:$0x1] %vm7193_vm5, %v7204_v12 }
 0xc54   : > { %9736 = shalt.err (!%p9733_p7)
}
 0xc55   : > { %s9737_s19 = scalar_lea.hbm %s13428_s24, 16  ;;  %s9741_s25 = scalar_lea.hbm %s14497_s27, 32 }
 0xc56   : > { %p9738_p8 = scmp.ne.s32.totalorder %s13428_s24, %s9737_s19  ;;  %p9742_p13 = scmp.lt.u32.totalorder %s13428_s24, %s14497_s27 }
 0xc57   : > { %p9743_p5 = scmp.lt.u32.totalorder %s9741_s25, %s9737_s19  ;;  %p9745_p9 = scmp.lt.u32.totalorder %s9737_s19, %s13428_s24 }
 0xc58   : > { %p9739_p11 = pnand %p9738_p8, %p14498_p10 }
 0xc59   : > { %p9744_p6 = por %p9743_p5, %p9742_p13 }
 0xc5a   : > { %p9740_p12 = pneg %p9739_p11 }
 0xc5b   : > { %p9746_p1 = por %p9745_p9, %p9744_p6 }
 0xc5d   : > { %p9747_p2 = pnand %p9746_p1, %p9740_p12 }
 0xc5f   : > { %9750 = shalt.err (!%p9747_p2)
}
 0xc60   : > { %9509 = dma.vmem_to_hbm [thread:$0]  (%p14498_p10), %s13430_s14, 16, %s13428_s24, %s7207_s26  }
 0xc61 PF: > { %s14499_s29 = sld [smem:[#allocation23_spill]]  ;;  %s14500_s6 = sld [smem:[#allocation20_spill]] }
 0xc62   : > { %s14501_s16 = sld [smem:[#allocation27_spill]] }
 0xc67   : > { %p9541_p3 = scmp.ge.s32.totalorder %s14499_s29, 2  ;;  %s7231_s23 = sand.u32 1, %s14500_s6  }
 0xc68   : > { %p14502_p0 = scmp.ne.s32.totalorder %s14501_s16, 0  ;;  %s7232_s22 = scalar_lea.sflag [#allocation6], %s7231_s23 }
 0xc6a   : > { %p9528_p4 = pnand %p9541_p3, %p14502_p0 }
 0xc6c   : > { %9784 = dma.done.wait (!%p9528_p4), %s7232_s22, 16  }
 0xc6d   : > { %9786 = vsyncadd (!%p9528_p4), %s7232_s22, 4294967280  ;;  %s14503_s16 = sld [smem:[#allocation24_spill]]  ;;  %s14504_s29 = sld [smem:[#allocation21_spill]] }
 0xc6e   : > { %s14505_s30 = sld [smem:[#allocation22_spill]]  ;;  %s14506_s15 = sld [smem:[#allocation25_spill]] }
 0xc73   : > { %p28_p7 = scmp.ge.s32.totalorder %s14503_s16, 4  }
 0xc75   :  { %30 = sbr.rel (!%p28_p7) target bundleno = 12 (0xc), region = 151 }
 0xc7c   :  { %7236 = vsyncpa [#allocation5], 1 }
 0xc7d   :  { %7238 = vsyncpa [#allocation5 + $0x1], 1 }
 0xc7e   :  { %7239 = vsyncpa [#allocation10], 1 }
 0xc7f   :  { %7240 = vsyncpa [#allocation13], 1 }
 0xc80   :  { %7241 = vsyncpa [#allocation6], 1 }
 0xc81   :  { %7243 = vsyncpa [#allocation6 + $0x1], 1 }
 0xc82   :  { %7244 = vsyncpa [#allocation7], 1 }
 0xc83   :  { %7246 = vsyncpa [#allocation7 + $0x1], 1 }

</bundles_post_ra>
